<compile_context>
chip_gen: v7x
topology: tpu7x:2x2x1
jax: 0.10.0
libtpu: 0.0.40
codegen_flags: <defaults>
</compile_context>

<pallas_src>
import jax
import jax.numpy as jnp
from jax.experimental import pallas as pl
from jax.experimental.pallas import tpu as pltpu

KERNEL = 3          # Conv1d kernel size
POOL = 16           # MaxPool1d kernel / stride
CONV_OUT_CH = 10    # Conv1d out_channels
LANE_PAD = 256      # pooled-length padding (>= 188, multiple of 128)
TB = 8              # batch elements per grid step


# ---------------------------------------------------------------------------
# Fused kernel: conv1d + relu + maxpool16 + linear + relu + linear
# TB batch elements per grid step; batch lives on sublanes everywhere.
# ---------------------------------------------------------------------------
def fused_convnet_kernel(xcol_ref, wblk_ref, bc_ref, w1_ref, b1_ref,
                         w2_ref, b2_ref, out_ref):
    # xcol_ref: (TB*C*K, 16*256)  im2col of TB elements, stacked on sublanes
    # wblk_ref: (10*TB, TB*C*K)   block-diag conv weight: rows (c,t), cols (t,ck)
    # bc_ref  : (10*TB, 1)        conv bias repeated over t
    # w1_ref  : (10, 256, H)      Linear1 weight (torch flatten order), p zero-padded
    # b1_ref  : (1, H)
    # w2_ref  : (H, 128)          Linear2 weight, output padded to 128 lanes
    # b2_ref  : (1, 128)
    # out_ref : (TB, 128)
    wblk = wblk_ref[...]                                   # (80, 96)

    # Conv1d fused with MaxPool1d(16): window j of every element lives in the
    # lane-aligned slice [j*256, (j+1)*256); 16 dots, max-accumulated.
    acc = jnp.dot(wblk, xcol_ref[:, 0:LANE_PAD],
                  preferred_element_type=jnp.float32)      # (80, 256)
    for j in range(1, POOL):
        acc = jnp.maximum(
            acc,
            jnp.dot(wblk, xcol_ref[:, j * LANE_PAD:(j + 1) * LANE_PAD],
                    preferred_element_type=jnp.float32))

    # Conv bias + ReLU hoisted out of the pool loop (max commutes with +const,
    # ReLU is monotone); torch's post-pool ReLU is redundant.
    pooled = jnp.maximum(acc + bc_ref[...], 0.0)           # (80, 256), rows (c,t)

    # Linear(1880, H): 10 sublane-aligned (TB,256)@(256,H) dots, M = TB.
    # Padded positions carry zero weights in w1_ref, so they cancel exactly.
    h = jnp.dot(pooled[0:TB, :], w1_ref[0], preferred_element_type=jnp.float32)
    for c in range(1, CONV_OUT_CH):
        h = h + jnp.dot(pooled[c * TB:(c + 1) * TB, :], w1_ref[c],
                        preferred_element_type=jnp.float32)
    h = jnp.maximum(h + b1_ref[...], 0.0)                  # (TB, H)

    # Linear(H, O) with O padded to 128 lanes -> lane-dense unmasked store.
    out_ref[...] = (jnp.dot(h, w2_ref[...], preferred_element_type=jnp.float32)
                    + b2_ref[...])


# ---------------------------------------------------------------------------
# Wrapper
# ---------------------------------------------------------------------------
@jax.jit
def convolutional_network_forward(x, params):
    """x: (B, C, L) float32 NCW. Returns logits (B, out_features)."""
    wc, bc, w1, b1, w2, b2 = (params[k] for k in ("wc", "bc", "w1", "b1", "w2", "b2"))
    B, C, L = x.shape
    lp = (L - (KERNEL - 1)) // POOL                        # pooled length (188)
    assert CONV_OUT_CH * lp == w1.shape[0], "in_features=1880 pins L to 3010"
    H = w1.shape[1]
    O = w2.shape[1]
    O_PAD = 128
    CK = C * KERNEL

    # Pad the batch to a multiple of TB (padded rows compute finite garbage,
    # sliced off below).  Demo batch (16) gives an even grid of 2 for v7x.
    NB = -(-B // TB)
    BP = NB * TB
    if BP != B:
        x = jnp.pad(x, ((0, BP - B), (0, 0), (0, 0)))

    # --- im2col via static slices (no gather) --------------------------------
    # xcol[b, c*K+k, j*256+p] = x[b, c, 16*p + j + k]   (zero for p >= 188)
    slabs = []
    for k in range(KERNEL):
        s = jax.lax.slice_in_dim(x, k, k + POOL * lp, axis=2)   # (BP, C, 16*lp)
        s = s.reshape(BP, C, lp, POOL)
        slabs.append(jnp.swapaxes(s, -1, -2))                   # (BP, C, 16, lp)
    xg = jnp.stack(slabs, axis=2)                               # (BP, C, K, 16, lp)
    xg = jnp.pad(xg, ((0, 0),) * 4 + ((0, LANE_PAD - lp),))     # (BP, C, K, 16, 256)
    # Rows of a TB-block are ordered (t, c, k); this is a pure reshape.
    xcol = xg.reshape(NB * TB * CK, POOL * LANE_PAD)            # (NB*96, 4096)

    # --- block-diagonal conv weight: batch goes into the MXU M dimension -----
    wck = wc.reshape(CONV_OUT_CH, CK)                           # (10, 12)
    eye_tb = jnp.eye(TB, dtype=x.dtype)
    w_blk = (wck[:, None, None, :] * eye_tb[None, :, :, None]
             ).reshape(CONV_OUT_CH * TB, TB * CK)               # (80, 96)
    bc_rep = jnp.repeat(bc, TB).reshape(CONV_OUT_CH * TB, 1)    # (80, 1)

    # Linear1 weight: torch flatten order c*188+p -> (10, 188, H), pad p to 256.
    w1p = jnp.pad(w1.reshape(CONV_OUT_CH, lp, H),
                  ((0, 0), (0, LANE_PAD - lp), (0, 0)))         # (10, 256, H)
    b1r = b1.reshape(1, H)
    # (b1/b2/bc kept as separate tiny constant blocks: H is a free module
    #  parameter, so packing them into one 128-lane row is not generic.)

    # Linear2 weight / bias padded to 128 output lanes.
    w2p = jnp.pad(w2, ((0, 0), (0, O_PAD - O)))                 # (H, 128)
    b2p = jnp.pad(b2.reshape(1, O), ((0, 0), (0, O_PAD - O)))   # (1, 128)

    cost = pl.CostEstimate(
        flops=2 * NB * (CONV_OUT_CH * TB * TB * CK * POOL * LANE_PAD
                        + TB * CONV_OUT_CH * LANE_PAD * H
                        + TB * H * O_PAD),
        transcendentals=0,
        bytes_accessed=4 * (xcol.size + BP * O_PAD
                            + NB * (w_blk.size + bc_rep.size + w1p.size
                                    + b1r.size + w2p.size + b2p.size)),
    )

    out_pad = pl.pallas_call(
        fused_convnet_kernel,
        out_shape=jax.ShapeDtypeStruct((BP, O_PAD), jnp.float32),
        grid_spec=pltpu.PrefetchScalarGridSpec(
            num_scalar_prefetch=0,
            grid=(NB,),
            in_specs=[
                pl.BlockSpec((TB * CK, POOL * LANE_PAD), lambda g: (g, 0)),
                pl.BlockSpec((CONV_OUT_CH * TB, TB * CK), lambda g: (0, 0)),
                pl.BlockSpec((CONV_OUT_CH * TB, 1), lambda g: (0, 0)),
                pl.BlockSpec((CONV_OUT_CH, LANE_PAD, H), lambda g: (0, 0, 0)),
                pl.BlockSpec((1, H), lambda g: (0, 0)),
                pl.BlockSpec((H, O_PAD), lambda g: (0, 0)),
                pl.BlockSpec((1, O_PAD), lambda g: (0, 0)),
            ],
            out_specs=pl.BlockSpec((TB, O_PAD), lambda g: (g, 0)),
        ),
        compiler_params=pltpu.CompilerParams(
            dimension_semantics=("parallel",)),
        cost_estimate=cost,
    )(xcol, w_blk, bc_rep, w1p, b1r, w2p, b2p)

    return out_pad[:B, :O]


# ---------------------------------------------------------------------------
# Pure-JAX reference (same math, XLA ops, highest matmul precision)
# ---------------------------------------------------------------------------
def reference_forward(x, params):
    wc, bc, w1, b1, w2, b2 = (params[k] for k in ("wc", "bc", "w1", "b1", "w2", "b2"))
    hi = jax.lax.Precision.HIGHEST
    out = jax.lax.conv_general_dilated(
        x, wc, window_strides=(1,), padding="VALID",
        dimension_numbers=("NCH", "OIH", "NCH"), precision=hi)
    out = jnp.maximum(out + bc[None, :, None], 0.0)
    B, Oc, Lo = out.shape
    lp = Lo // POOL
    out = out[:, :, : lp * POOL].reshape(B, Oc, lp, POOL).max(axis=-1)
    out = jnp.maximum(out, 0.0)
    flat = out.reshape(B, -1)
    h = jnp.maximum(jnp.dot(flat, w1, precision=hi) + b1, 0.0)
    return jnp.dot(h, w2, precision=hi) + b2


if __name__ == "__main__":
    # Module hyperparameters (L = 3010 is forced by linear in_features=1880).
    B, C, L = 16, 4, 3010
    hidden_features, out_features = 32, 8
    flat_features = CONV_OUT_CH * ((L - (KERNEL - 1)) // POOL)   # == 1880
    assert flat_features == 1880

    key = jax.random.PRNGKey(0)
    k_x, k_wc, k_bc, k_w1, k_b1, k_w2, k_b2 = jax.random.split(key, 7)

    x = jax.random.normal(k_x, (B, C, L), dtype=jnp.float32)
    params = {
        "wc": 0.1 * jax.random.normal(k_wc, (CONV_OUT_CH, C, KERNEL), jnp.float32),
        "bc": 0.1 * jax.random.normal(k_bc, (CONV_OUT_CH,), jnp.float32),
        "w1": 0.05 * jax.random.normal(k_w1, (flat_features, hidden_features), jnp.float32),
        "b1": 0.05 * jax.random.normal(k_b1, (hidden_features,), jnp.float32),
        "w2": 0.05 * jax.random.normal(k_w2, (hidden_features, out_features), jnp.float32),
        "b2": 0.05 * jax.random.normal(k_b2, (out_features,), jnp.float32),
    }

    out = jax.block_until_ready(convolutional_network_forward(x, params))
    ref = jax.block_until_ready(reference_forward(x, params))

    assert out.shape == (B, out_features), out.shape
    max_diff = float(jnp.max(jnp.abs(out - ref)))
    assert jnp.allclose(out, ref, atol=5e-3, rtol=5e-3), f"max abs diff {max_diff}"
    print("KERNEL_OK")
</pallas_src>

<mosaic_0001>
module attributes {stable_mosaic.version = 11 : i64} {
  func.func @fused_convnet_kernel(%arg0: i32, %arg1: memref<96x4096xf32, #tpu.memory_space<vmem>>, %arg2: memref<80x96xf32, #tpu.memory_space<vmem>>, %arg3: memref<80x1xf32, #tpu.memory_space<vmem>>, %arg4: memref<10x256x32xf32, #tpu.memory_space<vmem>>, %arg5: memref<1x32xf32, #tpu.memory_space<vmem>>, %arg6: memref<32x128xf32, #tpu.memory_space<vmem>>, %arg7: memref<1x128xf32, #tpu.memory_space<vmem>>, %arg8: memref<8x128xf32, #tpu.memory_space<vmem>>) attributes {dimension_semantics = [#tpu.dimension_semantics<parallel>], iteration_bounds = array<i64: 2>, scalar_prefetch = 0 : i64, scratch_operands = 0 : i64, tpu.core_type = #tpu.core_type<tc>, window_params = [{transform_indices = @transform_0, window_bounds = array<i64: 96, 4096>}, {pipeline_mode = #tpu.pipeline_mode<synchronous>, transform_indices = @transform_1, window_bounds = array<i64: 80, 96>}, {pipeline_mode = #tpu.pipeline_mode<synchronous>, transform_indices = @transform_2, window_bounds = array<i64: 80, 1>}, {pipeline_mode = #tpu.pipeline_mode<synchronous>, transform_indices = @transform_3, window_bounds = array<i64: 10, 256, 32>}, {pipeline_mode = #tpu.pipeline_mode<synchronous>, transform_indices = @transform_4, window_bounds = array<i64: 1, 32>}, {pipeline_mode = #tpu.pipeline_mode<synchronous>, transform_indices = @transform_5, window_bounds = array<i64: 32, 128>}, {pipeline_mode = #tpu.pipeline_mode<synchronous>, transform_indices = @transform_6, window_bounds = array<i64: 1, 128>}, {transform_indices = @transform_7, window_bounds = array<i64: 8, 128>}]} {
    %c0 = arith.constant 0 : index
    %c0_0 = arith.constant 0 : index
    %0 = vector.load %arg2[%c0, %c0_0] : memref<80x96xf32, #tpu.memory_space<vmem>>, vector<80x96xf32>
    %c0_1 = arith.constant 0 : index
    %c0_2 = arith.constant 0 : index
    %1 = vector.load %arg1[%c0_1, %c0_2] : memref<96x4096xf32, #tpu.memory_space<vmem>>, vector<96x256xf32>
    %cst = arith.constant dense<0.000000e+00> : vector<80x256xf32>
    %2 = tpu.matmul %0, %1, %cst {dimension_numbers = #tpu.dot_dimension_numbers<[1], [0], [0], [1], [0, 0, 1, 1], [], []>} : vector<80x96xf32>, vector<96x256xf32>, vector<80x256xf32> -> vector<80x256xf32>
    %c0_3 = arith.constant 0 : index
    %c256 = arith.constant 256 : index
    %3 = vector.load %arg1[%c0_3, %c256] : memref<96x4096xf32, #tpu.memory_space<vmem>>, vector<96x256xf32>
    %cst_4 = arith.constant dense<0.000000e+00> : vector<80x256xf32>
    %4 = tpu.matmul %0, %3, %cst_4 {dimension_numbers = #tpu.dot_dimension_numbers<[1], [0], [0], [1], [0, 0, 1, 1], [], []>} : vector<80x96xf32>, vector<96x256xf32>, vector<80x256xf32> -> vector<80x256xf32>
    %5 = arith.maximumf %2, %4 : vector<80x256xf32>
    %c0_5 = arith.constant 0 : index
    %c512 = arith.constant 512 : index
    %6 = vector.load %arg1[%c0_5, %c512] : memref<96x4096xf32, #tpu.memory_space<vmem>>, vector<96x256xf32>
    %cst_6 = arith.constant dense<0.000000e+00> : vector<80x256xf32>
    %7 = tpu.matmul %0, %6, %cst_6 {dimension_numbers = #tpu.dot_dimension_numbers<[1], [0], [0], [1], [0, 0, 1, 1], [], []>} : vector<80x96xf32>, vector<96x256xf32>, vector<80x256xf32> -> vector<80x256xf32>
    %8 = arith.maximumf %5, %7 : vector<80x256xf32>
    %c0_7 = arith.constant 0 : index
    %c768 = arith.constant 768 : index
    %9 = vector.load %arg1[%c0_7, %c768] : memref<96x4096xf32, #tpu.memory_space<vmem>>, vector<96x256xf32>
    %cst_8 = arith.constant dense<0.000000e+00> : vector<80x256xf32>
    %10 = tpu.matmul %0, %9, %cst_8 {dimension_numbers = #tpu.dot_dimension_numbers<[1], [0], [0], [1], [0, 0, 1, 1], [], []>} : vector<80x96xf32>, vector<96x256xf32>, vector<80x256xf32> -> vector<80x256xf32>
    %11 = arith.maximumf %8, %10 : vector<80x256xf32>
    %c0_9 = arith.constant 0 : index
    %c1024 = arith.constant 1024 : index
    %12 = vector.load %arg1[%c0_9, %c1024] : memref<96x4096xf32, #tpu.memory_space<vmem>>, vector<96x256xf32>
    %cst_10 = arith.constant dense<0.000000e+00> : vector<80x256xf32>
    %13 = tpu.matmul %0, %12, %cst_10 {dimension_numbers = #tpu.dot_dimension_numbers<[1], [0], [0], [1], [0, 0, 1, 1], [], []>} : vector<80x96xf32>, vector<96x256xf32>, vector<80x256xf32> -> vector<80x256xf32>
    %14 = arith.maximumf %11, %13 : vector<80x256xf32>
    %c0_11 = arith.constant 0 : index
    %c1280 = arith.constant 1280 : index
    %15 = vector.load %arg1[%c0_11, %c1280] : memref<96x4096xf32, #tpu.memory_space<vmem>>, vector<96x256xf32>
    %cst_12 = arith.constant dense<0.000000e+00> : vector<80x256xf32>
    %16 = tpu.matmul %0, %15, %cst_12 {dimension_numbers = #tpu.dot_dimension_numbers<[1], [0], [0], [1], [0, 0, 1, 1], [], []>} : vector<80x96xf32>, vector<96x256xf32>, vector<80x256xf32> -> vector<80x256xf32>
    %17 = arith.maximumf %14, %16 : vector<80x256xf32>
    %c0_13 = arith.constant 0 : index
    %c1536 = arith.constant 1536 : index
    %18 = vector.load %arg1[%c0_13, %c1536] : memref<96x4096xf32, #tpu.memory_space<vmem>>, vector<96x256xf32>
    %cst_14 = arith.constant dense<0.000000e+00> : vector<80x256xf32>
    %19 = tpu.matmul %0, %18, %cst_14 {dimension_numbers = #tpu.dot_dimension_numbers<[1], [0], [0], [1], [0, 0, 1, 1], [], []>} : vector<80x96xf32>, vector<96x256xf32>, vector<80x256xf32> -> vector<80x256xf32>
    %20 = arith.maximumf %17, %19 : vector<80x256xf32>
    %c0_15 = arith.constant 0 : index
    %c1792 = arith.constant 1792 : index
    %21 = vector.load %arg1[%c0_15, %c1792] : memref<96x4096xf32, #tpu.memory_space<vmem>>, vector<96x256xf32>
    %cst_16 = arith.constant dense<0.000000e+00> : vector<80x256xf32>
    %22 = tpu.matmul %0, %21, %cst_16 {dimension_numbers = #tpu.dot_dimension_numbers<[1], [0], [0], [1], [0, 0, 1, 1], [], []>} : vector<80x96xf32>, vector<96x256xf32>, vector<80x256xf32> -> vector<80x256xf32>
    %23 = arith.maximumf %20, %22 : vector<80x256xf32>
    %c0_17 = arith.constant 0 : index
    %c2048 = arith.constant 2048 : index
    %24 = vector.load %arg1[%c0_17, %c2048] : memref<96x4096xf32, #tpu.memory_space<vmem>>, vector<96x256xf32>
    %cst_18 = arith.constant dense<0.000000e+00> : vector<80x256xf32>
    %25 = tpu.matmul %0, %24, %cst_18 {dimension_numbers = #tpu.dot_dimension_numbers<[1], [0], [0], [1], [0, 0, 1, 1], [], []>} : vector<80x96xf32>, vector<96x256xf32>, vector<80x256xf32> -> vector<80x256xf32>
    %26 = arith.maximumf %23, %25 : vector<80x256xf32>
    %c0_19 = arith.constant 0 : index
    %c2304 = arith.constant 2304 : index
    %27 = vector.load %arg1[%c0_19, %c2304] : memref<96x4096xf32, #tpu.memory_space<vmem>>, vector<96x256xf32>
    %cst_20 = arith.constant dense<0.000000e+00> : vector<80x256xf32>
    %28 = tpu.matmul %0, %27, %cst_20 {dimension_numbers = #tpu.dot_dimension_numbers<[1], [0], [0], [1], [0, 0, 1, 1], [], []>} : vector<80x96xf32>, vector<96x256xf32>, vector<80x256xf32> -> vector<80x256xf32>
    %29 = arith.maximumf %26, %28 : vector<80x256xf32>
    %c0_21 = arith.constant 0 : index
    %c2560 = arith.constant 2560 : index
    %30 = vector.load %arg1[%c0_21, %c2560] : memref<96x4096xf32, #tpu.memory_space<vmem>>, vector<96x256xf32>
    %cst_22 = arith.constant dense<0.000000e+00> : vector<80x256xf32>
    %31 = tpu.matmul %0, %30, %cst_22 {dimension_numbers = #tpu.dot_dimension_numbers<[1], [0], [0], [1], [0, 0, 1, 1], [], []>} : vector<80x96xf32>, vector<96x256xf32>, vector<80x256xf32> -> vector<80x256xf32>
    %32 = arith.maximumf %29, %31 : vector<80x256xf32>
    %c0_23 = arith.constant 0 : index
    %c2816 = arith.constant 2816 : index
    %33 = vector.load %arg1[%c0_23, %c2816] : memref<96x4096xf32, #tpu.memory_space<vmem>>, vector<96x256xf32>
    %cst_24 = arith.constant dense<0.000000e+00> : vector<80x256xf32>
    %34 = tpu.matmul %0, %33, %cst_24 {dimension_numbers = #tpu.dot_dimension_numbers<[1], [0], [0], [1], [0, 0, 1, 1], [], []>} : vector<80x96xf32>, vector<96x256xf32>, vector<80x256xf32> -> vector<80x256xf32>
    %35 = arith.maximumf %32, %34 : vector<80x256xf32>
    %c0_25 = arith.constant 0 : index
    %c3072 = arith.constant 3072 : index
    %36 = vector.load %arg1[%c0_25, %c3072] : memref<96x4096xf32, #tpu.memory_space<vmem>>, vector<96x256xf32>
    %cst_26 = arith.constant dense<0.000000e+00> : vector<80x256xf32>
    %37 = tpu.matmul %0, %36, %cst_26 {dimension_numbers = #tpu.dot_dimension_numbers<[1], [0], [0], [1], [0, 0, 1, 1], [], []>} : vector<80x96xf32>, vector<96x256xf32>, vector<80x256xf32> -> vector<80x256xf32>
    %38 = arith.maximumf %35, %37 : vector<80x256xf32>
    %c0_27 = arith.constant 0 : index
    %c3328 = arith.constant 3328 : index
    %39 = vector.load %arg1[%c0_27, %c3328] : memref<96x4096xf32, #tpu.memory_space<vmem>>, vector<96x256xf32>
    %cst_28 = arith.constant dense<0.000000e+00> : vector<80x256xf32>
    %40 = tpu.matmul %0, %39, %cst_28 {dimension_numbers = #tpu.dot_dimension_numbers<[1], [0], [0], [1], [0, 0, 1, 1], [], []>} : vector<80x96xf32>, vector<96x256xf32>, vector<80x256xf32> -> vector<80x256xf32>
    %41 = arith.maximumf %38, %40 : vector<80x256xf32>
    %c0_29 = arith.constant 0 : index
    %c3584 = arith.constant 3584 : index
    %42 = vector.load %arg1[%c0_29, %c3584] : memref<96x4096xf32, #tpu.memory_space<vmem>>, vector<96x256xf32>
    %cst_30 = arith.constant dense<0.000000e+00> : vector<80x256xf32>
    %43 = tpu.matmul %0, %42, %cst_30 {dimension_numbers = #tpu.dot_dimension_numbers<[1], [0], [0], [1], [0, 0, 1, 1], [], []>} : vector<80x96xf32>, vector<96x256xf32>, vector<80x256xf32> -> vector<80x256xf32>
    %44 = arith.maximumf %41, %43 : vector<80x256xf32>
    %c0_31 = arith.constant 0 : index
    %c3840 = arith.constant 3840 : index
    %45 = vector.load %arg1[%c0_31, %c3840] : memref<96x4096xf32, #tpu.memory_space<vmem>>, vector<96x256xf32>
    %cst_32 = arith.constant dense<0.000000e+00> : vector<80x256xf32>
    %46 = tpu.matmul %0, %45, %cst_32 {dimension_numbers = #tpu.dot_dimension_numbers<[1], [0], [0], [1], [0, 0, 1, 1], [], []>} : vector<80x96xf32>, vector<96x256xf32>, vector<80x256xf32> -> vector<80x256xf32>
    %47 = arith.maximumf %44, %46 : vector<80x256xf32>
    %c0_33 = arith.constant 0 : index
    %c0_34 = arith.constant 0 : index
    %48 = vector.load %arg3[%c0_33, %c0_34] : memref<80x1xf32, #tpu.memory_space<vmem>>, vector<80x1xf32>
    %49 = vector.broadcast %48 : vector<80x1xf32> to vector<80x256xf32>
    %50 = arith.addf %47, %49 : vector<80x256xf32>
    %cst_35 = arith.constant 0.000000e+00 : f32
    %51 = vector.broadcast %cst_35 : f32 to vector<80x256xf32>
    %52 = arith.maximumf %50, %51 : vector<80x256xf32>
    %53 = vector.extract_strided_slice %52 {offsets = [0, 0], sizes = [8, 256], strides = [1, 1]} : vector<80x256xf32> to vector<8x256xf32>
    %c0_36 = arith.constant 0 : index
    %c0_37 = arith.constant 0 : index
    %c0_38 = arith.constant 0 : index
    %54 = vector.load %arg4[%c0_36, %c0_37, %c0_38] : memref<10x256x32xf32, #tpu.memory_space<vmem>>, vector<1x256x32xf32>
    %55 = vector.shape_cast %54 : vector<1x256x32xf32> to vector<256x32xf32>
    %cst_39 = arith.constant dense<0.000000e+00> : vector<8x32xf32>
    %56 = tpu.matmul %53, %55, %cst_39 {dimension_numbers = #tpu.dot_dimension_numbers<[1], [0], [0], [1], [0, 0, 1, 1], [], []>} : vector<8x256xf32>, vector<256x32xf32>, vector<8x32xf32> -> vector<8x32xf32>
    %57 = vector.extract_strided_slice %52 {offsets = [8, 0], sizes = [8, 256], strides = [1, 1]} : vector<80x256xf32> to vector<8x256xf32>
    %c1 = arith.constant 1 : index
    %c0_40 = arith.constant 0 : index
    %c0_41 = arith.constant 0 : index
    %58 = vector.load %arg4[%c1, %c0_40, %c0_41] : memref<10x256x32xf32, #tpu.memory_space<vmem>>, vector<1x256x32xf32>
    %59 = vector.shape_cast %58 : vector<1x256x32xf32> to vector<256x32xf32>
    %cst_42 = arith.constant dense<0.000000e+00> : vector<8x32xf32>
    %60 = tpu.matmul %57, %59, %cst_42 {dimension_numbers = #tpu.dot_dimension_numbers<[1], [0], [0], [1], [0, 0, 1, 1], [], []>} : vector<8x256xf32>, vector<256x32xf32>, vector<8x32xf32> -> vector<8x32xf32>
    %61 = arith.addf %56, %60 : vector<8x32xf32>
    %62 = vector.extract_strided_slice %52 {offsets = [16, 0], sizes = [8, 256], strides = [1, 1]} : vector<80x256xf32> to vector<8x256xf32>
    %c2 = arith.constant 2 : index
    %c0_43 = arith.constant 0 : index
    %c0_44 = arith.constant 0 : index
    %63 = vector.load %arg4[%c2, %c0_43, %c0_44] : memref<10x256x32xf32, #tpu.memory_space<vmem>>, vector<1x256x32xf32>
    %64 = vector.shape_cast %63 : vector<1x256x32xf32> to vector<256x32xf32>
    %cst_45 = arith.constant dense<0.000000e+00> : vector<8x32xf32>
    %65 = tpu.matmul %62, %64, %cst_45 {dimension_numbers = #tpu.dot_dimension_numbers<[1], [0], [0], [1], [0, 0, 1, 1], [], []>} : vector<8x256xf32>, vector<256x32xf32>, vector<8x32xf32> -> vector<8x32xf32>
    %66 = arith.addf %61, %65 : vector<8x32xf32>
    %67 = vector.extract_strided_slice %52 {offsets = [24, 0], sizes = [8, 256], strides = [1, 1]} : vector<80x256xf32> to vector<8x256xf32>
    %c3 = arith.constant 3 : index
    %c0_46 = arith.constant 0 : index
    %c0_47 = arith.constant 0 : index
    %68 = vector.load %arg4[%c3, %c0_46, %c0_47] : memref<10x256x32xf32, #tpu.memory_space<vmem>>, vector<1x256x32xf32>
    %69 = vector.shape_cast %68 : vector<1x256x32xf32> to vector<256x32xf32>
    %cst_48 = arith.constant dense<0.000000e+00> : vector<8x32xf32>
    %70 = tpu.matmul %67, %69, %cst_48 {dimension_numbers = #tpu.dot_dimension_numbers<[1], [0], [0], [1], [0, 0, 1, 1], [], []>} : vector<8x256xf32>, vector<256x32xf32>, vector<8x32xf32> -> vector<8x32xf32>
    %71 = arith.addf %66, %70 : vector<8x32xf32>
    %72 = vector.extract_strided_slice %52 {offsets = [32, 0], sizes = [8, 256], strides = [1, 1]} : vector<80x256xf32> to vector<8x256xf32>
    %c4 = arith.constant 4 : index
    %c0_49 = arith.constant 0 : index
    %c0_50 = arith.constant 0 : index
    %73 = vector.load %arg4[%c4, %c0_49, %c0_50] : memref<10x256x32xf32, #tpu.memory_space<vmem>>, vector<1x256x32xf32>
    %74 = vector.shape_cast %73 : vector<1x256x32xf32> to vector<256x32xf32>
    %cst_51 = arith.constant dense<0.000000e+00> : vector<8x32xf32>
    %75 = tpu.matmul %72, %74, %cst_51 {dimension_numbers = #tpu.dot_dimension_numbers<[1], [0], [0], [1], [0, 0, 1, 1], [], []>} : vector<8x256xf32>, vector<256x32xf32>, vector<8x32xf32> -> vector<8x32xf32>
    %76 = arith.addf %71, %75 : vector<8x32xf32>
    %77 = vector.extract_strided_slice %52 {offsets = [40, 0], sizes = [8, 256], strides = [1, 1]} : vector<80x256xf32> to vector<8x256xf32>
    %c5 = arith.constant 5 : index
    %c0_52 = arith.constant 0 : index
    %c0_53 = arith.constant 0 : index
    %78 = vector.load %arg4[%c5, %c0_52, %c0_53] : memref<10x256x32xf32, #tpu.memory_space<vmem>>, vector<1x256x32xf32>
    %79 = vector.shape_cast %78 : vector<1x256x32xf32> to vector<256x32xf32>
    %cst_54 = arith.constant dense<0.000000e+00> : vector<8x32xf32>
    %80 = tpu.matmul %77, %79, %cst_54 {dimension_numbers = #tpu.dot_dimension_numbers<[1], [0], [0], [1], [0, 0, 1, 1], [], []>} : vector<8x256xf32>, vector<256x32xf32>, vector<8x32xf32> -> vector<8x32xf32>
    %81 = arith.addf %76, %80 : vector<8x32xf32>
    %82 = vector.extract_strided_slice %52 {offsets = [48, 0], sizes = [8, 256], strides = [1, 1]} : vector<80x256xf32> to vector<8x256xf32>
    %c6 = arith.constant 6 : index
    %c0_55 = arith.constant 0 : index
    %c0_56 = arith.constant 0 : index
    %83 = vector.load %arg4[%c6, %c0_55, %c0_56] : memref<10x256x32xf32, #tpu.memory_space<vmem>>, vector<1x256x32xf32>
    %84 = vector.shape_cast %83 : vector<1x256x32xf32> to vector<256x32xf32>
    %cst_57 = arith.constant dense<0.000000e+00> : vector<8x32xf32>
    %85 = tpu.matmul %82, %84, %cst_57 {dimension_numbers = #tpu.dot_dimension_numbers<[1], [0], [0], [1], [0, 0, 1, 1], [], []>} : vector<8x256xf32>, vector<256x32xf32>, vector<8x32xf32> -> vector<8x32xf32>
    %86 = arith.addf %81, %85 : vector<8x32xf32>
    %87 = vector.extract_strided_slice %52 {offsets = [56, 0], sizes = [8, 256], strides = [1, 1]} : vector<80x256xf32> to vector<8x256xf32>
    %c7 = arith.constant 7 : index
    %c0_58 = arith.constant 0 : index
    %c0_59 = arith.constant 0 : index
    %88 = vector.load %arg4[%c7, %c0_58, %c0_59] : memref<10x256x32xf32, #tpu.memory_space<vmem>>, vector<1x256x32xf32>
    %89 = vector.shape_cast %88 : vector<1x256x32xf32> to vector<256x32xf32>
    %cst_60 = arith.constant dense<0.000000e+00> : vector<8x32xf32>
    %90 = tpu.matmul %87, %89, %cst_60 {dimension_numbers = #tpu.dot_dimension_numbers<[1], [0], [0], [1], [0, 0, 1, 1], [], []>} : vector<8x256xf32>, vector<256x32xf32>, vector<8x32xf32> -> vector<8x32xf32>
    %91 = arith.addf %86, %90 : vector<8x32xf32>
    %92 = vector.extract_strided_slice %52 {offsets = [64, 0], sizes = [8, 256], strides = [1, 1]} : vector<80x256xf32> to vector<8x256xf32>
    %c8 = arith.constant 8 : index
    %c0_61 = arith.constant 0 : index
    %c0_62 = arith.constant 0 : index
    %93 = vector.load %arg4[%c8, %c0_61, %c0_62] : memref<10x256x32xf32, #tpu.memory_space<vmem>>, vector<1x256x32xf32>
    %94 = vector.shape_cast %93 : vector<1x256x32xf32> to vector<256x32xf32>
    %cst_63 = arith.constant dense<0.000000e+00> : vector<8x32xf32>
    %95 = tpu.matmul %92, %94, %cst_63 {dimension_numbers = #tpu.dot_dimension_numbers<[1], [0], [0], [1], [0, 0, 1, 1], [], []>} : vector<8x256xf32>, vector<256x32xf32>, vector<8x32xf32> -> vector<8x32xf32>
    %96 = arith.addf %91, %95 : vector<8x32xf32>
    %97 = vector.extract_strided_slice %52 {offsets = [72, 0], sizes = [8, 256], strides = [1, 1]} : vector<80x256xf32> to vector<8x256xf32>
    %c9 = arith.constant 9 : index
    %c0_64 = arith.constant 0 : index
    %c0_65 = arith.constant 0 : index
    %98 = vector.load %arg4[%c9, %c0_64, %c0_65] : memref<10x256x32xf32, #tpu.memory_space<vmem>>, vector<1x256x32xf32>
    %99 = vector.shape_cast %98 : vector<1x256x32xf32> to vector<256x32xf32>
    %cst_66 = arith.constant dense<0.000000e+00> : vector<8x32xf32>
    %100 = tpu.matmul %97, %99, %cst_66 {dimension_numbers = #tpu.dot_dimension_numbers<[1], [0], [0], [1], [0, 0, 1, 1], [], []>} : vector<8x256xf32>, vector<256x32xf32>, vector<8x32xf32> -> vector<8x32xf32>
    %101 = arith.addf %96, %100 : vector<8x32xf32>
    %c0_67 = arith.constant 0 : index
    %c0_68 = arith.constant 0 : index
    %102 = vector.load %arg5[%c0_67, %c0_68] : memref<1x32xf32, #tpu.memory_space<vmem>>, vector<1x32xf32>
    %103 = vector.broadcast %102 : vector<1x32xf32> to vector<8x32xf32>
    %104 = arith.addf %101, %103 : vector<8x32xf32>
    %cst_69 = arith.constant 0.000000e+00 : f32
    %105 = vector.broadcast %cst_69 : f32 to vector<8x32xf32>
    %106 = arith.maximumf %104, %105 : vector<8x32xf32>
    %c0_70 = arith.constant 0 : index
    %c0_71 = arith.constant 0 : index
    %107 = vector.load %arg6[%c0_70, %c0_71] : memref<32x128xf32, #tpu.memory_space<vmem>>, vector<32x128xf32>
    %cst_72 = arith.constant dense<0.000000e+00> : vector<8x128xf32>
    %108 = tpu.matmul %106, %107, %cst_72 {dimension_numbers = #tpu.dot_dimension_numbers<[1], [0], [0], [1], [0, 0, 1, 1], [], []>} : vector<8x32xf32>, vector<32x128xf32>, vector<8x128xf32> -> vector<8x128xf32>
    %c0_73 = arith.constant 0 : index
    %c0_74 = arith.constant 0 : index
    %109 = vector.load %arg7[%c0_73, %c0_74] : memref<1x128xf32, #tpu.memory_space<vmem>>, vector<1x128xf32>
    %110 = vector.broadcast %109 : vector<1x128xf32> to vector<8x128xf32>
    %111 = arith.addf %108, %110 : vector<8x128xf32>
    %c0_75 = arith.constant 0 : index
    %c0_76 = arith.constant 0 : index
    %112 = vector.load %arg8[%c0_75, %c0_76] : memref<8x128xf32, #tpu.memory_space<vmem>>, vector<8x128xf32>
    tpu.vector_store %arg8[%c0_75, %c0_76], %111 {strides = array<i32>} : memref<8x128xf32, #tpu.memory_space<vmem>>, vector<8x128xf32>,
    return
  }
  func.func @transform_0(%arg0: i32) -> (i32, i32) {
    %c0_i32 = arith.constant 0 : i32
    %c0_i32_0 = arith.constant 0 : i32
    return %arg0, %c0_i32 : i32, i32
  }
  func.func @transform_1(%arg0: i32) -> (i32, i32) {
    %c0_i32 = arith.constant 0 : i32
    %c0_i32_0 = arith.constant 0 : i32
    %c0_i32_1 = arith.constant 0 : i32
    return %c0_i32, %c0_i32_0 : i32, i32
  }
  func.func @transform_2(%arg0: i32) -> (i32, i32) {
    %c0_i32 = arith.constant 0 : i32
    %c0_i32_0 = arith.constant 0 : i32
    %c0_i32_1 = arith.constant 0 : i32
    return %c0_i32, %c0_i32_0 : i32, i32
  }
  func.func @transform_3(%arg0: i32) -> (i32, i32, i32) {
    %c0_i32 = arith.constant 0 : i32
    %c0_i32_0 = arith.constant 0 : i32
    %c0_i32_1 = arith.constant 0 : i32
    %c0_i32_2 = arith.constant 0 : i32
    return %c0_i32, %c0_i32_0, %c0_i32_1 : i32, i32, i32
  }
  func.func @transform_4(%arg0: i32) -> (i32, i32) {
    %c0_i32 = arith.constant 0 : i32
    %c0_i32_0 = arith.constant 0 : i32
    %c0_i32_1 = arith.constant 0 : i32
    return %c0_i32, %c0_i32_0 : i32, i32
  }
  func.func @transform_5(%arg0: i32) -> (i32, i32) {
    %c0_i32 = arith.constant 0 : i32
    %c0_i32_0 = arith.constant 0 : i32
    %c0_i32_1 = arith.constant 0 : i32
    return %c0_i32, %c0_i32_0 : i32, i32
  }
  func.func @transform_6(%arg0: i32) -> (i32, i32) {
    %c0_i32 = arith.constant 0 : i32
    %c0_i32_0 = arith.constant 0 : i32
    %c0_i32_1 = arith.constant 0 : i32
    return %c0_i32, %c0_i32_0 : i32, i32
  }
  func.func @transform_7(%arg0: i32) -> (i32, i32) {
    %c0_i32 = arith.constant 0 : i32
    %c0_i32_0 = arith.constant 0 : i32
    return %arg0, %c0_i32 : i32, i32
  }
}

</mosaic_0001>

<bundles_post_ra>
// kernel: mul.8
= control target key start
LH: loop header
LB: loop body
LE: loop exit
PB: predicated region body
PF: predicated region fallthrough
CT: control target
= control target key end

     0   :  { %vm21_vm0 = vcmask 80896   ;;  %s80_s0 = inlined_call_operand.vmem [shape: f32[10,4,3], index: 0, kind: input, shape index: {}]   ;;  %s81_s1 = inlined_call_operand.vmem [shape: f32[10,12], index: 1, kind: output, shape index: {}]  }
   0x1   :  { %v40_v0 = vld [vmem:[%s80_s0 + $0xc] sm:$0xf]  ;;  %v41_v1 = vld [vmem:[%s80_s0 + $0x8] sm:$0xf]  ;;  %v42_v2 = vld [vmem:[%s80_s0 + $0x4] sm:$0xf] }
   0x2   :  { %8 = vst [vmem:[#allocation0 + $0x18] sm:$0xf] %v40_v0  ;;  %13 = vst [vmem:[#allocation0 + $0x10] sm:$0xf] %v41_v1  ;;  %v18_v3 = vld [vmem:[%s80_s0] sm:$0xf] }
   0x3   :  { %17 = vst [vmem:[#allocation0 + $0x8] sm:$0xf] %v42_v2  ;;  %19 = vst [vmem:[#allocation0] sm:$0xf] %v18_v3 }
   0x9   :  { %v29_v5 = vld [vmem:[#allocation0 + $0x10] sm:$0x7]   ;;  %v34_v6 = vld [vmem:[#allocation0 + $0x18] sm:$0x7]  }
   0xa   :  { %v24_v4 = vld [vmem:[#allocation0 + $0x8] sm:$0x7]   ;;  %v20_v7 = vld [vmem:[#allocation0] sm:$0x7]   ;;  %44 = vst.msk [vmem:[%s81_s1 + $0x6] sm:$0x7] %vm21_vm0, %v29_v5  }
   0xb   :  { %43 = vst.msk [vmem:[%s81_s1 + $0x3] sm:$0x7] %vm21_vm0, %v24_v4   ;;  %45 = vst.msk [vmem:[%s81_s1 + $0x9] sm:$0x7] %vm21_vm0, %v34_v6  }
   0xc   :  { %22 = vst.msk [vmem:[%s81_s1] sm:$0x7] %vm21_vm0, %v20_v7  }

// kernel: convolutional_network_forward.1
= control target key start
LH: loop header
LB: loop body
LE: loop exit
PB: predicated region body
PF: predicated region fallthrough
CT: control target
= control target key end

     0   :  { %s5911_s24 = smov 0   ;;  %s9332_s0 = inlined_call_operand.vmem [shape: f32[192,4096], index: 0, kind: input, shape index: {}]   ;;  %s9333_s1 = inlined_call_operand.vmem [shape: f32[80,96], index: 1, kind: input, shape index: {}]   ;;  %s9334_s2 = inlined_call_operand.vmem [shape: f32[80,1], index: 2, kind: input, shape index: {}]   ;;  %s9335_s3 = inlined_call_operand.vmem [shape: f32[10,256,32], index: 3, kind: input, shape index: {}]   ;;  %s9336_s4 = inlined_call_operand.vmem [shape: f32[1,32], index: 4, kind: input, shape index: {}]   ;;  %s9337_s5 = inlined_call_operand.vmem [shape: f32[32,128], index: 5, kind: input, shape index: {}]   ;;  %s9338_s6 = inlined_call_operand.vmem [shape: f32[1,128], index: 6, kind: input, shape index: {}]   ;;  %s9339_s7 = inlined_call_operand.vmem [shape: f32[16,128], index: 7, kind: output, shape index: {}]  }
   0x1 LB: > { %s5917_s25 = sadd.s32 4294967295, %s5865_s24   ;;  %p4296_p0 = scmp.ge.s32.totalorder %s5865_s24, 1  ;;  %s5865_s24 = sphi %s5911_s24, %s17_s24  }
   0x2   : > { %p239_p1 = scmp.lt.s32.totalorder %s5865_s24, 3 }
   0x4   : > { %p240_p2 = pnand %p4296_p0, %p239_p1 }
   0x6   : > { %243 = sbr.rel (%p240_p2) target bundleno = 1120 (0x460), region = 48 }
   0xd   : > { %s271_s26 = smul.u32 12, %s5917_s25  ;;  %v9345_v0 = vmov 0.0   ;;  %vm316_vm0 = vcmask 785408   ;;  %vm5870_vm1 = vmmov 0   ;;  %vm4164_vm2 = vcmask 261120   ;;  %p278_p4 = scmp.lt.s32.totalorder %s5917_s25, 1 }
   0xe   : > { %411 = vmatprep.mubr.f32.mxu0 %v9345_v0  ;;  %560 = vmatprep.mubr.f32.mxu1 %v9345_v0 }
   0xf   : > { %p272_p3 = scmp.lt.s32.totalorder %s271_s26, 23  ;;  %s9432_s25 = smov (!%p278_p4, %s5917_s25), 1 }
  0x11   : > { %s9430_s26 = smov (!%p272_p3, %s271_s26), 23 }
  0x12   : > { %s4753_s27 = sshll.u32 %s9430_s26, 8 }
  0x13   : > { %s5927_s30 = scalar_lea.vmem %s9332_s0, %s4753_s27 }
  0x14   : > { %v293_v1 = vld [vmem:[%s5927_s30 + $0x8] sm:$0xff]  ;;  %v473_v3 = vld [vmem:[%s5927_s30 + $0x18] sm:$0xff]  ;;  %v292_v6 = vld [vmem:[%s5927_s30] sm:$0xff] }
  0x15   : > { %v295_v2 = vld [vmem:[%s5927_s30 + $0x108] sm:$0xff]  ;;  %v475_v5 = vld [vmem:[%s5927_s30 + $0x118] sm:$0xff]  ;;  %v294_v7 = vld [vmem:[%s5927_s30 + $0x100] sm:$0xff] }
  0x16   : > { %v5120_v4 = vpack.c.bf16 %v295_v2, %v293_v1  ;;  %v5144_v8 = vpack.c.bf16 %v475_v5, %v473_v3  ;;  %v5122_v9 = vpack.c.bf16 %v294_v7, %v292_v6  ;;  %v472_v10 = vld [vmem:[%s5927_s30 + $0x10] sm:$0xff]  ;;  %v297_v12 = vld [vmem:[%s5927_s30 + $0x208] sm:$0xff]  ;;  %v477_v15 = vld [vmem:[%s5927_s30 + $0x218] sm:$0xff] }
  0x17   : > { %v474_v11 = vld [vmem:[%s5927_s30 + $0x110] sm:$0xff]  ;;  %v299_v14 = vld [vmem:[%s5927_s30 + $0x308] sm:$0xff]  ;;  %v479_v16 = vld [vmem:[%s5927_s30 + $0x318] sm:$0xff] }
  0x18   : > { %5121 = vmatprep.subr.bf16.mxu0 %v5120_v4  ;;  %v5146_v13 = vpack.c.bf16 %v474_v11, %v472_v10  ;;  %5145 = vmatprep.subr.bf16.mxu1 %v5144_v8  ;;  %v5124_v17 = vpack.c.bf16 %v299_v14, %v297_v12  ;;  %v5148_v18 = vpack.c.bf16 %v479_v16, %v477_v15  ;;  %v296_v19 = vld [vmem:[%s5927_s30 + $0x200] sm:$0xff]  ;;  %v476_v21 = vld [vmem:[%s5927_s30 + $0x210] sm:$0xff]  ;;  %v301_v24 = vld [vmem:[%s5927_s30 + $0x408] sm:$0xff] }
  0x19   : > { %5123 = vmatpush1.bf16.msra.mxu0 %v5122_v9  ;;  %v298_v20 = vld [vmem:[%s5927_s30 + $0x300] sm:$0xff]  ;;  %v478_v23 = vld [vmem:[%s5927_s30 + $0x310] sm:$0xff]  ;;  %v303_v25 = vld [vmem:[%s5927_s30 + $0x508] sm:$0xff] }
  0x1a   : > { %5147 = vmatpush1.bf16.msra.mxu1 %v5146_v13  ;;  %v5126_v22 = vpack.c.bf16 %v298_v20, %v296_v19  ;;  %5125 = vmatprep.subr.bf16.mxu0 %v5124_v17  ;;  %v5150_v26 = vpack.c.bf16 %v478_v23, %v476_v21  ;;  %v5128_v27 = vpack.c.bf16 %v303_v25, %v301_v24  ;;  %v481_v28 = vld [vmem:[%s5927_s30 + $0x418] sm:$0xff]  ;;  %v300_v30 = vld [vmem:[%s5927_s30 + $0x400] sm:$0xff]  ;;  %v480_v33 = vld [vmem:[%s5927_s30 + $0x410] sm:$0xff] }
  0x1b   : > { %5149 = vmatprep.subr.bf16.mxu1 %v5148_v18  ;;  %v483_v29 = vld [vmem:[%s5927_s30 + $0x518] sm:$0xff]  ;;  %v302_v32 = vld [vmem:[%s5927_s30 + $0x500] sm:$0xff]  ;;  %v482_v34 = vld [vmem:[%s5927_s30 + $0x510] sm:$0xff] }
  0x1c   : > { %v5152_v31 = vpack.c.bf16 %v483_v29, %v481_v28  ;;  %v5130_v35 = vpack.c.bf16 %v302_v32, %v300_v30  ;;  %v305_v36 = vld [vmem:[%s5927_s30 + $0x608] sm:$0xff]  ;;  %v485_v38 = vld [vmem:[%s5927_s30 + $0x618] sm:$0xff]  ;;  %v5154_v39 = vpack.c.bf16 %v482_v34, %v480_v33  ;;  %v304_v42 = vld [vmem:[%s5927_s30 + $0x600] sm:$0xff] }
  0x1d   : > { %5127 = vmatpush1.bf16.msra.mxu0 %v5126_v22  ;;  %v307_v37 = vld [vmem:[%s5927_s30 + $0x708] sm:$0xff]  ;;  %v487_v41 = vld [vmem:[%s5927_s30 + $0x718] sm:$0xff]  ;;  %v306_v43 = vld [vmem:[%s5927_s30 + $0x700] sm:$0xff] }
  0x1e   : > { %5151 = vmatpush1.bf16.msra.mxu1 %v5150_v26  ;;  %5129 = vmatprep.subr.bf16.mxu0 %v5128_v27  ;;  %v5132_v40 = vpack.c.bf16 %v307_v37, %v305_v36  ;;  %v5156_v44 = vpack.c.bf16 %v487_v41, %v485_v38  ;;  %v484_v45 = vld [vmem:[%s5927_s30 + $0x610] sm:$0xff]  ;;  %v309_v47 = vld [vmem:[%s5927_s30 + $0x808] sm:$0xff]  ;;  %v489_v49 = vld [vmem:[%s5927_s30 + $0x818] sm:$0xff]  ;;  %v5134_v51 = vpack.c.bf16 %v306_v43, %v304_v42 }
  0x1f   : > { %5153 = vmatprep.subr.bf16.mxu1 %v5152_v31  ;;  %v486_v46 = vld [vmem:[%s5927_s30 + $0x710] sm:$0xff]  ;;  %v311_v48 = vld [vmem:[%s5927_s30 + $0x908] sm:$0xff]  ;;  %v491_v50 = vld [vmem:[%s5927_s30 + $0x918] sm:$0xff] }
  0x20   : > { %v5158_v52 = vpack.c.bf16 %v486_v46, %v484_v45  ;;  %v5136_v53 = vpack.c.bf16 %v311_v48, %v309_v47  ;;  %v308_v54 = vld [vmem:[%s5927_s30 + $0x800] sm:$0xff]  ;;  %v488_v56 = vld [vmem:[%s5927_s30 + $0x810] sm:$0xff]  ;;  %v5160_v57 = vpack.c.bf16 %v491_v50, %v489_v49  ;;  %v313_v59 = vld [vmem:[%s5927_s30 + $0xa08] sm:$0xff] }
  0x21   : > { %5131 = vmatpush1.bf16.msra.mxu0 %v5130_v35  ;;  %v310_v55 = vld [vmem:[%s5927_s30 + $0x900] sm:$0xff]  ;;  %v490_v58 = vld [vmem:[%s5927_s30 + $0x910] sm:$0xff]  ;;  %v315_v60 = vld [vmem:[%s5927_s30 + $0xb08] sm:$0xff] }
  0x22   : > { %5155 = vmatpush1.bf16.msra.mxu1 %v5154_v39  ;;  %5133 = vmatprep.subr.bf16.mxu0 %v5132_v40  ;;  %v493_v61 = vld [vmem:[%s5927_s30 + $0xa18] sm:$0xff]  ;;  %v5138_v63 = vpack.c.bf16 %v310_v55, %v308_v54  ;;  %v5162_v1 = vpack.c.bf16 %v490_v58, %v488_v56  ;;  %v5140_v2 = vpack.c.bf16 %v315_v60, %v313_v59  ;;  %v312_v3 = vld [vmem:[%s5927_s30 + $0xa00] sm:$0xff]  ;;  %v492_v5 = vld [vmem:[%s5927_s30 + $0xa10] sm:$0xff] }
  0x23   : > { %5157 = vmatprep.subr.bf16.mxu1 %v5156_v44  ;;  %v495_v62 = vld [vmem:[%s5927_s30 + $0xb18] sm:$0xff]  ;;  %v314_v4 = vld [vmem:[%s5927_s30 + $0xb00] sm:$0xff]  ;;  %v494_v7 = vld [vmem:[%s5927_s30 + $0xb10] sm:$0xff] }
  0x24   : > { %v5164_v6 = vpack.c.bf16 %v495_v62, %v493_v61  ;;  %v642_v8 = vld [vmem:[%s5927_s30 + $0x28] sm:$0xff]  ;;  %v811_v10 = vld [vmem:[%s5927_s30 + $0x38] sm:$0xff]  ;;  %v5142_v12 = vpack.c.bf16 %v314_v4, %v312_v3  ;;  %v5166_v13 = vpack.c.bf16 %v494_v7, %v492_v5  ;;  %v641_v15 = vld [vmem:[%s5927_s30 + $0x20] sm:$0xff] }
  0x25   : > { %5135 = vmatpush1.bf16.msra.mxu0 %v5134_v51  ;;  %v644_v9 = vld [vmem:[%s5927_s30 + $0x128] sm:$0xff]  ;;  %v813_v11 = vld [vmem:[%s5927_s30 + $0x138] sm:$0xff]  ;;  %v643_v16 = vld [vmem:[%s5927_s30 + $0x120] sm:$0xff] }
  0x26   : > { %5159 = vmatpush1.bf16.msra.mxu1 %v5158_v52  ;;  %5137 = vmatprep.subr.bf16.mxu0 %v5136_v53  ;;  %v5168_v14 = vpack.c.bf16 %v644_v9, %v642_v8  ;;  %v5192_v17 = vpack.c.bf16 %v813_v11, %v811_v10  ;;  %v810_v18 = vld [vmem:[%s5927_s30 + $0x30] sm:$0xff]  ;;  %v646_v20 = vld [vmem:[%s5927_s30 + $0x228] sm:$0xff]  ;;  %v5990_v22 = vld [vmem:[%s9333_s1] sm:$0xff]  ;;  %v5170_v23 = vpack.c.bf16 %v643_v16, %v641_v15 }
  0x27   : > { %5161 = vmatprep.subr.bf16.mxu1 %v5160_v57  ;;  %v812_v19 = vld [vmem:[%s5927_s30 + $0x130] sm:$0xff]  ;;  %v648_v21 = vld [vmem:[%s5927_s30 + $0x328] sm:$0xff]  ;;  %v815_v24 = vld [vmem:[%s5927_s30 + $0x238] sm:$0xff] }
  0x28   : > { %v817_v25 = vld [vmem:[%s5927_s30 + $0x338] sm:$0xff]  ;;  %v5194_v26 = vpack.c.bf16 %v812_v19, %v810_v18  ;;  %v5172_v27 = vpack.c.bf16 %v648_v21, %v646_v20  ;;  %v645_v28 = vld [vmem:[%s5927_s30 + $0x220] sm:$0xff]  ;;  %v814_v30 = vld [vmem:[%s5927_s30 + $0x230] sm:$0xff] }
  0x29   : > { %5139 = vmatpush1.bf16.msra.mxu0 %v5138_v63  ;;  %v647_v29 = vld [vmem:[%s5927_s30 + $0x320] sm:$0xff]  ;;  %v5196_v31 = vpack.c.bf16 %v817_v25, %v815_v24  ;;  %v816_v32 = vld [vmem:[%s5927_s30 + $0x330] sm:$0xff]  ;;  %v650_v33 = vld [vmem:[%s5927_s30 + $0x428] sm:$0xff] }
  0x2a   : > { %5163 = vmatpush1.bf16.msra.mxu1 %v5162_v1  ;;  %5141 = vmatprep.subr.bf16.mxu0 %v5140_v2  ;;  %v652_v34 = vld [vmem:[%s5927_s30 + $0x528] sm:$0xff]  ;;  %v819_v36 = vld [vmem:[%s5927_s30 + $0x438] sm:$0xff]  ;;  %v5174_v38 = vpack.c.bf16 %v647_v29, %v645_v28  ;;  %v5198_v39 = vpack.c.bf16 %v816_v32, %v814_v30  ;;  %v649_v41 = vld [vmem:[%s5927_s30 + $0x420] sm:$0xff] }
  0x2b   : > { %5165 = vmatprep.subr.bf16.mxu1 %v5164_v6  ;;  %v6007_v35 = vld [vmem:[%s9333_s1 + $0x8] sm:$0xff]  ;;  %v821_v37 = vld [vmem:[%s5927_s30 + $0x538] sm:$0xff]  ;;  %v5176_v40 = vpack.c.bf16 %v652_v34, %v650_v33  ;;  %v651_v42 = vld [vmem:[%s5927_s30 + $0x520] sm:$0xff] }
  0x2c   : > { %v818_v43 = vld [vmem:[%s5927_s30 + $0x430] sm:$0xff]  ;;  %v5200_v44 = vpack.c.bf16 %v821_v37, %v819_v36  ;;  %v654_v46 = vld [vmem:[%s5927_s30 + $0x628] sm:$0xff]  ;;  %v823_v49 = vld [vmem:[%s5927_s30 + $0x638] sm:$0xff]  ;;  %v5178_v51 = vpack.c.bf16 %v651_v42, %v649_v41 }
  0x2d   : > { %5143 = vmatpush1.bf16.msra.mxu0 %v5142_v12  ;;  %v820_v45 = vld [vmem:[%s5927_s30 + $0x530] sm:$0xff]  ;;  %v656_v47 = vld [vmem:[%s5927_s30 + $0x728] sm:$0xff]  ;;  %v825_v50 = vld [vmem:[%s5927_s30 + $0x738] sm:$0xff] }
  0x2e   : > { %5167 = vmatpush1.bf16.msra.mxu1 %v5166_v13  ;;  %5169 = vmatprep.subr.bf16.mxu0 %v5168_v14  ;;  %v6027_v48 = vld [vmem:[%s9333_s1 + $0x10] sm:$0xff]  ;;  %v5202_v52 = vpack.c.bf16 %v820_v45, %v818_v43  ;;  %v5180_v53 = vpack.c.bf16 %v656_v47, %v654_v46  ;;  %v653_v54 = vld [vmem:[%s5927_s30 + $0x620] sm:$0xff]  ;;  %v5204_v57 = vpack.c.bf16 %v825_v50, %v823_v49  ;;  %v658_v59 = vld [vmem:[%s5927_s30 + $0x828] sm:$0xff] }
  0x2f   : > { %5193 = vmatprep.subr.bf16.mxu1 %v5192_v17  ;;  %v655_v55 = vld [vmem:[%s5927_s30 + $0x720] sm:$0xff]  ;;  %v822_v56 = vld [vmem:[%s5927_s30 + $0x630] sm:$0xff]  ;;  %v660_v60 = vld [vmem:[%s5927_s30 + $0x928] sm:$0xff] }
  0x30   : > { %4300 = vmatmul.mubr.msk.f32.vlgmr.msra.gmra.mrb[0].mxu0 %vm316_vm0, %v5990_v22  ;;  %v824_v58 = vld [vmem:[%s5927_s30 + $0x730] sm:$0xff]  ;;  %v6046_v61 = vld [vmem:[%s9333_s1 + $0x18] sm:$0xff]  ;;  %v5182_v1 = vpack.c.bf16 %v655_v55, %v653_v54  ;;  %v5184_v3 = vpack.c.bf16 %v660_v60, %v658_v59  ;;  %v657_v4 = vld [vmem:[%s5927_s30 + $0x820] sm:$0xff] }
  0x31   : > { %4310 = vmatmul.mubr.msk.f32.vlgmr.msra.gmra.mrb[0].mxu1 %vm316_vm0, %v5990_v22  ;;  %5171 = vmatpush1.bf16.msra.mxu0 %v5170_v23  ;;  %v827_v62 = vld [vmem:[%s5927_s30 + $0x838] sm:$0xff]  ;;  %v5206_v2 = vpack.c.bf16 %v824_v58, %v822_v56  ;;  %v659_v5 = vld [vmem:[%s5927_s30 + $0x920] sm:$0xff]  ;;  %v826_v6 = vld [vmem:[%s5927_s30 + $0x830] sm:$0xff] }
  0x32   : > { %417 = vmatprep.mubr.f32.mxu0 %v9345_v0  ;;  %566 = vmatprep.mubr.f32.mxu1 %v9345_v0  ;;  %v829_v63 = vld [vmem:[%s5927_s30 + $0x938] sm:$0xff]  ;;  %v828_v8 = vld [vmem:[%s5927_s30 + $0x930] sm:$0xff]  ;;  %v662_v9 = vld [vmem:[%s5927_s30 + $0xa28] sm:$0xff]  ;;  %v5186_v14 = vpack.c.bf16 %v659_v5, %v657_v4 }
  0x33   : > { %5195 = vmatpush1.bf16.msra.mxu1 %v5194_v26  ;;  %5173 = vmatprep.subr.bf16.mxu0 %v5172_v27  ;;  %v5208_v7 = vpack.c.bf16 %v829_v63, %v827_v62  ;;  %v664_v10 = vld [vmem:[%s5927_s30 + $0xb28] sm:$0xff]  ;;  %v6065_v11 = vld [vmem:[%s9333_s1 + $0x20] sm:$0xff]  ;;  %v831_v12 = vld [vmem:[%s5927_s30 + $0xa38] sm:$0xff]  ;;  %v5210_v15 = vpack.c.bf16 %v828_v8, %v826_v6 }
  0x34   : > { %4301 = vmatmul.mubr.msk.f32.gmra.mrb[2].mxu0 %vm316_vm0, %v6007_v35  ;;  %5197 = vmatprep.subr.bf16.mxu1 %v5196_v31  ;;  %v833_v13 = vld [vmem:[%s5927_s30 + $0xb38] sm:$0xff]  ;;  %v5188_v16 = vpack.c.bf16 %v664_v10, %v662_v9  ;;  %v661_v17 = vld [vmem:[%s5927_s30 + $0xa20] sm:$0xff]  ;;  %v830_v19 = vld [vmem:[%s5927_s30 + $0xa30] sm:$0xff] }
  0x35   : > { %4311 = vmatmul.mubr.msk.f32.gmra.mrb[2].mxu1 %vm316_vm0, %v6007_v35  ;;  %423 = vmatprep.mubr.f32.mxu0 %v9345_v0  ;;  %v663_v18 = vld [vmem:[%s5927_s30 + $0xb20] sm:$0xff]  ;;  %v5212_v20 = vpack.c.bf16 %v833_v13, %v831_v12  ;;  %v832_v21 = vld [vmem:[%s5927_s30 + $0xb30] sm:$0xff]  ;;  %v980_v23 = vld [vmem:[%s5927_s30 + $0x48] sm:$0xff] }
  0x36   : > { %572 = vmatprep.mubr.f32.mxu1 %v9345_v0  ;;  %5175 = vmatpush1.bf16.msra.mxu0 %v5174_v38  ;;  %v982_v24 = vld [vmem:[%s5927_s30 + $0x148] sm:$0xff]  ;;  %v1149_v26 = vld [vmem:[%s5927_s30 + $0x58] sm:$0xff]  ;;  %v5190_v28 = vpack.c.bf16 %v663_v18, %v661_v17  ;;  %v5214_v29 = vpack.c.bf16 %v832_v21, %v830_v19  ;;  %v6097_v32 = vld [vmem:[%s9333_s1 + $0x30] sm:$0xff] }
  0x37   : > { %5199 = vmatpush1.bf16.msra.mxu1 %v5198_v39  ;;  %5177 = vmatprep.subr.bf16.mxu0 %v5176_v40  ;;  %v6084_v25 = vld [vmem:[%s9333_s1 + $0x28] sm:$0xff]  ;;  %v1151_v27 = vld [vmem:[%s5927_s30 + $0x158] sm:$0xff]  ;;  %v5216_v30 = vpack.c.bf16 %v982_v24, %v980_v23  ;;  %v6119_v34 = vld [vmem:[%s9333_s1 + $0x40] sm:$0xff] }
  0x38   : > { %4302 = vmatmul.mubr.msk.f32.gmra.mrb[4].mxu0 %vm316_vm0, %v6027_v48  ;;  %5201 = vmatprep.subr.bf16.mxu1 %v5200_v44  ;;  %v5240_v31 = vpack.c.bf16 %v1151_v27, %v1149_v26  ;;  %v6108_v33 = vld [vmem:[%s9333_s1 + $0x38] sm:$0xff]  ;;  %v6130_v36 = vld [vmem:[%s9333_s1 + $0x48] sm:$0xff]  ;;  %v979_v37 = vld [vmem:[%s5927_s30 + $0x40] sm:$0xff] }
  0x39   : > { %4312 = vmatmul.mubr.msk.f32.gmra.mrb[4].mxu1 %vm316_vm0, %v6027_v48  ;;  %429 = vmatprep.mubr.f32.mxu0 %v9345_v0  ;;  %v981_v38 = vld [vmem:[%s5927_s30 + $0x140] sm:$0xff]  ;;  %v1148_v39 = vld [vmem:[%s5927_s30 + $0x50] sm:$0xff]  ;;  %v984_v41 = vld [vmem:[%s5927_s30 + $0x248] sm:$0xff] }
  0x3a   : > { %578 = vmatprep.mubr.f32.mxu1 %v9345_v0  ;;  %5179 = vmatpush1.bf16.msra.mxu0 %v5178_v51  ;;  %v1150_v40 = vld [vmem:[%s5927_s30 + $0x150] sm:$0xff]  ;;  %v986_v42 = vld [vmem:[%s5927_s30 + $0x348] sm:$0xff]  ;;  %v5218_v43 = vpack.c.bf16 %v981_v38, %v979_v37  ;;  %v1153_v44 = vld [vmem:[%s5927_s30 + $0x258] sm:$0xff] }
  0x3b   : > { %5203 = vmatpush1.bf16.msra.mxu1 %v5202_v52  ;;  %5181 = vmatprep.subr.bf16.mxu0 %v5180_v53  ;;  %v1155_v45 = vld [vmem:[%s5927_s30 + $0x358] sm:$0xff]  ;;  %v5242_v46 = vpack.c.bf16 %v1150_v40, %v1148_v39  ;;  %v5220_v47 = vpack.c.bf16 %v986_v42, %v984_v41  ;;  %v983_v49 = vld [vmem:[%s5927_s30 + $0x240] sm:$0xff]  ;;  %v1152_v51 = vld [vmem:[%s5927_s30 + $0x250] sm:$0xff] }
  0x3c   : > { %4303 = vmatmul.mubr.msk.f32.gmra.mrb[6].mxu0 %vm316_vm0, %v6046_v61  ;;  %5205 = vmatprep.subr.bf16.mxu1 %v5204_v57  ;;  %v985_v50 = vld [vmem:[%s5927_s30 + $0x340] sm:$0xff]  ;;  %v5244_v52 = vpack.c.bf16 %v1155_v45, %v1153_v44  ;;  %v1154_v53 = vld [vmem:[%s5927_s30 + $0x350] sm:$0xff]  ;;  %v988_v54 = vld [vmem:[%s5927_s30 + $0x448] sm:$0xff] }
  0x3d   : > { %4313 = vmatmul.mubr.msk.f32.gmra.mrb[6].mxu1 %vm316_vm0, %v6046_v61  ;;  %435 = vmatprep.mubr.f32.mxu0 %v9345_v0  ;;  %v990_v55 = vld [vmem:[%s5927_s30 + $0x548] sm:$0xff]  ;;  %v1157_v56 = vld [vmem:[%s5927_s30 + $0x458] sm:$0xff]  ;;  %v5222_v58 = vpack.c.bf16 %v985_v50, %v983_v49  ;;  %v5246_v59 = vpack.c.bf16 %v1154_v53, %v1152_v51  ;;  %v987_v62 = vld [vmem:[%s5927_s30 + $0x440] sm:$0xff] }
  0x3e   : > { %584 = vmatprep.mubr.f32.mxu1 %v9345_v0  ;;  %5183 = vmatpush1.bf16.msra.mxu0 %v5182_v1  ;;  %v1159_v57 = vld [vmem:[%s5927_s30 + $0x558] sm:$0xff]  ;;  %v5224_v60 = vpack.c.bf16 %v990_v55, %v988_v54  ;;  %v989_v63 = vld [vmem:[%s5927_s30 + $0x540] sm:$0xff]  ;;  %v1156_v1 = vld [vmem:[%s5927_s30 + $0x450] sm:$0xff] }
  0x3f   : > { %5207 = vmatpush1.bf16.msra.mxu1 %v5206_v2  ;;  %5185 = vmatprep.subr.bf16.mxu0 %v5184_v3  ;;  %v5248_v2 = vpack.c.bf16 %v1159_v57, %v1157_v56  ;;  %v1158_v3 = vld [vmem:[%s5927_s30 + $0x550] sm:$0xff]  ;;  %v992_v4 = vld [vmem:[%s5927_s30 + $0x648] sm:$0xff]  ;;  %v1161_v6 = vld [vmem:[%s5927_s30 + $0x658] sm:$0xff]  ;;  %v5226_v8 = vpack.c.bf16 %v989_v63, %v987_v62 }
  0x40   : > { %4304 = vmatmul.mubr.msk.f32.gmra.mrb[8].mxu0 %vm316_vm0, %v6065_v11  ;;  %5209 = vmatprep.subr.bf16.mxu1 %v5208_v7  ;;  %v994_v5 = vld [vmem:[%s5927_s30 + $0x748] sm:$0xff]  ;;  %v1163_v7 = vld [vmem:[%s5927_s30 + $0x758] sm:$0xff]  ;;  %v5250_v9 = vpack.c.bf16 %v1158_v3, %v1156_v1  ;;  %v991_v12 = vld [vmem:[%s5927_s30 + $0x640] sm:$0xff] }
  0x41   : > { %4314 = vmatmul.mubr.msk.f32.gmra.mrb[8].mxu1 %vm316_vm0, %v6065_v11  ;;  %441 = vmatprep.mubr.f32.mxu0 %v9345_v0  ;;  %v5228_v10 = vpack.c.bf16 %v994_v5, %v992_v4  ;;  %v993_v13 = vld [vmem:[%s5927_s30 + $0x740] sm:$0xff]  ;;  %v996_v17 = vld [vmem:[%s5927_s30 + $0x848] sm:$0xff]  ;;  %v1165_v19 = vld [vmem:[%s5927_s30 + $0x858] sm:$0xff] }
  0x42   : > { %590 = vmatprep.mubr.f32.mxu1 %v9345_v0  ;;  %5187 = vmatpush1.bf16.msra.mxu0 %v5186_v14  ;;  %v1160_v14 = vld [vmem:[%s5927_s30 + $0x650] sm:$0xff]  ;;  %v998_v18 = vld [vmem:[%s5927_s30 + $0x948] sm:$0xff]  ;;  %v5230_v21 = vpack.c.bf16 %v993_v13, %v991_v12  ;;  %v995_v26 = vld [vmem:[%s5927_s30 + $0x840] sm:$0xff] }
  0x43   : > { %5211 = vmatpush1.bf16.msra.mxu1 %v5210_v15  ;;  %5189 = vmatprep.subr.bf16.mxu0 %v5188_v16  ;;  %v5252_v15 = vpack.c.bf16 %v1163_v7, %v1161_v6  ;;  %v1162_v16 = vld [vmem:[%s5927_s30 + $0x750] sm:$0xff]  ;;  %v5232_v24 = vpack.c.bf16 %v998_v18, %v996_v17  ;;  %v997_v27 = vld [vmem:[%s5927_s30 + $0x940] sm:$0xff]  ;;  %v1002_v37 = vld [vmem:[%s5927_s30 + $0xb48] sm:$0xff] }
  0x44   : > { %4305 = vmatmul.mubr.msk.f32.gmra.mrb[10].mxu0 %vm316_vm0, %v6084_v25  ;;  %5213 = vmatprep.subr.bf16.mxu1 %v5212_v20  ;;  %v1167_v20 = vld [vmem:[%s5927_s30 + $0x958] sm:$0xff]  ;;  %v5254_v23 = vpack.c.bf16 %v1162_v16, %v1160_v14  ;;  %v5234_v40 = vpack.c.bf16 %v997_v27, %v995_v26  ;;  %v1001_v44 = vld [vmem:[%s5927_s30 + $0xb40] sm:$0xff]  ;;  %v1168_v45 = vld [vmem:[%s5927_s30 + $0xa50] sm:$0xff] }
  0x45   : > { %4315 = vmatmul.mubr.msk.f32.gmra.mrb[10].mxu1 %vm316_vm0, %v6084_v25  ;;  %447 = vmatprep.mubr.f32.mxu0 %v9345_v0  ;;  %v1169_v38 = vld [vmem:[%s5927_s30 + $0xa58] sm:$0xff]  ;;  %v1318_v49 = vld [vmem:[%s5927_s30 + $0x68] sm:$0xff]  ;;  %v1317_v57 = vld [vmem:[%s5927_s30 + $0x60] sm:$0xff] }
  0x46   : > { %596 = vmatprep.mubr.f32.mxu1 %v9345_v0  ;;  %5191 = vmatpush1.bf16.msra.mxu0 %v5190_v28  ;;  %v1164_v28 = vld [vmem:[%s5927_s30 + $0x850] sm:$0xff]  ;;  %v1171_v39 = vld [vmem:[%s5927_s30 + $0xb58] sm:$0xff]  ;;  %v1320_v50 = vld [vmem:[%s5927_s30 + $0x168] sm:$0xff] }
  0x47   : > { %5215 = vmatpush1.bf16.msra.mxu1 %v5214_v29  ;;  %5217 = vmatprep.subr.bf16.mxu0 %v5216_v30  ;;  %v5256_v29 = vpack.c.bf16 %v1167_v20, %v1165_v19  ;;  %v1166_v30 = vld [vmem:[%s5927_s30 + $0x950] sm:$0xff]  ;;  %v1487_v51 = vld [vmem:[%s5927_s30 + $0x78] sm:$0xff]  ;;  %v5264_v55 = vpack.c.bf16 %v1320_v50, %v1318_v49  ;;  %v1322_v62 = vld [vmem:[%s5927_s30 + $0x268] sm:$0xff] }
  0x48   : > { %4306 = vmatmul.mubr.msk.f32.gmra.mrb[12].mxu0 %vm316_vm0, %v6097_v32  ;;  %5241 = vmatprep.subr.bf16.mxu1 %v5240_v31  ;;  %v1000_v31 = vld [vmem:[%s5927_s30 + $0xa48] sm:$0xff]  ;;  %v5258_v41 = vpack.c.bf16 %v1166_v30, %v1164_v28  ;;  %v1493_v3 = vld [vmem:[%s5927_s30 + $0x378] sm:$0xff]  ;;  %v1321_v6 = vld [vmem:[%s5927_s30 + $0x260] sm:$0xff] }
  0x49   : > { %4316 = vmatmul.mubr.msk.f32.gmra.mrb[12].mxu1 %vm316_vm0, %v6097_v32  ;;  %453 = vmatprep.mubr.f32.mxu0 %v9345_v0  ;;  %v5236_v42 = vpack.c.bf16 %v1002_v37, %v1000_v31  ;;  %v1324_v63 = vld [vmem:[%s5927_s30 + $0x368] sm:$0xff]  ;;  %v1323_v7 = vld [vmem:[%s5927_s30 + $0x360] sm:$0xff]  ;;  %v1495_v14 = vld [vmem:[%s5927_s30 + $0x478] sm:$0xff] }
  0x4a   : > { %602 = vmatprep.mubr.f32.mxu1 %v9345_v0  ;;  %v5268_v5 = vpack.c.bf16 %v1324_v63, %v1322_v62  ;;  %v1326_v12 = vld [vmem:[%s5927_s30 + $0x468] sm:$0xff]  ;;  %v5270_v16 = vpack.c.bf16 %v1323_v7, %v1321_v6  ;;  %v1325_v19 = vld [vmem:[%s5927_s30 + $0x460] sm:$0xff]  ;;  %v1499_v28 = vld [vmem:[%s5927_s30 + $0x678] sm:$0xff] }
  0x4b   : > { %v1328_v13 = vld [vmem:[%s5927_s30 + $0x568] sm:$0xff]  ;;  %v1327_v20 = vld [vmem:[%s5927_s30 + $0x560] sm:$0xff] }
  0x4c   : > { %4307 = vmatmul.mubr.msk.f32.gmra.mrb[14].mxu0 %vm316_vm0, %v6108_v33  ;;  %v5272_v18 = vpack.c.bf16 %v1328_v13, %v1326_v12  ;;  %v1330_v26 = vld [vmem:[%s5927_s30 + $0x668] sm:$0xff]  ;;  %v5274_v30 = vpack.c.bf16 %v1327_v20, %v1325_v19 }
  0x4d   : > { %4317 = vmatmul.mubr.msk.f32.gmra.mrb[14].mxu1 %vm316_vm0, %v6108_v33  ;;  %459 = vmatprep.mubr.f32.mxu0 %v9345_v0  ;;  %v1332_v27 = vld [vmem:[%s5927_s30 + $0x768] sm:$0xff] }
  0x4e   : > { %608 = vmatprep.mubr.f32.mxu1 %v9345_v0  ;;  %v5276_v37 = vpack.c.bf16 %v1332_v27, %v1330_v26  ;;  %v1656_v6 = vld [vmem:[%s5927_s30 + $0x88] sm:$0xff] }
  0x4f   : > { %v1658_v7 = vld [vmem:[%s5927_s30 + $0x188] sm:$0xff] }
  0x50   : > { %4308 = vmatmul.mubr.msk.f32.gmra.mrb[16].mxu0 %vm316_vm0, %v6119_v34  ;;  %v5312_v13 = vpack.c.bf16 %v1658_v7, %v1656_v6  ;;  %v1660_v19 = vld [vmem:[%s5927_s30 + $0x288] sm:$0xff]  ;;  %v1671_v6 = vld [vmem:[%s5927_s30 + $0x880] sm:$0xff] }
  0x51   : > { %4318 = vmatmul.mubr.msk.f32.gmra.mrb[16].mxu1 %vm316_vm0, %v6119_v34  ;;  %465 = vmatprep.mubr.f32.mxu0 %v9345_v0  ;;  %v1662_v20 = vld [vmem:[%s5927_s30 + $0x388] sm:$0xff]  ;;  %v1673_v7 = vld [vmem:[%s5927_s30 + $0x980] sm:$0xff] }
  0x52   : > { %614 = vmatprep.mubr.f32.mxu1 %v9345_v0  ;;  %v5316_v27 = vpack.c.bf16 %v1662_v20, %v1660_v19  ;;  %v1677_v19 = vld [vmem:[%s5927_s30 + $0xb80] sm:$0xff] }
  0x54   : > { %4309 = vmatmul.mubr.msk.f32.gmra.mrb[18].mxu0 %vm316_vm0, %v6130_v36 }
  0x55   : > { %4319 = vmatmul.mubr.msk.f32.gmra.mrb[18].mxu1 %vm316_vm0, %v6130_v36  ;;  %729 = vmatprep.mubr.f32.mxu0 %v9345_v0 }
  0x56   : > { %898 = vmatprep.mubr.f32.mxu1 %v9345_v0 }
  0x58   : > { %4320 = vmatmul.mubr.msk.f32.vlgmr.msra.gmra.mrb[20].mxu0 %vm316_vm0, %v5990_v22 }
  0x59   : > { %5219 = vmatpush1.bf16.msra.mxu0 %v5218_v43  ;;  %4330 = vmatmul.mubr.msk.f32.vlgmr.msra.gmra.mrb[20].mxu1 %vm316_vm0, %v5990_v22  ;;  %v999_v43 = vld [vmem:[%s5927_s30 + $0xa40] sm:$0xff] }
  0x5a   : > { %735 = vmatprep.mubr.f32.mxu0 %v9345_v0  ;;  %5243 = vmatpush1.bf16.msra.mxu1 %v5242_v46  ;;  %v5260_v46 = vpack.c.bf16 %v1171_v39, %v1169_v38  ;;  %v5238_v53 = vpack.c.bf16 %v1001_v44, %v999_v43  ;;  %v1329_v38 = vld [vmem:[%s5927_s30 + $0x660] sm:$0xff]  ;;  %v1334_v43 = vld [vmem:[%s5927_s30 + $0x868] sm:$0xff] }
  0x5b   : > { %904 = vmatprep.mubr.f32.mxu1 %v9345_v0  ;;  %5221 = vmatprep.subr.bf16.mxu0 %v5220_v47  ;;  %v1170_v47 = vld [vmem:[%s5927_s30 + $0xb50] sm:$0xff]  ;;  %v1331_v39 = vld [vmem:[%s5927_s30 + $0x760] sm:$0xff]  ;;  %v1336_v44 = vld [vmem:[%s5927_s30 + $0x968] sm:$0xff] }
  0x5c   : > { %4321 = vmatmul.mubr.msk.f32.gmra.mrb[22].mxu0 %vm316_vm0, %v6007_v35  ;;  %5245 = vmatprep.subr.bf16.mxu1 %v5244_v52  ;;  %v1489_v52 = vld [vmem:[%s5927_s30 + $0x178] sm:$0xff]  ;;  %v5262_v54 = vpack.c.bf16 %v1170_v47, %v1168_v45  ;;  %v5278_v47 = vpack.c.bf16 %v1331_v39, %v1329_v38  ;;  %v5280_v50 = vpack.c.bf16 %v1336_v44, %v1334_v43  ;;  %v1664_v38 = vld [vmem:[%s5927_s30 + $0x488] sm:$0xff] }
  0x5d   : > { %4331 = vmatmul.mubr.msk.f32.gmra.mrb[22].mxu1 %vm316_vm0, %v6007_v35  ;;  %741 = vmatprep.mubr.f32.mxu0 %v9345_v0  ;;  %v5288_v56 = vpack.c.bf16 %v1489_v52, %v1487_v51  ;;  %v1503_v45 = vld [vmem:[%s5927_s30 + $0x878] sm:$0xff]  ;;  %v1333_v51 = vld [vmem:[%s5927_s30 + $0x860] sm:$0xff]  ;;  %v1666_v39 = vld [vmem:[%s5927_s30 + $0x588] sm:$0xff] }
  0x5e   : > { %5223 = vmatpush1.bf16.msra.mxu0 %v5222_v58  ;;  %910 = vmatprep.mubr.f32.mxu1 %v9345_v0  ;;  %v1319_v58 = vld [vmem:[%s5927_s30 + $0x160] sm:$0xff]  ;;  %v5320_v44 = vpack.c.bf16 %v1666_v39, %v1664_v38  ;;  %v2000_v38 = vld [vmem:[%s5927_s30 + $0x3a8] sm:$0xff]  ;;  %v2167_v39 = vld [vmem:[%s5927_s30 + $0x2b8] sm:$0xff] }
  0x5f   : > { %5247 = vmatpush1.bf16.msra.mxu1 %v5246_v59  ;;  %5225 = vmatprep.subr.bf16.mxu0 %v5224_v60  ;;  %v1486_v59 = vld [vmem:[%s5927_s30 + $0x70] sm:$0xff]  ;;  %v5266_v1 = vpack.c.bf16 %v1319_v58, %v1317_v57  ;;  %v1335_v52 = vld [vmem:[%s5927_s30 + $0x960] sm:$0xff]  ;;  %v1340_v57 = vld [vmem:[%s5927_s30 + $0xb68] sm:$0xff] }
  0x60   : > { %4322 = vmatmul.mubr.msk.f32.gmra.mrb[24].mxu0 %vm316_vm0, %v6027_v48  ;;  %5249 = vmatprep.subr.bf16.mxu1 %v5248_v2  ;;  %v1488_v60 = vld [vmem:[%s5927_s30 + $0x170] sm:$0xff]  ;;  %v1491_v2 = vld [vmem:[%s5927_s30 + $0x278] sm:$0xff] }
  0x61   : > { %4332 = vmatmul.mubr.msk.f32.gmra.mrb[24].mxu1 %vm316_vm0, %v6027_v48  ;;  %747 = vmatprep.mubr.f32.mxu0 %v9345_v0  ;;  %v5290_v4 = vpack.c.bf16 %v1488_v60, %v1486_v59  ;;  %v1507_v58 = vld [vmem:[%s5927_s30 + $0xa78] sm:$0xff]  ;;  %v5282_v60 = vpack.c.bf16 %v1335_v52, %v1333_v51  ;;  %v1670_v51 = vld [vmem:[%s5927_s30 + $0x788] sm:$0xff] }
  0x62   : > { %916 = vmatprep.mubr.f32.mxu1 %v9345_v0  ;;  %5227 = vmatpush1.bf16.msra.mxu0 %v5226_v8  ;;  %v1490_v8 = vld [vmem:[%s5927_s30 + $0x270] sm:$0xff]  ;;  %v1509_v59 = vld [vmem:[%s5927_s30 + $0xb78] sm:$0xff] }
  0x63   : > { %5251 = vmatpush1.bf16.msra.mxu1 %v5250_v9  ;;  %5229 = vmatprep.subr.bf16.mxu0 %v5228_v10  ;;  %v5292_v9 = vpack.c.bf16 %v1493_v3, %v1491_v2  ;;  %v1492_v10 = vld [vmem:[%s5927_s30 + $0x370] sm:$0xff]  ;;  %v1339_v2 = vld [vmem:[%s5927_s30 + $0xb60] sm:$0xff]  ;;  %v1837_v52 = vld [vmem:[%s5927_s30 + $0x698] sm:$0xff] }
  0x64   : > { %4323 = vmatmul.mubr.msk.f32.gmra.mrb[26].mxu0 %vm316_vm0, %v6046_v61  ;;  %5253 = vmatprep.subr.bf16.mxu1 %v5252_v15  ;;  %v1497_v15 = vld [vmem:[%s5927_s30 + $0x578] sm:$0xff]  ;;  %v5294_v17 = vpack.c.bf16 %v1492_v10, %v1490_v8  ;;  %v1506_v3 = vld [vmem:[%s5927_s30 + $0xa70] sm:$0xff] }
  0x65   : > { %4333 = vmatmul.mubr.msk.f32.gmra.mrb[26].mxu1 %vm316_vm0, %v6046_v61  ;;  %753 = vmatprep.mubr.f32.mxu0 %v9345_v0  ;;  %v1825_v8 = vld [vmem:[%s5927_s30 + $0x98] sm:$0xff] }
  0x66   : > { %922 = vmatprep.mubr.f32.mxu1 %v9345_v0  ;;  %5231 = vmatpush1.bf16.msra.mxu0 %v5230_v21  ;;  %v1494_v21 = vld [vmem:[%s5927_s30 + $0x470] sm:$0xff] }
  0x67   : > { %5255 = vmatpush1.bf16.msra.mxu1 %v5254_v23  ;;  %5233 = vmatprep.subr.bf16.mxu0 %v5232_v24  ;;  %v5296_v23 = vpack.c.bf16 %v1497_v15, %v1495_v14  ;;  %v1496_v24 = vld [vmem:[%s5927_s30 + $0x570] sm:$0xff]  ;;  %v1655_v15 = vld [vmem:[%s5927_s30 + $0x80] sm:$0xff] }
  0x68   : > { %4324 = vmatmul.mubr.msk.f32.gmra.mrb[28].mxu0 %vm316_vm0, %v6065_v11  ;;  %5257 = vmatprep.subr.bf16.mxu1 %v5256_v29  ;;  %v1501_v29 = vld [vmem:[%s5927_s30 + $0x778] sm:$0xff]  ;;  %v5298_v31 = vpack.c.bf16 %v1496_v24, %v1494_v21 }
  0x69   : > { %4334 = vmatmul.mubr.msk.f32.gmra.mrb[28].mxu1 %vm316_vm0, %v6065_v11  ;;  %759 = vmatprep.mubr.f32.mxu0 %v9345_v0  ;;  %v1831_v24 = vld [vmem:[%s5927_s30 + $0x398] sm:$0xff] }
  0x6a   : > { %928 = vmatprep.mubr.f32.mxu1 %v9345_v0  ;;  %5235 = vmatpush1.bf16.msra.mxu0 %v5234_v40  ;;  %v1498_v40 = vld [vmem:[%s5927_s30 + $0x670] sm:$0xff] }
  0x6b   : > { %5259 = vmatpush1.bf16.msra.mxu1 %v5258_v41  ;;  %5237 = vmatprep.subr.bf16.mxu0 %v5236_v42  ;;  %v5300_v41 = vpack.c.bf16 %v1501_v29, %v1499_v28  ;;  %v1500_v42 = vld [vmem:[%s5927_s30 + $0x770] sm:$0xff]  ;;  %v1659_v28 = vld [vmem:[%s5927_s30 + $0x280] sm:$0xff] }
  0x6c   : > { %4325 = vmatmul.mubr.msk.f32.gmra.mrb[30].mxu0 %vm316_vm0, %v6084_v25  ;;  %5261 = vmatprep.subr.bf16.mxu1 %v5260_v46  ;;  %v1505_v46 = vld [vmem:[%s5927_s30 + $0x978] sm:$0xff]  ;;  %v5302_v49 = vpack.c.bf16 %v1500_v42, %v1498_v40  ;;  %v1661_v29 = vld [vmem:[%s5927_s30 + $0x380] sm:$0xff] }
  0x6d   : > { %4335 = vmatmul.mubr.msk.f32.gmra.mrb[30].mxu1 %vm316_vm0, %v6084_v25  ;;  %765 = vmatprep.mubr.f32.mxu0 %v9345_v0  ;;  %v1833_v40 = vld [vmem:[%s5927_s30 + $0x498] sm:$0xff]  ;;  %v5318_v42 = vpack.c.bf16 %v1661_v29, %v1659_v28 }
  0x6e   : > { %934 = vmatprep.mubr.f32.mxu1 %v9345_v0  ;;  %5239 = vmatpush1.bf16.msra.mxu0 %v5238_v53  ;;  %v1502_v53 = vld [vmem:[%s5927_s30 + $0x870] sm:$0xff] }
  0x6f   : > { %5263 = vmatpush1.bf16.msra.mxu1 %v5262_v54  ;;  %5265 = vmatprep.subr.bf16.mxu0 %v5264_v55  ;;  %v5304_v54 = vpack.c.bf16 %v1505_v46, %v1503_v45  ;;  %v1504_v55 = vld [vmem:[%s5927_s30 + $0x970] sm:$0xff]  ;;  %v1663_v45 = vld [vmem:[%s5927_s30 + $0x480] sm:$0xff] }
  0x70   : > { %4326 = vmatmul.mubr.msk.f32.gmra.mrb[32].mxu0 %vm316_vm0, %v6097_v32  ;;  %5289 = vmatprep.subr.bf16.mxu1 %v5288_v56  ;;  %v1338_v56 = vld [vmem:[%s5927_s30 + $0xa68] sm:$0xff]  ;;  %v5306_v62 = vpack.c.bf16 %v1504_v55, %v1502_v53  ;;  %v1665_v46 = vld [vmem:[%s5927_s30 + $0x580] sm:$0xff]  ;;  %v1839_v53 = vld [vmem:[%s5927_s30 + $0x798] sm:$0xff] }
  0x71   : > { %4336 = vmatmul.mubr.msk.f32.gmra.mrb[32].mxu1 %vm316_vm0, %v6097_v32  ;;  %771 = vmatprep.mubr.f32.mxu0 %v9345_v0  ;;  %v5284_v63 = vpack.c.bf16 %v1340_v57, %v1338_v56  ;;  %v1667_v57 = vld [vmem:[%s5927_s30 + $0x680] sm:$0xff] }
  0x72   : > { %940 = vmatprep.mubr.f32.mxu1 %v9345_v0 }
  0x74   : > { %4327 = vmatmul.mubr.msk.f32.gmra.mrb[34].mxu0 %vm316_vm0, %v6108_v33 }
  0x75   : > { %4337 = vmatmul.mubr.msk.f32.gmra.mrb[34].mxu1 %vm316_vm0, %v6108_v33  ;;  %777 = vmatprep.mubr.f32.mxu0 %v9345_v0 }
  0x76   : > { %946 = vmatprep.mubr.f32.mxu1 %v9345_v0 }
  0x78   : > { %4328 = vmatmul.mubr.msk.f32.gmra.mrb[36].mxu0 %vm316_vm0, %v6119_v34 }
  0x79   : > { %4338 = vmatmul.mubr.msk.f32.gmra.mrb[36].mxu1 %vm316_vm0, %v6119_v34  ;;  %783 = vmatprep.mubr.f32.mxu0 %v9345_v0 }
  0x7a   : > { %952 = vmatprep.mubr.f32.mxu1 %v9345_v0 }
  0x7c   : > { %4329 = vmatmul.mubr.msk.f32.gmra.mrb[38].mxu0 %vm316_vm0, %v6130_v36 }
  0x7d   : > { %4339 = vmatmul.mubr.msk.f32.gmra.mrb[38].mxu1 %vm316_vm0, %v6130_v36  ;;  %1067 = vmatprep.mubr.f32.mxu0 %v9345_v0 }
  0x7e   : > { %1236 = vmatprep.mubr.f32.mxu1 %v9345_v0 }
  0x80   : > { %4340 = vmatmul.mubr.msk.f32.vlgmr.msra.gmra.mrb[40].mxu0 %vm316_vm0, %v5990_v22 }
  0x81   : > { %5267 = vmatpush1.bf16.msra.mxu0 %v5266_v1  ;;  %4350 = vmatmul.mubr.msk.f32.vlgmr.msra.gmra.mrb[40].mxu1 %vm316_vm0, %v5990_v22  ;;  %v1337_v1 = vld [vmem:[%s5927_s30 + $0xa60] sm:$0xff] }
  0x82   : > { %1073 = vmatprep.mubr.f32.mxu0 %v9345_v0  ;;  %5291 = vmatpush1.bf16.msra.mxu1 %v5290_v4  ;;  %v5308_v4 = vpack.c.bf16 %v1509_v59, %v1507_v58  ;;  %v5286_v10 = vpack.c.bf16 %v1339_v2, %v1337_v1  ;;  %v1669_v58 = vld [vmem:[%s5927_s30 + $0x780] sm:$0xff]  ;;  %v5348_v59 = vpack.c.bf16 %v1839_v53, %v1837_v52  ;;  %v1841_v1 = vld [vmem:[%s5927_s30 + $0x898] sm:$0xff] }
  0x83   : > { %1242 = vmatprep.mubr.f32.mxu1 %v9345_v0  ;;  %5269 = vmatprep.subr.bf16.mxu0 %v5268_v5  ;;  %v1508_v5 = vld [vmem:[%s5927_s30 + $0xb70] sm:$0xff]  ;;  %v1843_v2 = vld [vmem:[%s5927_s30 + $0x998] sm:$0xff] }
  0x84   : > { %4341 = vmatmul.mubr.msk.f32.gmra.mrb[42].mxu0 %vm316_vm0, %v6007_v35  ;;  %5293 = vmatprep.subr.bf16.mxu1 %v5292_v9  ;;  %v1827_v9 = vld [vmem:[%s5927_s30 + $0x198] sm:$0xff]  ;;  %v5310_v12 = vpack.c.bf16 %v1508_v5, %v1506_v3  ;;  %v5326_v3 = vpack.c.bf16 %v1669_v58, %v1667_v57  ;;  %v2170_v57 = vld [vmem:[%s5927_s30 + $0x4b0] sm:$0xff]  ;;  %v6496_v58 = vld [vmem:[%s9333_s1 + $0x8] sm:$0xff] }
  0x85   : > { %4351 = vmatmul.mubr.msk.f32.gmra.mrb[42].mxu1 %vm316_vm0, %v6007_v35  ;;  %1079 = vmatprep.mubr.f32.mxu0 %v9345_v0  ;;  %v5336_v14 = vpack.c.bf16 %v1827_v9, %v1825_v8  ;;  %v5352_v8 = vpack.c.bf16 %v1843_v2, %v1841_v1  ;;  %v1842_v9 = vld [vmem:[%s5927_s30 + $0x990] sm:$0xff]  ;;  %v2177_v1 = vld [vmem:[%s5927_s30 + $0x7b8] sm:$0xff] }
  0x86   : > { %5271 = vmatpush1.bf16.msra.mxu0 %v5270_v16  ;;  %1248 = vmatprep.mubr.f32.mxu1 %v9345_v0  ;;  %v1657_v16 = vld [vmem:[%s5927_s30 + $0x180] sm:$0xff] }
  0x87   : > { %5295 = vmatpush1.bf16.msra.mxu1 %v5294_v17  ;;  %5273 = vmatprep.subr.bf16.mxu0 %v5272_v18  ;;  %v1824_v17 = vld [vmem:[%s5927_s30 + $0x90] sm:$0xff]  ;;  %v5314_v21 = vpack.c.bf16 %v1657_v16, %v1655_v15  ;;  %v5330_v15 = vpack.c.bf16 %v1673_v7, %v1671_v6  ;;  %v2007_v6 = vld [vmem:[%s5927_s30 + $0x7a0] sm:$0xff] }
  0x88   : > { %4342 = vmatmul.mubr.msk.f32.gmra.mrb[44].mxu0 %vm316_vm0, %v6027_v48  ;;  %5297 = vmatprep.subr.bf16.mxu1 %v5296_v23  ;;  %v1826_v18 = vld [vmem:[%s5927_s30 + $0x190] sm:$0xff]  ;;  %v1829_v23 = vld [vmem:[%s5927_s30 + $0x298] sm:$0xff] }
  0x89   : > { %4352 = vmatmul.mubr.msk.f32.gmra.mrb[44].mxu1 %vm316_vm0, %v6027_v48  ;;  %1085 = vmatprep.mubr.f32.mxu0 %v9345_v0  ;;  %v5338_v26 = vpack.c.bf16 %v1826_v18, %v1824_v17  ;;  %v1675_v18 = vld [vmem:[%s5927_s30 + $0xa80] sm:$0xff]  ;;  %v2174_v7 = vld [vmem:[%s5927_s30 + $0x6b0] sm:$0xff] }
  0x8a   : > { %1254 = vmatprep.mubr.f32.mxu1 %v9345_v0  ;;  %5275 = vmatpush1.bf16.msra.mxu0 %v5274_v30  ;;  %v1828_v30 = vld [vmem:[%s5927_s30 + $0x290] sm:$0xff]  ;;  %v5334_v28 = vpack.c.bf16 %v1677_v19, %v1675_v18  ;;  %v2009_v18 = vld [vmem:[%s5927_s30 + $0x8a0] sm:$0xff] }
  0x8b   : > { %5299 = vmatpush1.bf16.msra.mxu1 %v5298_v31  ;;  %5277 = vmatprep.subr.bf16.mxu0 %v5276_v37  ;;  %v5340_v31 = vpack.c.bf16 %v1831_v24, %v1829_v23  ;;  %v1830_v37 = vld [vmem:[%s5927_s30 + $0x390] sm:$0xff]  ;;  %v1994_v23 = vld [vmem:[%s5927_s30 + $0xa8] sm:$0xff]  ;;  %v2011_v19 = vld [vmem:[%s5927_s30 + $0x9a0] sm:$0xff] }
  0x8c   : > { %4343 = vmatmul.mubr.msk.f32.gmra.mrb[46].mxu0 %vm316_vm0, %v6046_v61  ;;  %5301 = vmatprep.subr.bf16.mxu1 %v5300_v41  ;;  %v1835_v41 = vld [vmem:[%s5927_s30 + $0x598] sm:$0xff]  ;;  %v5342_v43 = vpack.c.bf16 %v1830_v37, %v1828_v30  ;;  %v1996_v24 = vld [vmem:[%s5927_s30 + $0x1a8] sm:$0xff] }
  0x8d   : > { %4353 = vmatmul.mubr.msk.f32.gmra.mrb[46].mxu1 %vm316_vm0, %v6046_v61  ;;  %1091 = vmatprep.mubr.f32.mxu0 %v9345_v0  ;;  %v5360_v30 = vpack.c.bf16 %v1996_v24, %v1994_v23  ;;  %v1998_v37 = vld [vmem:[%s5927_s30 + $0x2a8] sm:$0xff]  ;;  %v2180_v23 = vld [vmem:[%s5927_s30 + $0x9b0] sm:$0xff] }
  0x8e   : > { %1260 = vmatprep.mubr.f32.mxu1 %v9345_v0  ;;  %5279 = vmatpush1.bf16.msra.mxu0 %v5278_v47  ;;  %v1832_v47 = vld [vmem:[%s5927_s30 + $0x490] sm:$0xff]  ;;  %v2014_v24 = vld [vmem:[%s5927_s30 + $0xaa8] sm:$0xff] }
  0x8f   : > { %5303 = vmatpush1.bf16.msra.mxu1 %v5302_v49  ;;  %5281 = vmatprep.subr.bf16.mxu0 %v5280_v50  ;;  %v1834_v49 = vld [vmem:[%s5927_s30 + $0x590] sm:$0xff]  ;;  %v1668_v50 = vld [vmem:[%s5927_s30 + $0x688] sm:$0xff] }
  0x90   : > { %4344 = vmatmul.mubr.msk.f32.gmra.mrb[48].mxu0 %vm316_vm0, %v6065_v11  ;;  %5305 = vmatprep.subr.bf16.mxu1 %v5304_v54  ;;  %v5322_v54 = vpack.c.bf16 %v1665_v46, %v1663_v45  ;;  %v5346_v55 = vpack.c.bf16 %v1834_v49, %v1832_v47  ;;  %v5324_v56 = vpack.c.bf16 %v1670_v51, %v1668_v50  ;;  %v2166_v45 = vld [vmem:[%s5927_s30 + $0x2b0] sm:$0xff]  ;;  %v6477_v46 = vld [vmem:[%s9333_s1] sm:$0xff]  ;;  %v2004_v49 = vld [vmem:[%s5927_s30 + $0x5a8] sm:$0xff] }
  0x91   : > { %4354 = vmatmul.mubr.msk.f32.gmra.mrb[48].mxu1 %vm316_vm0, %v6065_v11  ;;  %1097 = vmatprep.mubr.f32.mxu0 %v9345_v0  ;;  %v2168_v47 = vld [vmem:[%s5927_s30 + $0x3b0] sm:$0xff]  ;;  %v2171_v50 = vld [vmem:[%s5927_s30 + $0x4b8] sm:$0xff] }
  0x92   : > { %1266 = vmatprep.mubr.f32.mxu1 %v9345_v0  ;;  %5283 = vmatpush1.bf16.msra.mxu0 %v5282_v60  ;;  %v1838_v60 = vld [vmem:[%s5927_s30 + $0x790] sm:$0xff]  ;;  %v2173_v51 = vld [vmem:[%s5927_s30 + $0x5b8] sm:$0xff]  ;;  %v5390_v53 = vpack.c.bf16 %v2168_v47, %v2166_v45  ;;  %v6569_v45 = vld [vmem:[%s9333_s1 + $0x28] sm:$0xff] }
  0x93   : > { %5307 = vmatpush1.bf16.msra.mxu1 %v5306_v62  ;;  %5285 = vmatprep.subr.bf16.mxu0 %v5284_v63  ;;  %v1672_v62 = vld [vmem:[%s5927_s30 + $0x888] sm:$0xff]  ;;  %v6580_v47 = vld [vmem:[%s9333_s1 + $0x30] sm:$0xff] }
  0x94   : > { %4345 = vmatmul.mubr.msk.f32.gmra.mrb[50].mxu0 %vm316_vm0, %v6084_v25  ;;  %5309 = vmatprep.subr.bf16.mxu1 %v5308_v4  ;;  %v1674_v63 = vld [vmem:[%s5927_s30 + $0x988] sm:$0xff] }
  0x95   : > { %4355 = vmatmul.mubr.msk.f32.gmra.mrb[50].mxu1 %vm316_vm0, %v6084_v25  ;;  %1103 = vmatprep.mubr.f32.mxu0 %v9345_v0  ;;  %v5328_v5 = vpack.c.bf16 %v1674_v63, %v1672_v62  ;;  %v2008_v62 = vld [vmem:[%s5927_s30 + $0x7a8] sm:$0xff]  ;;  %v2175_v63 = vld [vmem:[%s5927_s30 + $0x6b8] sm:$0xff] }
  0x96   : > { %1272 = vmatprep.mubr.f32.mxu1 %v9345_v0  ;;  %5287 = vmatpush1.bf16.msra.mxu0 %v5286_v10  ;;  %v1676_v10 = vld [vmem:[%s5927_s30 + $0xa88] sm:$0xff] }
  0x97   : > { %5311 = vmatpush1.bf16.msra.mxu1 %v5310_v12  ;;  %5313 = vmatprep.subr.bf16.mxu0 %v5312_v13  ;;  %v1678_v12 = vld [vmem:[%s5927_s30 + $0xb88] sm:$0xff]  ;;  %v1845_v13 = vld [vmem:[%s5927_s30 + $0xa98] sm:$0xff] }
  0x98   : > { %4346 = vmatmul.mubr.msk.f32.gmra.mrb[52].mxu0 %vm316_vm0, %v6097_v32  ;;  %5337 = vmatprep.subr.bf16.mxu1 %v5336_v14  ;;  %v1847_v14 = vld [vmem:[%s5927_s30 + $0xb98] sm:$0xff]  ;;  %v5332_v17 = vpack.c.bf16 %v1678_v12, %v1676_v10  ;;  %v2010_v10 = vld [vmem:[%s5927_s30 + $0x8a8] sm:$0xff] }
  0x99   : > { %4356 = vmatmul.mubr.msk.f32.gmra.mrb[52].mxu1 %vm316_vm0, %v6097_v32  ;;  %1109 = vmatprep.mubr.f32.mxu0 %v9345_v0  ;;  %v5356_v20 = vpack.c.bf16 %v1847_v14, %v1845_v13  ;;  %v2012_v12 = vld [vmem:[%s5927_s30 + $0x9a8] sm:$0xff]  ;;  %v2179_v13 = vld [vmem:[%s5927_s30 + $0x8b8] sm:$0xff] }
  0x9a   : > { %1278 = vmatprep.mubr.f32.mxu1 %v9345_v0  ;;  %v2181_v14 = vld [vmem:[%s5927_s30 + $0x9b8] sm:$0xff] }
  0x9c   : > { %4347 = vmatmul.mubr.msk.f32.gmra.mrb[54].mxu0 %vm316_vm0, %v6108_v33 }
  0x9d   : > { %4357 = vmatmul.mubr.msk.f32.gmra.mrb[54].mxu1 %vm316_vm0, %v6108_v33  ;;  %1115 = vmatprep.mubr.f32.mxu0 %v9345_v0 }
  0x9e   : > { %1284 = vmatprep.mubr.f32.mxu1 %v9345_v0 }
  0xa0   : > { %4348 = vmatmul.mubr.msk.f32.gmra.mrb[56].mxu0 %vm316_vm0, %v6119_v34 }
  0xa1   : > { %4358 = vmatmul.mubr.msk.f32.gmra.mrb[56].mxu1 %vm316_vm0, %v6119_v34  ;;  %1121 = vmatprep.mubr.f32.mxu0 %v9345_v0 }
  0xa2   : > { %1290 = vmatprep.mubr.f32.mxu1 %v9345_v0 }
  0xa4   : > { %4349 = vmatmul.mubr.msk.f32.gmra.mrb[58].mxu0 %vm316_vm0, %v6130_v36 }
  0xa5   : > { %4359 = vmatmul.mubr.msk.f32.gmra.mrb[58].mxu1 %vm316_vm0, %v6130_v36  ;;  %1405 = vmatprep.mubr.f32.mxu0 %v9345_v0 }
  0xa6   : > { %1574 = vmatprep.mubr.f32.mxu1 %v9345_v0 }
  0xa8   : > { %4360 = vmatmul.mubr.msk.f32.vlgmr.msra.gmra.mrb[60].mxu0 %vm316_vm0, %v5990_v22 }
  0xa9   : > { %5315 = vmatpush1.bf16.msra.mxu0 %v5314_v21  ;;  %4370 = vmatmul.mubr.msk.f32.vlgmr.msra.gmra.mrb[60].mxu1 %vm316_vm0, %v5990_v22  ;;  %v5344_v22 = vpack.c.bf16 %v1835_v41, %v1833_v40  ;;  %v1846_v21 = vld [vmem:[%s5927_s30 + $0xb90] sm:$0xff]  ;;  %v2169_v40 = vld [vmem:[%s5927_s30 + $0x3b8] sm:$0xff] }
  0xaa   : > { %1411 = vmatprep.mubr.f32.mxu0 %v9345_v0  ;;  %5339 = vmatpush1.bf16.msra.mxu1 %v5338_v26  ;;  %v2163_v26 = vld [vmem:[%s5927_s30 + $0xb8] sm:$0xff] }
  0xab   : > { %1580 = vmatprep.mubr.f32.mxu1 %v9345_v0  ;;  %5317 = vmatprep.subr.bf16.mxu0 %v5316_v27  ;;  %v2165_v27 = vld [vmem:[%s5927_s30 + $0x1b8] sm:$0xff] }
  0xac   : > { %4361 = vmatmul.mubr.msk.f32.gmra.mrb[62].mxu0 %vm316_vm0, %v6007_v35  ;;  %5341 = vmatprep.subr.bf16.mxu1 %v5340_v31  ;;  %v5384_v31 = vpack.c.bf16 %v2165_v27, %v2163_v26  ;;  %v2016_v26 = vld [vmem:[%s5927_s30 + $0xba8] sm:$0xff]  ;;  %v2183_v27 = vld [vmem:[%s5927_s30 + $0xab8] sm:$0xff] }
  0xad   : > { %4371 = vmatmul.mubr.msk.f32.gmra.mrb[62].mxu1 %vm316_vm0, %v6007_v35  ;;  %1417 = vmatprep.mubr.f32.mxu0 %v9345_v0  ;;  %v1836_v35 = vld [vmem:[%s5927_s30 + $0x690] sm:$0xff] }
  0xae   : > { %5319 = vmatpush1.bf16.msra.mxu0 %v5318_v42  ;;  %1586 = vmatprep.mubr.f32.mxu1 %v9345_v0  ;;  %v5350_v4 = vpack.c.bf16 %v1838_v60, %v1836_v35  ;;  %v5364_v42 = vpack.c.bf16 %v2000_v38, %v1998_v37  ;;  %v5392_v35 = vpack.c.bf16 %v2173_v51, %v2171_v50  ;;  %v2006_v60 = vld [vmem:[%s5927_s30 + $0x6a8] sm:$0xff]  ;;  %v2184_v38 = vld [vmem:[%s5927_s30 + $0xbb0] sm:$0xff]  ;;  %v2331_v50 = vld [vmem:[%s5927_s30 + $0xc0] sm:$0xff] }
  0xaf   : > { %5343 = vmatpush1.bf16.msra.mxu1 %v5342_v43  ;;  %5321 = vmatprep.subr.bf16.mxu0 %v5320_v44  ;;  %v1997_v43 = vld [vmem:[%s5927_s30 + $0x2a0] sm:$0xff] }
  0xb0   : > { %4362 = vmatmul.mubr.msk.f32.gmra.mrb[64].mxu0 %vm316_vm0, %v6027_v48  ;;  %5345 = vmatprep.subr.bf16.mxu1 %v5344_v22  ;;  %v1999_v44 = vld [vmem:[%s5927_s30 + $0x3a0] sm:$0xff]  ;;  %v2002_v22 = vld [vmem:[%s5927_s30 + $0x4a8] sm:$0xff] }
  0xb1   : > { %4372 = vmatmul.mubr.msk.f32.gmra.mrb[64].mxu1 %vm316_vm0, %v6027_v48  ;;  %1423 = vmatprep.mubr.f32.mxu0 %v9345_v0  ;;  %v1840_v48 = vld [vmem:[%s5927_s30 + $0x890] sm:$0xff]  ;;  %v5366_v52 = vpack.c.bf16 %v1999_v44, %v1997_v43  ;;  %v2333_v51 = vld [vmem:[%s5927_s30 + $0x1c0] sm:$0xff] }
  0xb2   : > { %1592 = vmatprep.mubr.f32.mxu1 %v9345_v0  ;;  %5323 = vmatpush1.bf16.msra.mxu0 %v5322_v54  ;;  %v5354_v16 = vpack.c.bf16 %v1842_v9, %v1840_v48  ;;  %v5368_v54 = vpack.c.bf16 %v2004_v49, %v2002_v22  ;;  %v6515_v48 = vld [vmem:[%s9333_s1 + $0x10] sm:$0xff]  ;;  %v6591_v22 = vld [vmem:[%s9333_s1 + $0x38] sm:$0xff]  ;;  %v6602_v49 = vld [vmem:[%s9333_s1 + $0x40] sm:$0xff] }
  0xb3   : > { %5347 = vmatpush1.bf16.msra.mxu1 %v5346_v55  ;;  %5325 = vmatprep.subr.bf16.mxu0 %v5324_v56  ;;  %v2001_v55 = vld [vmem:[%s5927_s30 + $0x4a0] sm:$0xff]  ;;  %v2176_v9 = vld [vmem:[%s5927_s30 + $0x7b0] sm:$0xff] }
  0xb4   : > { %4363 = vmatmul.mubr.msk.f32.gmra.mrb[66].mxu0 %vm316_vm0, %v6046_v61  ;;  %5349 = vmatprep.subr.bf16.mxu1 %v5348_v59  ;;  %v2003_v56 = vld [vmem:[%s5927_s30 + $0x5a0] sm:$0xff]  ;;  %v2172_v59 = vld [vmem:[%s5927_s30 + $0x5b0] sm:$0xff] }
  0xb5   : > { %4373 = vmatmul.mubr.msk.f32.gmra.mrb[66].mxu1 %vm316_vm0, %v6046_v61  ;;  %1429 = vmatprep.mubr.f32.mxu0 %v9345_v0  ;;  %v1844_v61 = vld [vmem:[%s5927_s30 + $0xa90] sm:$0xff]  ;;  %v5370_v2 = vpack.c.bf16 %v2003_v56, %v2001_v55  ;;  %v2336_v55 = vld [vmem:[%s5927_s30 + $0x2c8] sm:$0xff] }
  0xb6   : > { %1598 = vmatprep.mubr.f32.mxu1 %v9345_v0  ;;  %5327 = vmatpush1.bf16.msra.mxu0 %v5326_v3  ;;  %v5358_v29 = vpack.c.bf16 %v1846_v21, %v1844_v61  ;;  %v5394_v3 = vpack.c.bf16 %v2172_v59, %v2170_v57  ;;  %v2178_v61 = vld [vmem:[%s5927_s30 + $0x8b0] sm:$0xff]  ;;  %v5400_v21 = vpack.c.bf16 %v2181_v14, %v2179_v13  ;;  %v2338_v56 = vld [vmem:[%s5927_s30 + $0x3c8] sm:$0xff]  ;;  %v2507_v59 = vld [vmem:[%s5927_s30 + $0x3d8] sm:$0xff] }
  0xb7   : > { %5351 = vmatpush1.bf16.msra.mxu1 %v5350_v4  ;;  %5329 = vmatprep.subr.bf16.mxu0 %v5328_v5  ;;  %v5372_v4 = vpack.c.bf16 %v2008_v62, %v2006_v60  ;;  %v2005_v5 = vld [vmem:[%s5927_s30 + $0x6a0] sm:$0xff]  ;;  %v5410_v57 = vpack.c.bf16 %v2333_v51, %v2331_v50  ;;  %v5412_v62 = vpack.c.bf16 %v2338_v56, %v2336_v55  ;;  %v2518_v51 = vld [vmem:[%s5927_s30 + $0x9d0] sm:$0xff] }
  0xb8   : > { %4364 = vmatmul.mubr.msk.f32.gmra.mrb[68].mxu0 %vm316_vm0, %v6065_v11  ;;  %5353 = vmatprep.subr.bf16.mxu1 %v5352_v8  ;;  %v5396_v8 = vpack.c.bf16 %v2177_v1, %v2175_v63  ;;  %v2335_v63 = vld [vmem:[%s5927_s30 + $0x2c0] sm:$0xff] }
  0xb9   : > { %4374 = vmatmul.mubr.msk.f32.gmra.mrb[68].mxu1 %vm316_vm0, %v6065_v11  ;;  %1435 = vmatprep.mubr.f32.mxu0 %v9345_v0  ;;  %v1993_v11 = vld [vmem:[%s5927_s30 + $0xa0] sm:$0xff] }
  0xba   : > { %1604 = vmatprep.mubr.f32.mxu1 %v9345_v0  ;;  %5331 = vmatpush1.bf16.msra.mxu0 %v5330_v15  ;;  %v5374_v15 = vpack.c.bf16 %v2007_v6, %v2005_v5  ;;  %v2337_v1 = vld [vmem:[%s5927_s30 + $0x3c0] sm:$0xff]  ;;  %v2340_v5 = vld [vmem:[%s5927_s30 + $0x4c8] sm:$0xff] }
  0xbb   : > { %5355 = vmatpush1.bf16.msra.mxu1 %v5354_v16  ;;  %5333 = vmatprep.subr.bf16.mxu0 %v5332_v17  ;;  %v5398_v16 = vpack.c.bf16 %v2176_v9, %v2174_v7  ;;  %v5376_v17 = vpack.c.bf16 %v2012_v12, %v2010_v10  ;;  %v2342_v6 = vld [vmem:[%s5927_s30 + $0x5c8] sm:$0xff]  ;;  %v2509_v7 = vld [vmem:[%s5927_s30 + $0x4d8] sm:$0xff]  ;;  %v5414_v9 = vpack.c.bf16 %v2337_v1, %v2335_v63  ;;  %v2339_v13 = vld [vmem:[%s5927_s30 + $0x4c0] sm:$0xff] }
  0xbc   : > { %4365 = vmatmul.mubr.msk.f32.gmra.mrb[70].mxu0 %vm316_vm0, %v6084_v25  ;;  %5357 = vmatprep.subr.bf16.mxu1 %v5356_v20  ;;  %v6534_v20 = vld [vmem:[%s9333_s1 + $0x18] sm:$0xff]  ;;  %v5416_v12 = vpack.c.bf16 %v2342_v6, %v2340_v5  ;;  %v2341_v14 = vld [vmem:[%s5927_s30 + $0x5c0] sm:$0xff] }
  0xbd   : > { %4375 = vmatmul.mubr.msk.f32.gmra.mrb[70].mxu1 %vm316_vm0, %v6084_v25  ;;  %1441 = vmatprep.mubr.f32.mxu0 %v9345_v0  ;;  %v1995_v25 = vld [vmem:[%s5927_s30 + $0x1a0] sm:$0xff] }
  0xbe   : > { %1610 = vmatprep.mubr.f32.mxu1 %v9345_v0  ;;  %5335 = vmatpush1.bf16.msra.mxu0 %v5334_v28  ;;  %v2185_v28 = vld [vmem:[%s5927_s30 + $0xbb8] sm:$0xff]  ;;  %v2683_v55 = vld [vmem:[%s5927_s30 + $0x7e0] sm:$0xff] }
  0xbf   : > { %5359 = vmatpush1.bf16.msra.mxu1 %v5358_v29  ;;  %5361 = vmatprep.subr.bf16.mxu0 %v5360_v30  ;;  %v5378_v29 = vpack.c.bf16 %v2011_v19, %v2009_v18  ;;  %v5402_v30 = vpack.c.bf16 %v2180_v23, %v2178_v61  ;;  %v5404_v37 = vpack.c.bf16 %v2185_v28, %v2183_v27  ;;  %v2344_v18 = vld [vmem:[%s5927_s30 + $0x6c8] sm:$0xff]  ;;  %v2513_v61 = vld [vmem:[%s5927_s30 + $0x6d8] sm:$0xff]  ;;  %v2343_v27 = vld [vmem:[%s5927_s30 + $0x6c0] sm:$0xff] }
  0xc0   : > { %4366 = vmatmul.mubr.msk.f32.gmra.mrb[72].mxu0 %vm316_vm0, %v6097_v32  ;;  %5385 = vmatprep.subr.bf16.mxu1 %v5384_v31  ;;  %v5380_v31 = vpack.c.bf16 %v2016_v26, %v2014_v24  ;;  %v2346_v19 = vld [vmem:[%s5927_s30 + $0x7c8] sm:$0xff]  ;;  %v5418_v23 = vpack.c.bf16 %v2341_v14, %v2339_v13  ;;  %v2345_v28 = vld [vmem:[%s5927_s30 + $0x7c0] sm:$0xff]  ;;  %v2839_v14 = vld [vmem:[%s5927_s30 + $0xf8] sm:$0xff] }
  0xc1   : > { %4376 = vmatmul.mubr.msk.f32.gmra.mrb[72].mxu1 %vm316_vm0, %v6097_v32  ;;  %1447 = vmatprep.mubr.f32.mxu0 %v9345_v0  ;;  %v2162_v32 = vld [vmem:[%s5927_s30 + $0xb0] sm:$0xff]  ;;  %v5420_v26 = vpack.c.bf16 %v2346_v19, %v2344_v18 }
  0xc2   : > { %1616 = vmatprep.mubr.f32.mxu1 %v9345_v0 }
  0xc4   : > { %4367 = vmatmul.mubr.msk.f32.gmra.mrb[74].mxu0 %vm316_vm0, %v6108_v33 }
  0xc5   : > { %4377 = vmatmul.mubr.msk.f32.gmra.mrb[74].mxu1 %vm316_vm0, %v6108_v33  ;;  %1453 = vmatprep.mubr.f32.mxu0 %v9345_v0  ;;  %v2164_v33 = vld [vmem:[%s5927_s30 + $0x1b0] sm:$0xff] }
  0xc6   : > { %1622 = vmatprep.mubr.f32.mxu1 %v9345_v0  ;;  %v5386_v41 = vpack.c.bf16 %v2164_v33, %v2162_v32  ;;  %v2182_v32 = vld [vmem:[%s5927_s30 + $0xab0] sm:$0xff]  ;;  %v6553_v33 = vld [vmem:[%s9333_s1 + $0x20] sm:$0xff] }
  0xc7   : > { %v5406_v43 = vpack.c.bf16 %v2184_v38, %v2182_v32  ;;  %v2517_v32 = vld [vmem:[%s5927_s30 + $0x8d8] sm:$0xff]  ;;  %v5422_v38 = vpack.c.bf16 %v2345_v28, %v2343_v27 }
  0xc8   : > { %4368 = vmatmul.mubr.msk.f32.gmra.mrb[76].mxu0 %vm316_vm0, %v6119_v34  ;;  %v2849_v28 = vld [vmem:[%s5927_s30 + $0x5f8] sm:$0xff] }
  0xc9   : > { %4378 = vmatmul.mubr.msk.f32.gmra.mrb[76].mxu1 %vm316_vm0, %v6119_v34  ;;  %1459 = vmatprep.mubr.f32.mxu0 %v9345_v0  ;;  %v5362_v34 = vpack.c.bf16 %v1995_v25, %v1993_v11  ;;  %v2013_v11 = vld [vmem:[%s5927_s30 + $0xaa0] sm:$0xff] }
  0xca   : > { %1628 = vmatprep.mubr.f32.mxu1 %v9345_v0  ;;  %v2015_v25 = vld [vmem:[%s5927_s30 + $0xba0] sm:$0xff] }
  0xcc   : > { %4369 = vmatmul.mubr.msk.f32.gmra.mrb[78].mxu0 %vm316_vm0, %v6130_v36 }
  0xcd   : > { %4379 = vmatmul.mubr.msk.f32.gmra.mrb[78].mxu1 %vm316_vm0, %v6130_v36  ;;  %1743 = vmatprep.mubr.f32.mxu0 %v9345_v0  ;;  %v5388_v36 = vpack.c.bf16 %v2169_v40, %v2167_v39  ;;  %v2334_v39 = vld [vmem:[%s5927_s30 + $0x1c8] sm:$0xff]  ;;  %v2501_v40 = vld [vmem:[%s5927_s30 + $0xd8] sm:$0xff] }
  0xce   : > { %1912 = vmatprep.mubr.f32.mxu1 %v9345_v0 }
  0xd0   : > { %4380 = vmatmul.mubr.msk.f32.vlgmr.msra.gmra.mrb[80].mxu0 %vm316_vm0, %v6477_v46 }
  0xd1   : > { %5363 = vmatpush1.bf16.msra.mxu0 %v5362_v34  ;;  %4390 = vmatmul.mubr.msk.f32.vlgmr.msra.gmra.mrb[80].mxu1 %vm316_vm0, %v6477_v46  ;;  %v2332_v34 = vld [vmem:[%s5927_s30 + $0xc8] sm:$0xff] }
  0xd2   : > { %1749 = vmatprep.mubr.f32.mxu0 %v9345_v0  ;;  %5387 = vmatpush1.bf16.msra.mxu1 %v5386_v41  ;;  %v2503_v41 = vld [vmem:[%s5927_s30 + $0x1d8] sm:$0xff]  ;;  %v5408_v44 = vpack.c.bf16 %v2334_v39, %v2332_v34 }
  0xd3   : > { %1918 = vmatprep.mubr.f32.mxu1 %v9345_v0  ;;  %5365 = vmatprep.subr.bf16.mxu0 %v5364_v42  ;;  %v5382_v42 = vpack.c.bf16 %v2015_v25, %v2013_v11  ;;  %v2348_v11 = vld [vmem:[%s5927_s30 + $0x8c8] sm:$0xff] }
  0xd4   : > { %4381 = vmatmul.mubr.msk.f32.gmra.mrb[82].mxu0 %vm316_vm0, %v6496_v58  ;;  %5389 = vmatprep.subr.bf16.mxu1 %v5388_v36  ;;  %v5432_v36 = vpack.c.bf16 %v2503_v41, %v2501_v40  ;;  %v2350_v25 = vld [vmem:[%s5927_s30 + $0x9c8] sm:$0xff]  ;;  %v2347_v41 = vld [vmem:[%s5927_s30 + $0x8c0] sm:$0xff] }
  0xd5   : > { %4391 = vmatmul.mubr.msk.f32.gmra.mrb[82].mxu1 %vm316_vm0, %v6496_v58  ;;  %1755 = vmatprep.mubr.f32.mxu0 %v9345_v0  ;;  %v5424_v40 = vpack.c.bf16 %v2350_v25, %v2348_v11  ;;  %v2847_v11 = vld [vmem:[%s5927_s30 + $0x4f8] sm:$0xff] }
  0xd6   : > { %5367 = vmatpush1.bf16.msra.mxu0 %v5366_v52  ;;  %1924 = vmatprep.mubr.f32.mxu1 %v9345_v0  ;;  %v2500_v52 = vld [vmem:[%s5927_s30 + $0xd0] sm:$0xff] }
  0xd7   : > { %5391 = vmatpush1.bf16.msra.mxu1 %v5390_v53  ;;  %5369 = vmatprep.subr.bf16.mxu0 %v5368_v54  ;;  %v2502_v53 = vld [vmem:[%s5927_s30 + $0x1d0] sm:$0xff]  ;;  %v6617_v54 = vld [vmem:[%s9333_s1 + $0x48] sm:$0xff] }
  0xd8   : > { %4382 = vmatmul.mubr.msk.f32.gmra.mrb[84].mxu0 %vm316_vm0, %v6515_v48  ;;  %5393 = vmatprep.subr.bf16.mxu1 %v5392_v35  ;;  %v2505_v35 = vld [vmem:[%s5927_s30 + $0x2d8] sm:$0xff]  ;;  %v5434_v60 = vpack.c.bf16 %v2502_v53, %v2500_v52  ;;  %v2352_v52 = vld [vmem:[%s5927_s30 + $0xac8] sm:$0xff] }
  0xd9   : > { %4392 = vmatmul.mubr.msk.f32.gmra.mrb[84].mxu1 %vm316_vm0, %v6515_v48  ;;  %1761 = vmatprep.mubr.f32.mxu0 %v9345_v0  ;;  %v2354_v53 = vld [vmem:[%s5927_s30 + $0xbc8] sm:$0xff] }
  0xda   : > { %1930 = vmatprep.mubr.f32.mxu1 %v9345_v0  ;;  %5371 = vmatpush1.bf16.msra.mxu0 %v5370_v2  ;;  %v2504_v2 = vld [vmem:[%s5927_s30 + $0x2d0] sm:$0xff]  ;;  %v5428_v1 = vpack.c.bf16 %v2354_v53, %v2352_v52  ;;  %v3007_v52 = vld [vmem:[%s9334_s2] sm:$0xff] }
  0xdb   : > { %5395 = vmatpush1.bf16.msra.mxu1 %v5394_v3  ;;  %5373 = vmatprep.subr.bf16.mxu0 %v5372_v4  ;;  %v5436_v3 = vpack.c.bf16 %v2507_v59, %v2505_v35  ;;  %v2506_v4 = vld [vmem:[%s5927_s30 + $0x3d0] sm:$0xff]  ;;  %v2523_v35 = vld [vmem:[%s5927_s30 + $0xbd8] sm:$0xff]  ;;  %v2684_v59 = vld [vmem:[%s5927_s30 + $0x7e8] sm:$0xff] }
  0xdc   : > { %4383 = vmatmul.mubr.msk.f32.gmra.mrb[86].mxu0 %vm316_vm0, %v6534_v20  ;;  %5397 = vmatprep.subr.bf16.mxu1 %v5396_v8  ;;  %v2511_v8 = vld [vmem:[%s5927_s30 + $0x5d8] sm:$0xff]  ;;  %v5438_v10 = vpack.c.bf16 %v2506_v4, %v2504_v2  ;;  %v2351_v2 = vld [vmem:[%s5927_s30 + $0xac0] sm:$0xff]  ;;  %v2520_v4 = vld [vmem:[%s5927_s30 + $0xad0] sm:$0xff] }
  0xdd   : > { %4393 = vmatmul.mubr.msk.f32.gmra.mrb[86].mxu1 %vm316_vm0, %v6534_v20  ;;  %1767 = vmatprep.mubr.f32.mxu0 %v9345_v0 }
  0xde   : > { %1936 = vmatprep.mubr.f32.mxu1 %v9345_v0  ;;  %5375 = vmatpush1.bf16.msra.mxu0 %v5374_v15  ;;  %v2508_v15 = vld [vmem:[%s5927_s30 + $0x4d0] sm:$0xff] }
  0xdf   : > { %5399 = vmatpush1.bf16.msra.mxu1 %v5398_v16  ;;  %5377 = vmatprep.subr.bf16.mxu0 %v5376_v17  ;;  %v5440_v16 = vpack.c.bf16 %v2511_v8, %v2509_v7  ;;  %v2510_v17 = vld [vmem:[%s5927_s30 + $0x5d0] sm:$0xff] }
  0xe0   : > { %4384 = vmatmul.mubr.msk.f32.gmra.mrb[88].mxu0 %vm316_vm0, %v6553_v33  ;;  %5401 = vmatprep.subr.bf16.mxu1 %v5400_v21  ;;  %v2515_v21 = vld [vmem:[%s5927_s30 + $0x7d8] sm:$0xff]  ;;  %v5442_v24 = vpack.c.bf16 %v2510_v17, %v2508_v15  ;;  %v2522_v8 = vld [vmem:[%s5927_s30 + $0xbd0] sm:$0xff] }
  0xe1   : > { %4394 = vmatmul.mubr.msk.f32.gmra.mrb[88].mxu1 %vm316_vm0, %v6553_v33  ;;  %1773 = vmatprep.mubr.f32.mxu0 %v9345_v0  ;;  %v2841_v15 = vld [vmem:[%s5927_s30 + $0x1f8] sm:$0xff]  ;;  %v5454_v19 = vpack.c.bf16 %v2522_v8, %v2520_v4  ;;  %v2838_v4 = vld [vmem:[%s5927_s30 + $0xf0] sm:$0xff]  ;;  %v3011_v8 = vld [vmem:[%s9334_s2 + $0x20] sm:$0xff] }
  0xe2   : > { %1942 = vmatprep.mubr.f32.mxu1 %v9345_v0  ;;  %5379 = vmatpush1.bf16.msra.mxu0 %v5378_v29  ;;  %v2512_v29 = vld [vmem:[%s5927_s30 + $0x6d0] sm:$0xff] }
  0xe3   : > { %5403 = vmatpush1.bf16.msra.mxu1 %v5402_v30  ;;  %5381 = vmatprep.subr.bf16.mxu0 %v5380_v31  ;;  %v5444_v30 = vpack.c.bf16 %v2515_v21, %v2513_v61  ;;  %v2514_v31 = vld [vmem:[%s5927_s30 + $0x7d0] sm:$0xff] }
  0xe4   : > { %4385 = vmatmul.mubr.msk.f32.gmra.mrb[90].mxu0 %vm316_vm0, %v6569_v45  ;;  %5405 = vmatprep.subr.bf16.mxu1 %v5404_v37  ;;  %v2519_v37 = vld [vmem:[%s5927_s30 + $0x9d8] sm:$0xff]  ;;  %v5446_v39 = vpack.c.bf16 %v2514_v31, %v2512_v29 }
  0xe5   : > { %4395 = vmatmul.mubr.msk.f32.gmra.mrb[90].mxu1 %vm316_vm0, %v6569_v45  ;;  %1779 = vmatprep.mubr.f32.mxu0 %v9345_v0  ;;  %v5448_v50 = vpack.c.bf16 %v2519_v37, %v2517_v32  ;;  %v2680_v32 = vld [vmem:[%s5927_s30 + $0x5e8] sm:$0xff] }
  0xe6   : > { %1948 = vmatprep.mubr.f32.mxu1 %v9345_v0  ;;  %5383 = vmatpush1.bf16.msra.mxu0 %v5382_v42  ;;  %v2349_v42 = vld [vmem:[%s5927_s30 + $0x9c0] sm:$0xff] }
  0xe7   : > { %5407 = vmatpush1.bf16.msra.mxu1 %v5406_v43  ;;  %5409 = vmatprep.subr.bf16.mxu0 %v5408_v44  ;;  %v2516_v43 = vld [vmem:[%s5927_s30 + $0x8d0] sm:$0xff] }
  0xe8   : > { %4386 = vmatmul.mubr.msk.f32.gmra.mrb[92].mxu0 %vm316_vm0, %v6580_v47  ;;  %5433 = vmatprep.subr.bf16.mxu1 %v5432_v36  ;;  %v5450_v63 = vpack.c.bf16 %v2518_v51, %v2516_v43 }
  0xe9   : > { %4396 = vmatmul.mubr.msk.f32.gmra.mrb[92].mxu1 %vm316_vm0, %v6580_v47  ;;  %1785 = vmatprep.mubr.f32.mxu0 %v9345_v0 }
  0xea   : > { %1954 = vmatprep.mubr.f32.mxu1 %v9345_v0 }
  0xec   : > { %4387 = vmatmul.mubr.msk.f32.gmra.mrb[94].mxu0 %vm316_vm0, %v6591_v22 }
  0xed   : > { %4397 = vmatmul.mubr.msk.f32.gmra.mrb[94].mxu1 %vm316_vm0, %v6591_v22  ;;  %1791 = vmatprep.mubr.f32.mxu0 %v9345_v0 }
  0xee   : > { %1960 = vmatprep.mubr.f32.mxu1 %v9345_v0 }
  0xf0   : > { %4388 = vmatmul.mubr.msk.f32.gmra.mrb[96].mxu0 %vm316_vm0, %v6602_v49 }
  0xf1   : > { %4398 = vmatmul.mubr.msk.f32.gmra.mrb[96].mxu1 %vm316_vm0, %v6602_v49  ;;  %1797 = vmatprep.mubr.f32.mxu0 %v9345_v0 }
  0xf2   : > { %1966 = vmatprep.mubr.f32.mxu1 %v9345_v0 }
  0xf4   : > { %4389 = vmatmul.mubr.msk.f32.gmra.mrb[98].mxu0 %vm316_vm0, %v6617_v54 }
  0xf5   : > { %4399 = vmatmul.mubr.msk.f32.gmra.mrb[98].mxu1 %vm316_vm0, %v6617_v54  ;;  %2081 = vmatprep.mubr.f32.mxu0 %v9345_v0 }
  0xf6   : > { %2250 = vmatprep.mubr.f32.mxu1 %v9345_v0 }
  0xf8   : > { %4400 = vmatmul.mubr.msk.f32.vlgmr.msra.gmra.mrb[100].mxu0 %vm316_vm0, %v6477_v46 }
  0xf9   : > { %5411 = vmatpush1.bf16.msra.mxu0 %v5410_v57  ;;  %4410 = vmatmul.mubr.msk.f32.vlgmr.msra.gmra.mrb[100].mxu1 %vm316_vm0, %v6477_v46  ;;  %v2521_v57 = vld [vmem:[%s5927_s30 + $0xad8] sm:$0xff] }
  0xfa   : > { %2087 = vmatprep.mubr.f32.mxu0 %v9345_v0  ;;  %5435 = vmatpush1.bf16.msra.mxu1 %v5434_v60  ;;  %v5426_v60 = vpack.c.bf16 %v2349_v42, %v2347_v41  ;;  %v5452_v7 = vpack.c.bf16 %v2523_v35, %v2521_v57  ;;  %v2675_v35 = vld [vmem:[%s5927_s30 + $0x3e0] sm:$0xff] }
  0xfb   : > { %2256 = vmatprep.mubr.f32.mxu1 %v9345_v0  ;;  %5413 = vmatprep.subr.bf16.mxu0 %v5412_v62 }
  0xfc   : > { %4401 = vmatmul.mubr.msk.f32.gmra.mrb[102].mxu0 %vm316_vm0, %v6496_v58  ;;  %5437 = vmatprep.subr.bf16.mxu1 %v5436_v3  ;;  %v2353_v3 = vld [vmem:[%s5927_s30 + $0xbc0] sm:$0xff] }
  0xfd   : > { %4411 = vmatmul.mubr.msk.f32.gmra.mrb[102].mxu1 %vm316_vm0, %v6496_v58  ;;  %2093 = vmatprep.mubr.f32.mxu0 %v9345_v0  ;;  %v5430_v17 = vpack.c.bf16 %v2353_v3, %v2351_v2  ;;  %v2671_v2 = vld [vmem:[%s5927_s30 + $0x1e0] sm:$0xff] }
  0xfe   : > { %5415 = vmatpush1.bf16.msra.mxu0 %v5414_v9  ;;  %2262 = vmatprep.mubr.f32.mxu1 %v9345_v0  ;;  %v2670_v9 = vld [vmem:[%s5927_s30 + $0xe8] sm:$0xff] }
  0xff   : > { %5439 = vmatpush1.bf16.msra.mxu1 %v5438_v10  ;;  %5417 = vmatprep.subr.bf16.mxu0 %v5416_v12  ;;  %v2672_v10 = vld [vmem:[%s5927_s30 + $0x1e8] sm:$0xff] }
 0x100   : > { %4402 = vmatmul.mubr.msk.f32.gmra.mrb[104].mxu0 %vm316_vm0, %v6515_v48  ;;  %5441 = vmatprep.subr.bf16.mxu1 %v5440_v16  ;;  %v5456_v61 = vpack.c.bf16 %v2672_v10, %v2670_v9  ;;  %v2846_v16 = vld [vmem:[%s5927_s30 + $0x4f0] sm:$0xff] }
 0x101   : > { %4412 = vmatmul.mubr.msk.f32.gmra.mrb[104].mxu1 %vm316_vm0, %v6515_v48  ;;  %2099 = vmatprep.mubr.f32.mxu0 %v9345_v0 }
 0x102   : > { %2268 = vmatprep.mubr.f32.mxu1 %v9345_v0  ;;  %5419 = vmatpush1.bf16.msra.mxu0 %v5418_v23 }
 0x103   : > { %v6671_v34 = vpop.f32.mrb[0].mxu0  ;;  %5443 = vmatpush1.bf16.msra.mxu1 %v5442_v24  ;;  %5421 = vmatprep.subr.bf16.mxu0 %v5420_v26  ;;  %v5480_v24 = vpack.c.bf16 %v2841_v15, %v2839_v14  ;;  %v2674_v14 = vld [vmem:[%s5927_s30 + $0x2e8] sm:$0xff]  ;;  %v2679_v26 = vld [vmem:[%s5927_s30 + $0x5e0] sm:$0xff] }
 0x104   : > { %v6676_v44 = vpop.f32.mrb[0].mxu1  ;;  %v6678_v36 = vpop.f32.mrb[1].mxu0  ;;  %4403 = vmatmul.mubr.msk.f32.gmra.mrb[106].mxu0 %vm316_vm0, %v6534_v20  ;;  %5445 = vmatprep.subr.bf16.mxu1 %v5444_v30  ;;  %v2676_v15 = vld [vmem:[%s5927_s30 + $0x3e8] sm:$0xff] }
 0x105   : > { %v6687_v56 = vpop.f32.mrb[1].mxu1  ;;  %4413 = vmatmul.mubr.msk.f32.gmra.mrb[106].mxu1 %vm316_vm0, %v6534_v20  ;;  %2105 = vmatprep.mubr.f32.mxu0 %v9345_v0 }
 0x106   : > { %2274 = vmatprep.mubr.f32.mxu1 %v9345_v0  ;;  %5423 = vmatpush1.bf16.msra.mxu0 %v5422_v38  ;;  %v5868_v38 = vmov 0  }
 0x107   : > { %v6697_v62 = vpop.f32.mrb[2].mxu0  ;;  %5447 = vmatpush1.bf16.msra.mxu1 %v5446_v39  ;;  %5425 = vmatprep.subr.bf16.mxu0 %v5424_v40  ;;  %v3008_v39 = vld [vmem:[%s9334_s2 + $0x8] sm:$0xff] }
 0x108   : > { %v6702_v5 = vpop.f32.mrb[2].mxu1  ;;  %v6704_v6 = vpop.f32.mrb[3].mxu0  ;;  %4404 = vmatmul.mubr.msk.f32.gmra.mrb[108].mxu0 %vm316_vm0, %v6553_v33  ;;  %5449 = vmatprep.subr.bf16.mxu1 %v5448_v50  ;;  %v2842_v50 = vld [vmem:[%s5927_s30 + $0x2f0] sm:$0xff] }
 0x109   : > { %v6713_v13 = vpop.f32.mrb[3].mxu1  ;;  %4414 = vmatmul.mubr.msk.f32.gmra.mrb[108].mxu1 %vm316_vm0, %v6553_v33  ;;  %2111 = vmatprep.mubr.f32.mxu0 %v9345_v0 }
 0x10a   : > { %2280 = vmatprep.mubr.f32.mxu1 %v9345_v0  ;;  %5427 = vmatpush1.bf16.msra.mxu0 %v5426_v60 }
 0x10b   : > { %v6723_v18 = vpop.f32.mrb[4].mxu0  ;;  %5451 = vmatpush1.bf16.msra.mxu1 %v5450_v63  ;;  %5429 = vmatprep.subr.bf16.mxu0 %v5428_v1  ;;  %v2669_v1 = vld [vmem:[%s5927_s30 + $0xe0] sm:$0xff]  ;;  %v5460_v63 = vpack.c.bf16 %v2676_v15, %v2674_v14 }
 0x10c   : > { %v6725_v21 = vpop.f32.mrb[4].mxu1  ;;  %v6727_v23 = vpop.f32.mrb[5].mxu0  ;;  %4405 = vmatmul.mubr.msk.f32.gmra.mrb[110].mxu0 %vm316_vm0, %v6569_v45  ;;  %5453 = vmatprep.subr.bf16.mxu1 %v5452_v7  ;;  %v2840_v7 = vld [vmem:[%s5927_s30 + $0x1f0] sm:$0xff] }
 0x10d   : > { %v6733_v27 = vpop.f32.mrb[5].mxu1  ;;  %4415 = vmatmul.mubr.msk.f32.gmra.mrb[110].mxu1 %vm316_vm0, %v6569_v45  ;;  %2117 = vmatprep.mubr.f32.mxu0 %v9345_v0 }
 0x10e   : > { %2286 = vmatprep.mubr.f32.mxu1 %v9345_v0  ;;  %5431 = vmatpush1.bf16.msra.mxu0 %v5430_v17 }
 0x10f   : > { %v6741_v29 = vpop.f32.mrb[6].mxu0  ;;  %5455 = vmatpush1.bf16.msra.mxu1 %v5454_v19  ;;  %5457 = vmatprep.subr.bf16.mxu0 %v5456_v61  ;;  %v5458_v61 = vpack.c.bf16 %v2671_v2, %v2669_v1  ;;  %v3013_v1 = vld [vmem:[%s9334_s2 + $0x30] sm:$0xff] }
 0x110   : > { %v6743_v30 = vpop.f32.mrb[6].mxu1  ;;  %v6745_v31 = vpop.f32.mrb[7].mxu0  ;;  %4406 = vmatmul.mubr.msk.f32.gmra.mrb[112].mxu0 %vm316_vm0, %v6580_v47  ;;  %5481 = vmatprep.subr.bf16.mxu1 %v5480_v24  ;;  %v2843_v24 = vld [vmem:[%s5927_s30 + $0x2f8] sm:$0xff] }
 0x111   : > { %v6751_v25 = vpop.f32.mrb[7].mxu1  ;;  %4416 = vmatmul.mubr.msk.f32.gmra.mrb[112].mxu1 %vm316_vm0, %v6580_v47  ;;  %2123 = vmatprep.mubr.f32.mxu0 %v9345_v0 }
 0x112   : > { %2292 = vmatprep.mubr.f32.mxu1 %v9345_v0  ;;  %5842 = vset.pattern.permute.xlu0 %v5868_v38 }
 0x113   : > { %v6759_v37 = vpop.f32.mrb[8].mxu0  ;;  %5843 = vset.pattern.permute.xlu1 %v5868_v38  ;;  %3024 = vperm.xlu0 %5842, %v3008_v39   ;;  %v2845_v38 = vld [vmem:[%s5927_s30 + $0x3f8] sm:$0xff]  ;;  %v2678_v39 = vld [vmem:[%s5927_s30 + $0x4e8] sm:$0xff] }
 0x114   : > { %v6764_v40 = vpop.f32.mrb[8].mxu1  ;;  %v6766_v41 = vpop.f32.mrb[9].mxu0  ;;  %4407 = vmatmul.mubr.msk.f32.gmra.mrb[114].mxu0 %vm316_vm0, %v6591_v22  ;;  %v5464_v14 = vpack.c.bf16 %v2680_v32, %v2678_v39  ;;  %v2853_v39 = vld [vmem:[%s5927_s30 + $0x7f8] sm:$0xff]  ;;  %v2681_v32 = vld [vmem:[%s5927_s30 + $0x6e0] sm:$0xff] }
 0x115   : > { %v6772_v43 = vpop.f32.mrb[9].mxu1  ;;  %4417 = vmatmul.mubr.msk.f32.gmra.mrb[114].mxu1 %vm316_vm0, %v6591_v22  ;;  %2129 = vmatprep.mubr.f32.mxu0 %v9345_v0 }
 0x116   : > { %2298 = vmatprep.mubr.f32.mxu1 %v9345_v0 }
 0x117   : > { %v6780_v51 = vpop.f32.mrb[10].mxu0  ;;  %3019 = vperm.xlu0 %5842, %v3007_v52   ;;  %v5482_v52 = vpack.c.bf16 %v2840_v7, %v2838_v4  ;;  %v5484_v4 = vpack.c.bf16 %v2845_v38, %v2843_v24  ;;  %v2844_v7 = vld [vmem:[%s5927_s30 + $0x3f0] sm:$0xff] }
 0x118   : > { %v6785_v53 = vpop.f32.mrb[10].mxu1  ;;  %v6787_v57 = vpop.f32.mrb[11].mxu0  ;;  %4408 = vmatmul.mubr.msk.f32.gmra.mrb[116].mxu0 %vm316_vm0, %v6602_v49 }
 0x119   : > { %v6793_v60 = vpop.f32.mrb[11].mxu1  ;;  %4418 = vmatmul.mubr.msk.f32.gmra.mrb[116].mxu1 %vm316_vm0, %v6602_v49  ;;  %2135 = vmatprep.mubr.f32.mxu0 %v9345_v0 }
 0x11a   : > { %2304 = vmatprep.mubr.f32.mxu1 %v9345_v0 }
 0x11b   : > { %v6803_v3 = vpop.f32.mrb[12].mxu0  ;;  %3039 = vperm.xlu0 %5842, %v3011_v8   ;;  %v2673_v8 = vld [vmem:[%s5927_s30 + $0x2e0] sm:$0xff] }
 0x11c   : > { %v6810_v9 = vpop.f32.mrb[12].mxu1  ;;  %v6812_v10 = vpop.f32.mrb[13].mxu0  ;;  %4409 = vmatmul.mubr.msk.f32.gmra.mrb[118].mxu0 %vm316_vm0, %v6617_v54  ;;  %v5462_v38 = vpack.c.bf16 %v2675_v35, %v2673_v8  ;;  %v5488_v35 = vpack.c.bf16 %v2849_v28, %v2847_v11  ;;  %v2682_v8 = vld [vmem:[%s5927_s30 + $0x6e8] sm:$0xff] }
 0x11d   : > { %v6820_v19 = vpop.f32.mrb[13].mxu1  ;;  %4419 = vmatmul.mubr.msk.f32.gmra.mrb[118].mxu1 %vm316_vm0, %v6617_v54  ;;  %2419 = vmatprep.mubr.f32.mxu0 %v9345_v0  ;;  %v2686_v28 = vld [vmem:[%s5927_s30 + $0x8e8] sm:$0xff] }
 0x11e   : > { %2588 = vmatprep.mubr.f32.mxu1 %v9345_v0 }
 0x11f   : > { %v6831_v17 = vpop.f32.mrb[14].mxu0  ;;  %3049 = vperm.xlu0 %5842, %v3013_v1  }
 0x120   : > { %v6838_v2 = vpop.f32.mrb[14].mxu1  ;;  %v6840_v42 = vpop.f32.mrb[15].mxu0  ;;  %4420 = vmatmul.mubr.msk.f32.vlgmr.msra.gmra.mrb[120].mxu0 %vm316_vm0, %v6477_v46 }
 0x121   : > { %v6849_v15 = vpop.f32.mrb[15].mxu1  ;;  %5459 = vmatpush1.bf16.msra.mxu0 %v5458_v61  ;;  %4430 = vmatmul.mubr.msk.f32.vlgmr.msra.gmra.mrb[120].mxu1 %vm316_vm0, %v6477_v46  ;;  %v5486_v61 = vpack.c.bf16 %v2844_v7, %v2842_v50  ;;  %v2677_v46 = vld [vmem:[%s5927_s30 + $0x4e0] sm:$0xff] }
 0x122   : > { %2425 = vmatprep.mubr.f32.mxu0 %v9345_v0  ;;  %5483 = vmatpush1.bf16.msra.mxu1 %v5482_v52  ;;  %v2848_v52 = vld [vmem:[%s5927_s30 + $0x5f0] sm:$0xff]  ;;  %v5466_v11 = vpack.c.bf16 %v2679_v26, %v2677_v46 }
 0x123   : > { %v6858_v1 = vpop.f32.mrb[16].mxu0  ;;  %2594 = vmatprep.mubr.f32.mxu1 %v9345_v0  ;;  %5461 = vmatprep.subr.bf16.mxu0 %v5460_v63  ;;  %v2851_v63 = vld [vmem:[%s5927_s30 + $0x6f8] sm:$0xff]  ;;  %v5490_v7 = vpack.c.bf16 %v2848_v52, %v2846_v16  ;;  %v2852_v46 = vld [vmem:[%s5927_s30 + $0x7f0] sm:$0xff] }
 0x124   : > { %9347 = vst [vmem:[#allocation2_spill] sm:$0xff] %v6858_v1  ;;  %v6864_v24 = vpop.f32.mrb[16].mxu1  ;;  %v6866_v12 = vpop.f32.mrb[17].mxu0  ;;  %4421 = vmatmul.mubr.msk.f32.gmra.mrb[122].mxu0 %vm316_vm0, %v6496_v58  ;;  %5485 = vmatprep.subr.bf16.mxu1 %v5484_v4  ;;  %v5492_v26 = vpack.c.bf16 %v2853_v39, %v2851_v63  ;;  %v2857_v52 = vld [vmem:[%s5927_s30 + $0x9f8] sm:$0xff] }
 0x125   : > { %9348 = vst [vmem:[#allocation3_spill] sm:$0xff] %v6864_v24  ;;  %v6875_v50 = vpop.f32.mrb[17].mxu1  ;;  %4431 = vmatmul.mubr.msk.f32.gmra.mrb[122].mxu1 %vm316_vm0, %v6496_v58  ;;  %2431 = vmatprep.mubr.f32.mxu0 %v9345_v0  ;;  %v5468_v58 = vpack.c.bf16 %v2684_v59, %v2682_v8  ;;  %v2850_v24 = vld [vmem:[%s5927_s30 + $0x6f0] sm:$0xff]  ;;  %v5470_v8 = vpack.c.bf16 %v2683_v55, %v2681_v32 }
 0x126   : > { %5463 = vmatpush1.bf16.msra.mxu0 %v5462_v38  ;;  %2600 = vmatprep.mubr.f32.mxu1 %v9345_v0  ;;  %v5494_v39 = vpack.c.bf16 %v2852_v46, %v2850_v24  ;;  %v2856_v24 = vld [vmem:[%s5927_s30 + $0x9f0] sm:$0xff] }
 0x127   : > { %v6885_v4 = vpop.f32.mrb[18].mxu0  ;;  %5487 = vmatpush1.bf16.msra.mxu1 %v5486_v61  ;;  %5465 = vmatprep.subr.bf16.mxu0 %v5464_v14  ;;  %v2688_v61 = vld [vmem:[%s5927_s30 + $0x9e8] sm:$0xff]  ;;  %v2855_v14 = vld [vmem:[%s5927_s30 + $0x8f8] sm:$0xff] }
 0x128   : > { %9349 = vst [vmem:[#allocation4_spill] sm:$0xff] %v6885_v4  ;;  %v6890_v1 = vpop.f32.mrb[18].mxu1  ;;  %v6892_v38 = vpop.f32.mrb[19].mxu0  ;;  %4422 = vmatmul.mubr.msk.f32.gmra.mrb[124].mxu0 %vm316_vm0, %v6515_v48  ;;  %5489 = vmatprep.subr.bf16.mxu1 %v5488_v35  ;;  %v5472_v59 = vpack.c.bf16 %v2688_v61, %v2686_v28  ;;  %v2854_v4 = vld [vmem:[%s5927_s30 + $0x8f0] sm:$0xff]  ;;  %v9352_v35 = vmax.f32 %v6671_v34, %v6676_v44  ;;  %v2690_v28 = vld [vmem:[%s5927_s30 + $0xae8] sm:$0xff]  ;;  %v2859_v44 = vld [vmem:[%s5927_s30 + $0xaf8] sm:$0xff] }
 0x129   : > { %9350 = vst [vmem:[#allocation5_spill] sm:$0xff] %v6890_v1  ;;  %v6901_v16 = vpop.f32.mrb[19].mxu1  ;;  %4432 = vmatmul.mubr.msk.f32.gmra.mrb[124].mxu1 %vm316_vm0, %v6515_v48  ;;  %2437 = vmatprep.mubr.f32.mxu0 %v9345_v0  ;;  %v2685_v48 = vld [vmem:[%s5927_s30 + $0x8e0] sm:$0xff]  ;;  %v5496_v32 = vpack.c.bf16 %v2857_v52, %v2855_v14  ;;  %v5498_v52 = vpack.c.bf16 %v2856_v24, %v2854_v4 }
 0x12a   : > { %9351 = vst [vmem:[#allocation6_spill] sm:$0xff] %v6901_v16  ;;  %2606 = vmatprep.mubr.f32.mxu1 %v9345_v0  ;;  %5467 = vmatpush1.bf16.msra.mxu0 %v5466_v11  ;;  %v2687_v1 = vld [vmem:[%s5927_s30 + $0x9e0] sm:$0xff]  ;;  %v9355_v4 = vmax.f32 %v6704_v6, %v6713_v13  ;;  %v9357_v13 = vmax.f32 %v6723_v18, %v6725_v21  ;;  %v3009_v18 = vld [vmem:[%s9334_s2 + $0x10] sm:$0xff] }
 0x12b   : > { %v731_v63 = vpop.f32.mrb[20].mxu0  ;;  %5491 = vmatpush1.bf16.msra.mxu1 %v5490_v7  ;;  %5469 = vmatprep.subr.bf16.mxu0 %v5468_v58  ;;  %v2692_v7 = vld [vmem:[%s5927_s30 + $0xbe8] sm:$0xff]  ;;  %v9353_v58 = vmax.f32 %v6678_v36, %v6687_v56  ;;  %v5474_v36 = vpack.c.bf16 %v2687_v1, %v2685_v48  ;;  %v2858_v48 = vld [vmem:[%s5927_s30 + $0xaf0] sm:$0xff] }
 0x12c   : > { %v6917_v16 = vmax.f32 %v9352_v35, %v731_v63  ;;  %v733_v11 = vpop.f32.mrb[21].mxu0  ;;  %4423 = vmatmul.mubr.msk.f32.gmra.mrb[126].mxu0 %vm316_vm0, %v6534_v20  ;;  %v6921_v55 = vpop.f32.mrb[20].mxu1  ;;  %5493 = vmatprep.subr.bf16.mxu1 %v5492_v26  ;;  %v2861_v26 = vld [vmem:[%s5927_s30 + $0xbf8] sm:$0xff]  ;;  %v5476_v35 = vpack.c.bf16 %v2692_v7, %v2690_v28  ;;  %v2689_v63 = vld [vmem:[%s5927_s30 + $0xae0] sm:$0xff] }
 0x12d   : > { %v6929_v46 = vmax.f32 %v9353_v58, %v733_v11  ;;  %v6931_v34 = vpop.f32.mrb[21].mxu1  ;;  %4433 = vmatmul.mubr.msk.f32.gmra.mrb[126].mxu1 %vm316_vm0, %v6534_v20  ;;  %2443 = vmatprep.mubr.f32.mxu0 %v9345_v0  ;;  %v2691_v11 = vld [vmem:[%s5927_s30 + $0xbe0] sm:$0xff]  ;;  %v9354_v58 = vmax.f32 %v6697_v62, %v6702_v5  ;;  %v9356_v62 = vmov 0.0  }
 0x12e   : > { %2612 = vmatprep.mubr.f32.mxu1 %v9345_v0  ;;  %5471 = vmatpush1.bf16.msra.mxu0 %v5470_v8  ;;  %v5500_v8 = vpack.c.bf16 %v2861_v26, %v2859_v44 }
 0x12f   : > { %v960_v56 = vmax.f32 %v6929_v46, %v6931_v34  ;;  %v737_v14 = vpop.f32.mrb[22].mxu0  ;;  %5495 = vmatpush1.bf16.msra.mxu1 %v5494_v39  ;;  %5473 = vmatprep.subr.bf16.mxu0 %v5472_v59  ;;  %v2860_v39 = vld [vmem:[%s5927_s30 + $0xbf0] sm:$0xff]  ;;  %s4299_s30 = sshll.u32 %s9432_s25, 3 }
 0x130   : > { %v6948_v61 = vmax.f32 %v9354_v58, %v737_v14  ;;  %v739_v0 = vpop.f32.mrb[23].mxu0  ;;  %4424 = vmatmul.mubr.msk.f32.gmra.mrb[128].mxu0 %vm316_vm0, %v6553_v33  ;;  %v6952_v1 = vpop.f32.mrb[22].mxu1  ;;  %5497 = vmatprep.subr.bf16.mxu1 %v5496_v32  ;;  %v5478_v32 = vpack.c.bf16 %v2691_v11, %v2689_v63  ;;  %v9358_v14 = vmax.f32 %v6727_v23, %v6733_v27  ;;  %s281_s20 = scalar_lea.vmem %s9339_s7, %s4299_s30 }
 0x131   : > { %v6959_v59 = vmax.f32 %v9355_v4, %v739_v0  ;;  %v6961_v24 = vpop.f32.mrb[23].mxu1  ;;  %4434 = vmatmul.mubr.msk.f32.gmra.mrb[128].mxu1 %vm316_vm0, %v6553_v33  ;;  %2449 = vmatprep.mubr.f32.mxu0 %v9356_v62  ;;  %v5502_v0 = vpack.c.bf16 %v2860_v39, %v2858_v48  ;;  %v9359_v63 = vmax.f32 %v6741_v29, %v6743_v30  ;;  %v3010_v29 = vld [vmem:[%s9334_s2 + $0x18] sm:$0xff] }
 0x132   : > { %v961_v5 = vmax.f32 %v6948_v61, %v6952_v1  ;;  %2618 = vmatprep.mubr.f32.mxu1 %v9356_v62  ;;  %5475 = vmatpush1.bf16.msra.mxu0 %v5474_v36  ;;  %v3015_v36 = vld [vmem:[%s9334_s2 + $0x40] sm:$0xff]  ;;  %v9360_v48 = vmax.f32 %v6745_v31, %v6751_v25 }
 0x133   : > { %v962_v28 = vmax.f32 %v6959_v59, %v6961_v24  ;;  %v743_v6 = vpop.f32.mrb[24].mxu0  ;;  %5499 = vmatpush1.bf16.msra.mxu1 %v5498_v52  ;;  %5477 = vmatprep.subr.bf16.mxu0 %v5476_v35 }
 0x134   : > { %v6974_v7 = vmax.f32 %v9357_v13, %v743_v6  ;;  %v745_v44 = vpop.f32.mrb[25].mxu0  ;;  %4425 = vmatmul.mubr.msk.f32.gmra.mrb[130].mxu0 %vm316_vm0, %v6569_v45  ;;  %v6978_v26 = vpop.f32.mrb[24].mxu1  ;;  %5501 = vmatprep.subr.bf16.mxu1 %v5500_v8 }
 0x135   : > { %v6986_v52 = vmax.f32 %v9358_v14, %v745_v44  ;;  %v6988_v35 = vpop.f32.mrb[25].mxu1  ;;  %4435 = vmatmul.mubr.msk.f32.gmra.mrb[130].mxu1 %vm316_vm0, %v6569_v45  ;;  %2455 = vmatprep.mubr.f32.mxu0 %v9356_v62  ;;  %v9362_v44 = vmax.f32 %v6766_v41, %v6772_v43 }
 0x136   : > { %v963_v21 = vmax.f32 %v6974_v7, %v6978_v26  ;;  %2624 = vmatprep.mubr.f32.mxu1 %v9356_v62  ;;  %5479 = vmatpush1.bf16.msra.mxu0 %v5478_v32  ;;  %v9361_v32 = vmax.f32 %v6759_v37, %v6764_v40  ;;  %v3012_v37 = vld [vmem:[%s9334_s2 + $0x28] sm:$0xff] }
 0x137   : > { %v964_v23 = vmax.f32 %v6986_v52, %v6988_v35  ;;  %v749_v27 = vpop.f32.mrb[26].mxu0  ;;  %5503 = vmatpush1.bf16.msra.mxu1 %v5502_v0  ;;  %3059 = vperm.xlu0 %5842, %v3015_v36  }
 0x138   : > { %v7004_v11 = vmax.f32 %v9359_v63, %v749_v27  ;;  %v751_v58 = vpop.f32.mrb[27].mxu0  ;;  %4426 = vmatmul.mubr.msk.f32.gmra.mrb[132].mxu0 %vm316_vm0, %v6580_v47  ;;  %v7008_v8 = vpop.f32.mrb[26].mxu1  ;;  %3029 = vperm.xlu1 %5843, %v3009_v18   ;;  %v9363_v18 = vmax.f32 %v6780_v51, %v6785_v53  ;;  %v3014_v51 = vld [vmem:[%s9334_s2 + $0x38] sm:$0xff] }
 0x139   : > { %v7013_v39 = vmax.f32 %v9360_v48, %v751_v58  ;;  %v7015_v4 = vpop.f32.mrb[27].mxu1  ;;  %4436 = vmatmul.mubr.msk.f32.gmra.mrb[132].mxu1 %vm316_vm0, %v6580_v47  ;;  %2461 = vmatprep.mubr.f32.mxu0 %v9356_v62  ;;  %v9364_v48 = vmax.f32 %v6787_v57, %v6793_v60  ;;  %v9374_v57 = vld [vmem:[#allocation5_spill] sm:$0xff] }
 0x13a   : > { %v965_v30 = vmax.f32 %v7004_v11, %v7008_v8  ;;  %2630 = vmatprep.mubr.f32.mxu1 %v9356_v62 }
 0x13b   : > { %v966_v31 = vmax.f32 %v7013_v39, %v7015_v4  ;;  %v755_v25 = vpop.f32.mrb[28].mxu0 }
 0x13c   : > { %v7031_v6 = vmax.f32 %v9361_v32, %v755_v25  ;;  %v757_v0 = vpop.f32.mrb[29].mxu0  ;;  %4427 = vmatmul.mubr.msk.f32.gmra.mrb[134].mxu0 %vm316_vm0, %v6591_v22  ;;  %v7035_v13 = vpop.f32.mrb[28].mxu1  ;;  %3034 = vperm.xlu1 %5843, %v3010_v29   ;;  %v9365_v32 = vmax.f32 %v6803_v3, %v6810_v9  ;;  %v3016_v3 = vld [vmem:[%s9334_s2 + $0x48] sm:$0xff] }
 0x13d   : > { %v7040_v36 = vmax.f32 %v9362_v44, %v757_v0  ;;  %v7042_v14 = vpop.f32.mrb[29].mxu1  ;;  %4437 = vmatmul.mubr.msk.f32.gmra.mrb[134].mxu1 %vm316_vm0, %v6591_v22  ;;  %2467 = vmatprep.mubr.f32.mxu0 %v9356_v62 }
 0x13e   : > { %v967_v40 = vmax.f32 %v7031_v6, %v7035_v13  ;;  %2636 = vmatprep.mubr.f32.mxu1 %v9356_v62 }
 0x13f   : > { %v761_v43 = vpop.f32.mrb[30].mxu0 }
 0x140   : > { %v7058_v27 = vmax.f32 %v9363_v18, %v761_v43  ;;  %v763_v63 = vpop.f32.mrb[31].mxu0  ;;  %4428 = vmatmul.mubr.msk.f32.gmra.mrb[136].mxu0 %vm316_vm0, %v6602_v49  ;;  %v7062_v58 = vpop.f32.mrb[30].mxu1  ;;  %3044 = vperm.xlu1 %5843, %v3012_v37   ;;  %v9366_v43 = vmax.f32 %v6812_v10, %v6820_v19 }
 0x141   : > { %v7067_v29 = vmax.f32 %v9364_v48, %v763_v63  ;;  %v7069_v25 = vpop.f32.mrb[31].mxu1  ;;  %4438 = vmatmul.mubr.msk.f32.gmra.mrb[136].mxu1 %vm316_vm0, %v6602_v49  ;;  %2473 = vmatprep.mubr.f32.mxu0 %v9356_v62  ;;  %v9367_v48 = vmax.f32 %v6831_v17, %v6838_v2  ;;  %v9372_v17 = vmax.f32 %v6866_v12, %v6875_v50 }
 0x142   : > { %2642 = vmatprep.mubr.f32.mxu1 %v9356_v62 }
 0x143   : > { %v767_v60 = vpop.f32.mrb[32].mxu0 }
 0x144   : > { %v7085_v0 = vmax.f32 %v9365_v32, %v767_v60  ;;  %v769_v44 = vpop.f32.mrb[33].mxu0  ;;  %4429 = vmatmul.mubr.msk.f32.gmra.mrb[138].mxu0 %vm316_vm0, %v6617_v54  ;;  %v7089_v37 = vpop.f32.mrb[32].mxu1  ;;  %3054 = vperm.xlu1 %5843, %v3014_v51   ;;  %v5854_v60 = vld [vmem:[%s9333_s1] sm:$0xff] }
 0x145   : > { %v7094_v18 = vmax.f32 %v9366_v43, %v769_v44  ;;  %v7096_v63 = vpop.f32.mrb[33].mxu1  ;;  %4439 = vmatmul.mubr.msk.f32.gmra.mrb[138].mxu1 %vm316_vm0, %v6617_v54  ;;  %2757 = vmatprep.mubr.f32.mxu0 %v9356_v62  ;;  %v9368_v44 = vmax.f32 %v6840_v42, %v6849_v15 }
 0x146   : > { %2926 = vmatprep.mubr.f32.mxu1 %v9356_v62 }
 0x147   : > { %v773_v19 = vpop.f32.mrb[34].mxu0 }
 0x148   : > { %v7112_v51 = vmax.f32 %v9367_v48, %v773_v19  ;;  %v775_v54 = vpop.f32.mrb[35].mxu0  ;;  %4440 = vmatmul.mubr.msk.f32.vlgmr.msra.gmra.mrb[140].mxu0 %vm316_vm0, %v5854_v60  ;;  %v7118_v32 = vpop.f32.mrb[34].mxu1  ;;  %3064 = vperm.xlu1 %5843, %v3016_v3   ;;  %v9369_v19 = vld [vmem:[#allocation2_spill] sm:$0xff]  ;;  %v9370_v48 = vld [vmem:[#allocation3_spill] sm:$0xff] }
 0x149   : > { %v7123_v43 = vmax.f32 %v9368_v44, %v775_v54  ;;  %v7125_v10 = vpop.f32.mrb[35].mxu1  ;;  %4450 = vmatmul.mubr.msk.f32.vlgmr.msra.gmra.mrb[140].mxu1 %vm316_vm0, %v5854_v60  ;;  %2763 = vmatprep.mubr.f32.mxu0 %v9356_v62  ;;  %v9371_v42 = vmax.f32 %v9369_v19, %v9370_v48  ;;  %v5855_v60 = vld [vmem:[%s9333_s1 + $0x8] sm:$0xff] }
 0x14a   : > { %2932 = vmatprep.mubr.f32.mxu1 %v9356_v62 }
 0x14b   : > { %v779_v3 = vpop.f32.mrb[36].mxu0 }
 0x14c   : > { %v7137_v15 = vmax.f32 %v9371_v42, %v779_v3  ;;  %v781_v54 = vpop.f32.mrb[37].mxu0  ;;  %4441 = vmatmul.mubr.msk.f32.gmra.mrb[142].mxu0 %vm316_vm0, %v5855_v60  ;;  %v7143_v44 = vpop.f32.mrb[36].mxu1  ;;  %v9373_v42 = vld [vmem:[#allocation4_spill] sm:$0xff]  ;;  %v9376_v3 = vld [vmem:[#allocation6_spill] sm:$0xff] }
 0x14d   : > { %v7148_v9 = vmax.f32 %v9372_v17, %v781_v54  ;;  %v7150_v2 = vpop.f32.mrb[37].mxu1  ;;  %4451 = vmatmul.mubr.msk.f32.gmra.mrb[142].mxu1 %vm316_vm0, %v5855_v60  ;;  %2769 = vmatprep.mubr.f32.mxu0 %v9356_v62  ;;  %v9375_v12 = vmax.f32 %v9373_v42, %v9374_v57  ;;  %v5856_v54 = vld [vmem:[%s9333_s1 + $0x10] sm:$0xff]  ;;  %v9377_v53 = vmax.f32 %v6892_v38, %v9376_v3 }
 0x14e   : > { %2938 = vmatprep.mubr.f32.mxu1 %v9356_v62  ;;  %v9378_v38 = vmax.f32 %v6917_v16, %v6921_v55 }
 0x14f   : > { %v785_v48 = vpop.f32.mrb[38].mxu0 }
 0x150   : > { %v7162_v50 = vmax.f32 %v9375_v12, %v785_v48  ;;  %v787_v17 = vpop.f32.mrb[39].mxu0  ;;  %4442 = vmatmul.mubr.msk.f32.gmra.mrb[144].mxu0 %vm316_vm0, %v5856_v54  ;;  %v7168_v60 = vpop.f32.mrb[38].mxu1 }
 0x151   : > { %v7173_v41 = vmax.f32 %v9377_v53, %v787_v17  ;;  %v7175_v19 = vpop.f32.mrb[39].mxu1  ;;  %4452 = vmatmul.mubr.msk.f32.gmra.mrb[144].mxu1 %vm316_vm0, %v5856_v54  ;;  %2775 = vmatprep.mubr.f32.mxu0 %v9356_v62 }
 0x152   : > { %v977_v57 = vmax.f32 %v7162_v50, %v7168_v60  ;;  %2944 = vmatprep.mubr.f32.mxu1 %v9356_v62 }
 0x153   : > { %v978_v48 = vmax.f32 %v7173_v41, %v7175_v19  ;;  %v1069_v42 = vpop.f32.mrb[40].mxu0 }
 0x154   : > { %v7187_v53 = vmax.f32 %v9378_v38, %v1069_v42  ;;  %v1071_v3 = vpop.f32.mrb[41].mxu0  ;;  %4443 = vmatmul.mubr.msk.f32.gmra.mrb[146].mxu0 %vm316_vm0, %v6534_v20  ;;  %v7191_v12 = vpop.f32.mrb[40].mxu1 }
 0x155   : > { %v7196_v17 = vmax.f32 %v960_v56, %v1071_v3  ;;  %v7198_v54 = vpop.f32.mrb[41].mxu1  ;;  %4453 = vmatmul.mubr.msk.f32.gmra.mrb[146].mxu1 %vm316_vm0, %v6534_v20  ;;  %2781 = vmatprep.mubr.f32.mxu0 %v9356_v62 }
 0x156   : > { %v1297_v16 = vmax.f32 %v7187_v53, %v7191_v12  ;;  %2950 = vmatprep.mubr.f32.mxu1 %v9356_v62 }
 0x157   : > { %v1298_v55 = vmax.f32 %v7196_v17, %v7198_v54  ;;  %v1075_v42 = vpop.f32.mrb[42].mxu0 }
 0x158   : > { %v7211_v46 = vmax.f32 %v961_v5, %v1075_v42  ;;  %v1077_v34 = vpop.f32.mrb[43].mxu0  ;;  %4444 = vmatmul.mubr.msk.f32.gmra.mrb[148].mxu0 %vm316_vm0, %v6553_v33  ;;  %v7215_v20 = vpop.f32.mrb[42].mxu1 }
 0x159   : > { %v7220_v56 = vmax.f32 %v962_v28, %v1077_v34  ;;  %v7222_v38 = vpop.f32.mrb[43].mxu1  ;;  %4454 = vmatmul.mubr.msk.f32.gmra.mrb[148].mxu1 %vm316_vm0, %v6553_v33  ;;  %2787 = vmatprep.mubr.f32.mxu0 %v9356_v62 }
 0x15a   : > { %v1299_v61 = vmax.f32 %v7211_v46, %v7215_v20  ;;  %2956 = vmatprep.mubr.f32.mxu1 %v9356_v62  ;;  %v4476_v46 = vld [vmem:[%s9335_s3 + $0x180] sm:$0xff]  ;;  %v4477_v20 = vld [vmem:[%s9335_s3 + $0x188] sm:$0xff] }
 0x15b   : > { %v1300_v1 = vmax.f32 %v7220_v56, %v7222_v38  ;;  %v1081_v5 = vpop.f32.mrb[44].mxu0  ;;  %v3123_v56 = vld [vmem:[%s9335_s3 + $0x80] sm:$0xff] }
 0x15c   : > { %v7235_v59 = vmax.f32 %v963_v21, %v1081_v5  ;;  %v1083_v24 = vpop.f32.mrb[45].mxu0  ;;  %4445 = vmatmul.mubr.msk.f32.gmra.mrb[150].mxu0 %vm316_vm0, %v6569_v45  ;;  %v7239_v33 = vpop.f32.mrb[44].mxu1 }
 0x15d   : > { %v7244_v28 = vmax.f32 %v964_v23, %v1083_v24  ;;  %v7246_v3 = vpop.f32.mrb[45].mxu1  ;;  %4455 = vmatmul.mubr.msk.f32.gmra.mrb[150].mxu1 %vm316_vm0, %v6569_v45  ;;  %2793 = vmatprep.mubr.f32.mxu0 %v9356_v62 }
 0x15e   : > { %v1301_v7 = vmax.f32 %v7235_v59, %v7239_v33  ;;  %2962 = vmatprep.mubr.f32.mxu1 %v9356_v62 }
 0x15f   : > { %v1302_v26 = vmax.f32 %v7244_v28, %v7246_v3  ;;  %v1087_v21 = vpop.f32.mrb[46].mxu0 }
 0x160   : > { %v7259_v52 = vmax.f32 %v965_v30, %v1087_v21  ;;  %v1089_v35 = vpop.f32.mrb[47].mxu0  ;;  %4446 = vmatmul.mubr.msk.f32.gmra.mrb[152].mxu0 %vm316_vm0, %v6580_v47  ;;  %v7263_v45 = vpop.f32.mrb[46].mxu1  ;;  %v9381_v21 = vmax.f32 %v7067_v29, %v7069_v25  ;;  %v9382_v29 = vmax.f32 %v7085_v0, %v7089_v37 }
 0x161   : > { %v7268_v23 = vmax.f32 %v966_v31, %v1089_v35  ;;  %v7270_v42 = vpop.f32.mrb[47].mxu1  ;;  %4456 = vmatmul.mubr.msk.f32.gmra.mrb[152].mxu1 %vm316_vm0, %v6580_v47  ;;  %2799 = vmatprep.mubr.f32.mxu0 %v9356_v62  ;;  %v9379_v31 = vmax.f32 %v7040_v36, %v7042_v14  ;;  %v9380_v36 = vmax.f32 %v7058_v27, %v7062_v58 }
 0x162   : > { %v1303_v11 = vmax.f32 %v7259_v52, %v7263_v45  ;;  %2968 = vmatprep.mubr.f32.mxu1 %v9356_v62 }
 0x163   : > { %v1304_v8 = vmax.f32 %v7268_v23, %v7270_v42  ;;  %v1093_v30 = vpop.f32.mrb[48].mxu0 }
 0x164   : > { %v7283_v39 = vmax.f32 %v967_v40, %v1093_v30  ;;  %v1095_v4 = vpop.f32.mrb[49].mxu0  ;;  %4447 = vmatmul.mubr.msk.f32.gmra.mrb[154].mxu0 %vm316_vm0, %v6591_v22  ;;  %v7287_v47 = vpop.f32.mrb[48].mxu1 }
 0x165   : > { %v7292_v34 = vmax.f32 %v9379_v31, %v1095_v4  ;;  %v7294_v5 = vpop.f32.mrb[49].mxu1  ;;  %4457 = vmatmul.mubr.msk.f32.gmra.mrb[154].mxu1 %vm316_vm0, %v6591_v22  ;;  %2805 = vmatprep.mubr.f32.mxu0 %v9356_v62  ;;  %v5857_v4 = vld [vmem:[%s9333_s1 + $0x40] sm:$0xff] }
 0x166   : > { %v1305_v6 = vmax.f32 %v7283_v39, %v7287_v47  ;;  %2974 = vmatprep.mubr.f32.mxu1 %v9356_v62 }
 0x167   : > { %v1306_v13 = vmax.f32 %v7292_v34, %v7294_v5  ;;  %v1099_v40 = vpop.f32.mrb[50].mxu0  ;;  %v4464_v34 = vld [vmem:[%s9335_s3 + $0x120] sm:$0xff]  ;;  %v4465_v5 = vld [vmem:[%s9335_s3 + $0x128] sm:$0xff] }
 0x168   : > { %v7307_v14 = vmax.f32 %v9380_v36, %v1099_v40  ;;  %v1101_v24 = vpop.f32.mrb[51].mxu0  ;;  %4448 = vmatmul.mubr.msk.f32.gmra.mrb[156].mxu0 %vm316_vm0, %v6602_v49  ;;  %v7311_v22 = vpop.f32.mrb[50].mxu1  ;;  %v5858_v40 = vld [vmem:[%s9333_s1 + $0x48] sm:$0xff] }
 0x169   : > { %v7316_v35 = vmax.f32 %v9381_v21, %v1101_v24  ;;  %v7318_v30 = vpop.f32.mrb[51].mxu1  ;;  %4458 = vmatmul.mubr.msk.f32.gmra.mrb[156].mxu1 %vm316_vm0, %v5857_v4  ;;  %2811 = vmatprep.mubr.f32.mxu0 %v9356_v62  ;;  %v9383_v24 = vmax.f32 %v7094_v18, %v7096_v63  ;;  %v9385_v63 = vmax.f32 %v7123_v43, %v7125_v10 }
 0x16a   : > { %2980 = vmatprep.mubr.f32.mxu1 %v9356_v62  ;;  %v9387_v10 = vmax.f32 %v7148_v9, %v7150_v2 }
 0x16b   : > { %v1105_v58 = vpop.f32.mrb[52].mxu0 }
 0x16c   : > { %v7333_v25 = vmax.f32 %v9382_v29, %v1105_v58  ;;  %v1107_v31 = vpop.f32.mrb[53].mxu0  ;;  %4449 = vmatmul.mubr.msk.f32.gmra.mrb[158].mxu0 %vm316_vm0, %v5858_v40  ;;  %v7339_v36 = vpop.f32.mrb[52].mxu1  ;;  %v9384_v29 = vmax.f32 %v7112_v51, %v7118_v32  ;;  %v9386_v51 = vmax.f32 %v7137_v15, %v7143_v44 }
 0x16d   : > { %v7344_v21 = vmax.f32 %v9383_v24, %v1107_v31  ;;  %v7346_v4 = vpop.f32.mrb[53].mxu1  ;;  %4459 = vmatmul.mubr.msk.f32.gmra.mrb[158].mxu1 %vm316_vm0, %v5858_v40 }
 0x16f   : > { %v1111_v58 = vpop.f32.mrb[54].mxu0 }
 0x170   : > { %v7356_v27 = vmax.f32 %v9384_v29, %v1111_v58  ;;  %v1113_v49 = vpop.f32.mrb[55].mxu0  ;;  %v7358_v18 = vpop.f32.mrb[54].mxu1 }
 0x171   : > { %v7363_v31 = vmax.f32 %v9385_v63, %v1113_v49  ;;  %v7365_v40 = vpop.f32.mrb[55].mxu1 }
 0x173   : > { %v1117_v0 = vpop.f32.mrb[56].mxu0 }
 0x174   : > { %v7374_v32 = vmax.f32 %v9386_v51, %v1117_v0  ;;  %v1119_v58 = vpop.f32.mrb[57].mxu0  ;;  %v7376_v29 = vpop.f32.mrb[56].mxu1 }
 0x175   : > { %v7381_v43 = vmax.f32 %v9387_v10, %v1119_v58  ;;  %v7383_v49 = vpop.f32.mrb[57].mxu1 }
 0x176   : > { %v1313_v63 = vmax.f32 %v7374_v32, %v7376_v29 }
 0x177   : > { %v1314_v37 = vmax.f32 %v7381_v43, %v7383_v49  ;;  %v1123_v24 = vpop.f32.mrb[58].mxu0  ;;  %v4488_v49 = vld [vmem:[%s9335_s3 + $0x1e0] sm:$0xff] }
 0x178   : > { %v7392_v15 = vmax.f32 %v977_v57, %v1123_v24  ;;  %v1125_v44 = vpop.f32.mrb[59].mxu0  ;;  %v7394_v0 = vpop.f32.mrb[58].mxu1 }
 0x179   : > { %v7399_v9 = vmax.f32 %v978_v48, %v1125_v44  ;;  %v7401_v2 = vpop.f32.mrb[59].mxu1 }
 0x17a   : > { %v1315_v51 = vmax.f32 %v7392_v15, %v7394_v0 }
 0x17b   : > { %v1316_v58 = vmax.f32 %v7399_v9, %v7401_v2  ;;  %v1407_v10 = vpop.f32.mrb[60].mxu0 }
 0x17c   : > { %v7410_v50 = vmax.f32 %v1297_v16, %v1407_v10  ;;  %v1409_v60 = vpop.f32.mrb[61].mxu0  ;;  %v7412_v57 = vpop.f32.mrb[60].mxu1  ;;  %v4461_v10 = vld [vmem:[%s9335_s3 + $0x108] sm:$0xff] }
 0x17d   : > { %v7417_v41 = vmax.f32 %v1298_v55, %v1409_v60  ;;  %v7419_v19 = vpop.f32.mrb[61].mxu1  ;;  %v3124_v55 = vld [vmem:[%s9335_s3 + $0x88] sm:$0xff] }
 0x17f   : > { %v1413_v44 = vpop.f32.mrb[62].mxu0 }
 0x180   : > { %v7428_v53 = vmax.f32 %v1299_v61, %v1413_v44  ;;  %v1415_v12 = vpop.f32.mrb[63].mxu0  ;;  %v7430_v16 = vpop.f32.mrb[62].mxu1  ;;  %v5504_v44 = vpack.c.bf16 %v4477_v20, %v4476_v46  ;;  %v3107_v46 = vld [vmem:[%s9335_s3] sm:$0xff]  ;;  %v3108_v20 = vld [vmem:[%s9335_s3 + $0x8] sm:$0xff] }
 0x181   : > { %v7435_v17 = vmax.f32 %v1300_v1, %v1415_v12  ;;  %v7437_v54 = vpop.f32.mrb[63].mxu1  ;;  %v4460_v12 = vld [vmem:[%s9335_s3 + $0x100] sm:$0xff]  ;;  %v5538_v48 = vpack.c.bf16 %v3108_v20, %v3107_v46  ;;  %v4463_v46 = vld [vmem:[%s9335_s3 + $0x118] sm:$0xff] }
 0x182   : > { %5505 = vmatprep.subr.bf16.mxu0 %v5504_v44  ;;  %v4478_v44 = vld [vmem:[%s9335_s3 + $0x190] sm:$0xff]  ;;  %v3110_v20 = vld [vmem:[%s9335_s3 + $0x18] sm:$0xff] }
 0x183   : > { %v1419_v60 = vpop.f32.mrb[64].mxu0 }
 0x184   : > { %v7455_v38 = vmax.f32 %v1301_v7, %v1419_v60  ;;  %v1421_v61 = vpop.f32.mrb[65].mxu0  ;;  %v7457_v1 = vpop.f32.mrb[64].mxu1  ;;  %v5506_v7 = vpack.c.bf16 %v4461_v10, %v4460_v12  ;;  %v5536_v60 = vpack.c.bf16 %v3124_v55, %v3123_v56  ;;  %v3126_v55 = vld [vmem:[%s9335_s3 + $0x98] sm:$0xff] }
 0x185   : > { %v7471_v59 = vmax.f32 %v1302_v26, %v1421_v61  ;;  %v7473_v33 = vpop.f32.mrb[65].mxu1  ;;  %v3125_v26 = vld [vmem:[%s9335_s3 + $0x90] sm:$0xff]  ;;  %v4479_v12 = vld [vmem:[%s9335_s3 + $0x198] sm:$0xff] }
 0x186   : > { %v1639_v24 = vmax.f32 %v7455_v38, %v7457_v1  ;;  %5507 = vmatpush3.bf16.msra.mxu0 %v5506_v7  ;;  %5537 = vmatprep.subr.bf16.mxu1 %v5536_v60  ;;  %v5540_v7 = vpack.c.bf16 %v3126_v55, %v3125_v26  ;;  %v3109_v60 = vld [vmem:[%s9335_s3 + $0x10] sm:$0xff]  ;;  %v3127_v55 = vld [vmem:[%s9335_s3 + $0xa0] sm:$0xff] }
 0x187   : > { %v1640_v28 = vmax.f32 %v7471_v59, %v7473_v33  ;;  %v1425_v3 = vpop.f32.mrb[66].mxu0  ;;  %5539 = vmatpush3.bf16.msra.mxu1 %v5538_v48  ;;  %v4462_v48 = vld [vmem:[%s9335_s3 + $0x110] sm:$0xff] }
 0x188   : > { %v7494_v10 = vmax.f32 %v1303_v11, %v1425_v3  ;;  %v1427_v56 = vpop.f32.mrb[67].mxu0  ;;  %v7496_v61 = vpop.f32.mrb[66].mxu1  ;;  %v5508_v11 = vpack.c.bf16 %v4479_v12, %v4478_v44  ;;  %v5510_v42 = vpack.c.bf16 %v4463_v46, %v4462_v48  ;;  %5541 = vmatprep.subr.bf16.mxu1 %v5540_v7  ;;  %v3112_v48 = vld [vmem:[%s9335_s3 + $0x28] sm:$0xff] }
 0x189   : > { %v7510_v52 = vmax.f32 %v1304_v8, %v1427_v56  ;;  %v7512_v45 = vpop.f32.mrb[67].mxu1  ;;  %v5542_v8 = vpack.c.bf16 %v3110_v20, %v3109_v60  ;;  %v3128_v56 = vld [vmem:[%s9335_s3 + $0xa8] sm:$0xff] }
 0x18a   : > { %v1641_v23 = vmax.f32 %v7494_v10, %v7496_v61  ;;  %5509 = vmatprep.subr.bf16.mxu0 %v5508_v11  ;;  %v5544_v60 = vpack.c.bf16 %v3128_v56, %v3127_v55  ;;  %v3111_v11 = vld [vmem:[%s9335_s3 + $0x20] sm:$0xff]  ;;  %v4481_v46 = vld [vmem:[%s9335_s3 + $0x1a8] sm:$0xff]  ;;  %v5514_v55 = vpack.c.bf16 %v4465_v5, %v4464_v34  ;;  %v3129_v56 = vld [vmem:[%s9335_s3 + $0xb0] sm:$0xff] }
 0x18b   : > { %v1642_v3 = vmax.f32 %v7510_v52, %v7512_v45  ;;  %v1431_v26 = vpop.f32.mrb[68].mxu0  ;;  %5511 = vmatpush3.bf16.msra.mxu0 %v5510_v42  ;;  %5543 = vmatpush3.bf16.msra.mxu1 %v5542_v8  ;;  %v5546_v20 = vpack.c.bf16 %v3112_v48, %v3111_v11  ;;  %v9388_v11 = vmax.f32 %v7307_v14, %v7311_v22  ;;  %v3113_v34 = vld [vmem:[%s9335_s3 + $0x30] sm:$0xff]  ;;  %v3114_v5 = vld [vmem:[%s9335_s3 + $0x38] sm:$0xff] }
 0x18c   : > { %v7536_v44 = vmax.f32 %v1305_v6, %v1431_v26  ;;  %v1433_v12 = vpop.f32.mrb[69].mxu0  ;;  %v7538_v7 = vpop.f32.mrb[68].mxu1  ;;  %v4480_v6 = vld [vmem:[%s9335_s3 + $0x1a0] sm:$0xff]  ;;  %5545 = vmatprep.subr.bf16.mxu1 %v5544_v60 }
 0x18d   : > { %v7549_v39 = vmax.f32 %v1306_v13, %v1433_v12  ;;  %v7551_v47 = vpop.f32.mrb[69].mxu1  ;;  %v5512_v8 = vpack.c.bf16 %v4481_v46, %v4480_v6  ;;  %v3130_v12 = vld [vmem:[%s9335_s3 + $0xb8] sm:$0xff]  ;;  %v9389_v13 = vmax.f32 %v7316_v35, %v7318_v30  ;;  %v3115_v35 = vld [vmem:[%s9335_s3 + $0x40] sm:$0xff] }
 0x18e   : > { %v5548_v46 = vpack.c.bf16 %v3130_v12, %v3129_v56  ;;  %v4483_v56 = vld [vmem:[%s9335_s3 + $0x1b8] sm:$0xff]  ;;  %v9398_v10 = vmax.f32 %v7536_v44, %v7538_v7 }
 0x18f   : > { %v1437_v26 = vpop.f32.mrb[70].mxu0  ;;  %5513 = vmatprep.subr.bf16.mxu0 %v5512_v8  ;;  %5547 = vmatpush3.bf16.msra.mxu1 %v5546_v20  ;;  %v4482_v8 = vld [vmem:[%s9335_s3 + $0x1b0] sm:$0xff]  ;;  %v4467_v12 = vld [vmem:[%s9335_s3 + $0x138] sm:$0xff]  ;;  %v3116_v20 = vld [vmem:[%s9335_s3 + $0x48] sm:$0xff]  ;;  %v9399_v52 = vmax.f32 %v7549_v39, %v7551_v47 }
 0x190   : > { %v7578_v48 = vmax.f32 %v9388_v11, %v1437_v26  ;;  %v1439_v6 = vpop.f32.mrb[71].mxu0  ;;  %v7580_v60 = vpop.f32.mrb[70].mxu1  ;;  %5515 = vmatpush3.bf16.msra.mxu0 %v5514_v55  ;;  %v5550_v26 = vpack.c.bf16 %v3114_v5, %v3113_v34  ;;  %5549 = vmatprep.subr.bf16.mxu1 %v5548_v46  ;;  %v4466_v55 = vld [vmem:[%s9335_s3 + $0x130] sm:$0xff]  ;;  %v3131_v11 = vld [vmem:[%s9335_s3 + $0xc0] sm:$0xff] }
 0x191   : > { %v7591_v14 = vmax.f32 %v9389_v13, %v1439_v6  ;;  %v7593_v22 = vpop.f32.mrb[71].mxu1  ;;  %v5516_v13 = vpack.c.bf16 %v4483_v56, %v4482_v8  ;;  %v9390_v6 = vmax.f32 %v7333_v25, %v7339_v36  ;;  %v5518_v8 = vpack.c.bf16 %v4467_v12, %v4466_v55  ;;  %v3132_v56 = vld [vmem:[%s9335_s3 + $0xc8] sm:$0xff] }
 0x192   : > { %v9391_v25 = vmax.f32 %v7344_v21, %v7346_v4  ;;  %v5554_v55 = vpack.c.bf16 %v3116_v20, %v3115_v35  ;;  %v4484_v21 = vld [vmem:[%s9335_s3 + $0x1c0] sm:$0xff]  ;;  %v4485_v4 = vld [vmem:[%s9335_s3 + $0x1c8] sm:$0xff]  ;;  %v3133_v20 = vld [vmem:[%s9335_s3 + $0xd0] sm:$0xff]  ;;  %v9392_v35 = vmax.f32 %v7356_v27, %v7358_v18  ;;  %v9393_v27 = vmax.f32 %v7363_v31, %v7365_v40 }
 0x193   : > { %v1443_v30 = vpop.f32.mrb[72].mxu0  ;;  %5551 = vmatpush3.bf16.msra.mxu1 %v5550_v26  ;;  %5517 = vmatprep.subr.bf16.mxu0 %v5516_v13  ;;  %v5552_v26 = vpack.c.bf16 %v3132_v56, %v3131_v11  ;;  %v4468_v56 = vld [vmem:[%s9335_s3 + $0x140] sm:$0xff]  ;;  %v9400_v44 = vmax.f32 %v7578_v48, %v7580_v60  ;;  %v9401_v39 = vmax.f32 %v7591_v14, %v7593_v22 }
 0x194   : > { %v7617_v46 = vmax.f32 %v9390_v6, %v1443_v30  ;;  %v1445_v34 = vpop.f32.mrb[73].mxu0  ;;  %v7619_v5 = vpop.f32.mrb[72].mxu1  ;;  %5519 = vmatpush3.bf16.msra.mxu0 %v5518_v8  ;;  %v5520_v8 = vpack.c.bf16 %v4485_v4, %v4484_v21  ;;  %v3117_v4 = vld [vmem:[%s9335_s3 + $0x50] sm:$0xff] }
 0x195   : > { %v7633_v36 = vmax.f32 %v9391_v25, %v1445_v34  ;;  %v7635_v30 = vpop.f32.mrb[73].mxu1  ;;  %5553 = vmatprep.subr.bf16.mxu1 %v5552_v26  ;;  %v4469_v25 = vld [vmem:[%s9335_s3 + $0x148] sm:$0xff]  ;;  %v3134_v26 = vld [vmem:[%s9335_s3 + $0xd8] sm:$0xff] }
 0x196   : > { %v5556_v21 = vpack.c.bf16 %v3134_v26, %v3133_v20  ;;  %5521 = vmatprep.subr.bf16.mxu0 %v5520_v8  ;;  %v4486_v20 = vld [vmem:[%s9335_s3 + $0x1d0] sm:$0xff]  ;;  %v9402_v48 = vmax.f32 %v7617_v46, %v7619_v5 }
 0x197   : > { %v1449_v42 = vpop.f32.mrb[74].mxu0  ;;  %5555 = vmatpush3.bf16.msra.mxu1 %v5554_v55  ;;  %v5522_v55 = vpack.c.bf16 %v4469_v25, %v4468_v56  ;;  %v3135_v56 = vld [vmem:[%s9335_s3 + $0xe0] sm:$0xff]  ;;  %v9403_v14 = vmax.f32 %v7633_v36, %v7635_v30 }
 0x198   : > { %v7653_v13 = vmax.f32 %v9392_v35, %v1449_v42  ;;  %v1451_v11 = vpop.f32.mrb[75].mxu0  ;;  %v7655_v34 = vpop.f32.mrb[74].mxu1  ;;  %v3118_v35 = vld [vmem:[%s9335_s3 + $0x58] sm:$0xff]  ;;  %5557 = vmatprep.subr.bf16.mxu1 %v5556_v21 }
 0x199   : > { %v7669_v18 = vmax.f32 %v9393_v27, %v1451_v11  ;;  %v7671_v42 = vpop.f32.mrb[75].mxu1  ;;  %v5558_v12 = vpack.c.bf16 %v3118_v35, %v3117_v4  ;;  %5523 = vmatpush3.bf16.msra.mxu0 %v5522_v55  ;;  %v4487_v11 = vld [vmem:[%s9335_s3 + $0x1d8] sm:$0xff]  ;;  %v4470_v55 = vld [vmem:[%s9335_s3 + $0x150] sm:$0xff]  ;;  %v3136_v4 = vld [vmem:[%s9335_s3 + $0xe8] sm:$0xff] }
 0x19a   : > { %v1649_v6 = vmax.f32 %v7653_v13, %v7655_v34  ;;  %v5524_v27 = vpack.c.bf16 %v4487_v11, %v4486_v20  ;;  %v4471_v21 = vld [vmem:[%s9335_s3 + $0x158] sm:$0xff]  ;;  %v3119_v35 = vld [vmem:[%s9335_s3 + $0x60] sm:$0xff] }
 0x19b   : > { %v1650_v31 = vmax.f32 %v7669_v18, %v7671_v42  ;;  %v1455_v40 = vpop.f32.mrb[76].mxu0  ;;  %5559 = vmatpush3.bf16.msra.mxu1 %v5558_v12  ;;  %v5560_v12 = vpack.c.bf16 %v3136_v4, %v3135_v56  ;;  %v4489_v56 = vld [vmem:[%s9335_s3 + $0x1e8] sm:$0xff] }
 0x19c   : > { %v7695_v8 = vmax.f32 %v1313_v63, %v1455_v40  ;;  %v1457_v25 = vpop.f32.mrb[77].mxu0  ;;  %v7697_v26 = vpop.f32.mrb[76].mxu1  ;;  %v5526_v63 = vpack.c.bf16 %v4471_v21, %v4470_v55  ;;  %v3120_v40 = vld [vmem:[%s9335_s3 + $0x68] sm:$0xff]  ;;  %5525 = vmatprep.subr.bf16.mxu0 %v5524_v27  ;;  %v5528_v4 = vpack.c.bf16 %v4489_v56, %v4488_v49 }
 0x19d   : > { %v7711_v32 = vmax.f32 %v1314_v37, %v1457_v25  ;;  %v7713_v29 = vpop.f32.mrb[77].mxu1  ;;  %v5562_v11 = vpack.c.bf16 %v3120_v40, %v3119_v35  ;;  %5561 = vmatprep.subr.bf16.mxu1 %v5560_v12  ;;  %v3137_v25 = vld [vmem:[%s9335_s3 + $0xf0] sm:$0xff]  ;;  %v4473_v12 = vld [vmem:[%s9335_s3 + $0x168] sm:$0xff]  ;;  %v3138_v35 = vld [vmem:[%s9335_s3 + $0xf8] sm:$0xff] }
 0x19e   : > { %v1651_v20 = vmax.f32 %v7695_v8, %v7697_v26  ;;  %5527 = vmatpush3.bf16.msra.mxu0 %v5526_v63  ;;  %v4472_v63 = vld [vmem:[%s9335_s3 + $0x160] sm:$0xff]  ;;  %v5564_v40 = vpack.c.bf16 %v3138_v35, %v3137_v25  ;;  %v4491_v25 = vld [vmem:[%s9335_s3 + $0x1f8] sm:$0xff] }
 0x19f   : > { %v1652_v37 = vmax.f32 %v7711_v32, %v7713_v29  ;;  %v1461_v43 = vpop.f32.mrb[78].mxu0  ;;  %5563 = vmatpush3.bf16.msra.mxu1 %v5562_v11  ;;  %v3121_v11 = vld [vmem:[%s9335_s3 + $0x70] sm:$0xff]  ;;  %5529 = vmatprep.subr.bf16.mxu0 %v5528_v4  ;;  %v9394_v4 = vmax.f32 %v7410_v50, %v7412_v57  ;;  %v9395_v50 = vmax.f32 %v7417_v41, %v7419_v19  ;;  %v4508_v41 = vld [vmem:[%s9335_s3 + $0x280] sm:$0xff]  ;;  %v4509_v19 = vld [vmem:[%s9335_s3 + $0x288] sm:$0xff] }
 0x1a0   : > { %v7737_v27 = vmax.f32 %v1315_v51, %v1461_v43  ;;  %v1463_v55 = vpop.f32.mrb[79].mxu0  ;;  %v7739_v21 = vpop.f32.mrb[78].mxu1  ;;  %v5530_v51 = vpack.c.bf16 %v4473_v12, %v4472_v63  ;;  %v3122_v43 = vld [vmem:[%s9335_s3 + $0x78] sm:$0xff]  ;;  %5565 = vmatprep.subr.bf16.mxu1 %v5564_v40  ;;  %v4541_v40 = vld [vmem:[%s9335_s3 + $0x388] sm:$0xff] }
 0x1a1   : > { %v7753_v15 = vmax.f32 %v1316_v58, %v1463_v55  ;;  %v7755_v0 = vpop.f32.mrb[79].mxu1  ;;  %v5566_v56 = vpack.c.bf16 %v3122_v43, %v3121_v11  ;;  %v4490_v58 = vld [vmem:[%s9335_s3 + $0x1f0] sm:$0xff]  ;;  %v4540_v55 = vld [vmem:[%s9335_s3 + $0x380] sm:$0xff]  ;;  %v4475_v43 = vld [vmem:[%s9335_s3 + $0x178] sm:$0xff] }
 0x1a2   : > { %v1653_v49 = vmax.f32 %v7737_v27, %v7739_v21  ;;  %5531 = vmatpush3.bf16.msra.mxu0 %v5530_v51  ;;  %v5532_v51 = vpack.c.bf16 %v4491_v25, %v4490_v58  ;;  %v4474_v11 = vld [vmem:[%s9335_s3 + $0x170] sm:$0xff] }
 0x1a3   : > { %v1745_v2 = vpop.f32.mrb[80].mxu0  ;;  %5567 = vmatpush3.bf16.msra.mxu1 %v5566_v56  ;;  %v5600_v56 = vpack.c.bf16 %v4541_v40, %v4540_v55  ;;  %v5534_v58 = vpack.c.bf16 %v4475_v43, %v4474_v11  ;;  %v9396_v55 = vmax.f32 %v7428_v53, %v7430_v16  ;;  %v5568_v11 = vpack.c.bf16 %v4509_v19, %v4508_v41 }
 0x1a4   : > { %v7779_v63 = vmax.f32 %v9394_v4, %v1745_v2  ;;  %v1747_v12 = vpop.f32.mrb[81].mxu0  ;;  %v7781_v35 = vpop.f32.mrb[80].mxu1  ;;  %5533 = vmatprep.subr.bf16.mxu0 %v5532_v51  ;;  %v9397_v43 = vmax.f32 %v7435_v17, %v7437_v54  ;;  %v9404_v32 = vmax.f32 %v7753_v15, %v7755_v0 }
 0x1a5   : > { %v7795_v57 = vmax.f32 %v9395_v50, %v1747_v12  ;;  %v7797_v2 = vpop.f32.mrb[81].mxu1  ;;  %5601 = vmatprep.subr.bf16.mxu1 %v5600_v56 }
 0x1a6   : > { %v1973_v25 = vmax.f32 %v7779_v63, %v7781_v35  ;;  %5535 = vmatpush3.bf16.msra.mxu0 %v5534_v58 }
 0x1a7   : > { %v1974_v4 = vmax.f32 %v7795_v57, %v7797_v2  ;;  %v1751_v9 = vpop.f32.mrb[82].mxu0  ;;  %5569 = vmatprep.subr.bf16.mxu0 %v5568_v11 }
 0x1a8   : > { %v7812_v12 = vmax.f32 %v9396_v55, %v1751_v9  ;;  %v1753_v51 = vpop.f32.mrb[83].mxu0  ;;  %v7814_v40 = vpop.f32.mrb[82].mxu1 }
 0x1a9   : > { %v7819_v50 = vmax.f32 %v9397_v43, %v1753_v51  ;;  %v7821_v56 = vpop.f32.mrb[83].mxu1 }
 0x1aa   : > { %v1975_v58 = vmax.f32 %v7812_v12, %v7814_v40 }
 0x1ab   : > { %v1976_v53 = vmax.f32 %v7819_v50, %v7821_v56  ;;  %v1757_v16 = vpop.f32.mrb[84].mxu0 }
 0x1ac   : > { %v7830_v9 = vmax.f32 %v1639_v24, %v1757_v16  ;;  %v1759_v41 = vpop.f32.mrb[85].mxu0  ;;  %v7832_v19 = vpop.f32.mrb[84].mxu1 }
 0x1ad   : > { %v7837_v17 = vmax.f32 %v1640_v28, %v1759_v41  ;;  %v7839_v54 = vpop.f32.mrb[85].mxu1 }
 0x1ae   : > { %v1977_v55 = vmax.f32 %v7830_v9, %v7832_v19 }
 0x1af   : > { %v1978_v51 = vmax.f32 %v7837_v17, %v7839_v54  ;;  %v1763_v11 = vpop.f32.mrb[86].mxu0 }
 0x1b0   : > { %v7848_v24 = vmax.f32 %v1641_v23, %v1763_v11  ;;  %v1765_v38 = vpop.f32.mrb[87].mxu0  ;;  %v7850_v1 = vpop.f32.mrb[86].mxu1 }
 0x1b1   : > { %v7855_v59 = vmax.f32 %v1642_v3, %v1765_v38  ;;  %v7857_v33 = vpop.f32.mrb[87].mxu1 }
 0x1b2   : > { %v1979_v28 = vmax.f32 %v7848_v24, %v7850_v1 }
 0x1b3   : > { %v1769_v16 = vpop.f32.mrb[88].mxu0  ;;  %v9405_v17 = vmax.f32 %v7855_v59, %v7857_v33 }
 0x1b4   : > { %v7866_v61 = vmax.f32 %v9398_v10, %v1769_v16  ;;  %v1771_v23 = vpop.f32.mrb[89].mxu0  ;;  %v7868_v41 = vpop.f32.mrb[88].mxu1 }
 0x1b5   : > { %v7873_v45 = vmax.f32 %v9399_v52, %v1771_v23  ;;  %v7875_v3 = vpop.f32.mrb[89].mxu1 }
 0x1b6   : > { %v9406_v24 = vmax.f32 %v7866_v61, %v7868_v41 }
 0x1b7   : > { %v1775_v43 = vpop.f32.mrb[90].mxu0  ;;  %v9407_v59 = vmax.f32 %v7873_v45, %v7875_v3 }
 0x1b8   : > { %v7884_v7 = vmax.f32 %v9400_v44, %v1775_v43  ;;  %v1777_v16 = vpop.f32.mrb[91].mxu0  ;;  %v7886_v10 = vpop.f32.mrb[90].mxu1 }
 0x1b9   : > { %v7891_v47 = vmax.f32 %v9401_v39, %v1777_v16  ;;  %v7893_v23 = vpop.f32.mrb[91].mxu1 }
 0x1ba   : > { %v9408_v61 = vmax.f32 %v7884_v7, %v7886_v10 }
 0x1bb   : > { %v1781_v11 = vpop.f32.mrb[92].mxu0  ;;  %v9409_v45 = vmax.f32 %v7891_v47, %v7893_v23 }
 0x1bc   : > { %v7902_v60 = vmax.f32 %v9402_v48, %v1781_v11  ;;  %v1783_v43 = vpop.f32.mrb[93].mxu0  ;;  %v7904_v44 = vpop.f32.mrb[92].mxu1 }
 0x1bd   : > { %v7909_v22 = vmax.f32 %v9403_v14, %v1783_v43  ;;  %v7911_v16 = vpop.f32.mrb[93].mxu1 }
 0x1be   : > { %v1985_v39 = vmax.f32 %v7902_v60, %v7904_v44 }
 0x1bf   : > { %v1986_v38 = vmax.f32 %v7909_v22, %v7911_v16  ;;  %v1787_v52 = vpop.f32.mrb[94].mxu0 }
 0x1c0   : > { %v7920_v46 = vmax.f32 %v1649_v6, %v1787_v52  ;;  %v1789_v5 = vpop.f32.mrb[95].mxu0  ;;  %v7922_v11 = vpop.f32.mrb[94].mxu1 }
 0x1c1   : > { %v7927_v36 = vmax.f32 %v1650_v31, %v1789_v5  ;;  %v7929_v30 = vpop.f32.mrb[95].mxu1 }
 0x1c2   : > { %v1987_v48 = vmax.f32 %v7920_v46, %v7922_v11 }
 0x1c3   : > { %v1988_v43 = vmax.f32 %v7927_v36, %v7929_v30  ;;  %v1793_v14 = vpop.f32.mrb[96].mxu0 }
 0x1c4   : > { %v7938_v6 = vmax.f32 %v1651_v20, %v1793_v14  ;;  %v1795_v13 = vpop.f32.mrb[97].mxu0  ;;  %v7940_v34 = vpop.f32.mrb[96].mxu1 }
 0x1c5   : > { %v7945_v18 = vmax.f32 %v1652_v37, %v1795_v13  ;;  %v7947_v42 = vpop.f32.mrb[97].mxu1 }
 0x1c6   : > { %v1989_v31 = vmax.f32 %v7938_v6, %v7940_v34 }
 0x1c7   : > { %v1799_v5 = vpop.f32.mrb[98].mxu0  ;;  %v9410_v36 = vmax.f32 %v7945_v18, %v7947_v42 }
 0x1c8   : > { %v7956_v8 = vmax.f32 %v1653_v49, %v1799_v5  ;;  %v1801_v26 = vpop.f32.mrb[99].mxu0  ;;  %v7958_v20 = vpop.f32.mrb[98].mxu1 }
 0x1c9   : > { %v7963_v29 = vmax.f32 %v9404_v32, %v1801_v26  ;;  %v7965_v37 = vpop.f32.mrb[99].mxu1 }
 0x1ca   : > { %v1991_v14 = vmax.f32 %v7956_v8, %v7958_v20 }
 0x1cb   : > { %v1992_v13 = vmax.f32 %v7963_v29, %v7965_v37  ;;  %v2083_v52 = vpop.f32.mrb[100].mxu0 }
 0x1cc   : > { %v7974_v27 = vmax.f32 %v1973_v25, %v2083_v52  ;;  %v2085_v21 = vpop.f32.mrb[101].mxu0  ;;  %v7976_v49 = vpop.f32.mrb[100].mxu1 }
 0x1cd   : > { %v7981_v15 = vmax.f32 %v1974_v4, %v2085_v21  ;;  %v7983_v0 = vpop.f32.mrb[101].mxu1 }
 0x1ce   : > { %v2311_v5 = vmax.f32 %v7974_v27, %v7976_v49 }
 0x1cf   : > { %v2312_v26 = vmax.f32 %v7981_v15, %v7983_v0  ;;  %v2089_v32 = vpop.f32.mrb[102].mxu0 }
 0x1d0   : > { %v7992_v63 = vmax.f32 %v1975_v58, %v2089_v32  ;;  %v2091_v35 = vpop.f32.mrb[103].mxu0  ;;  %v7994_v25 = vpop.f32.mrb[102].mxu1 }
 0x1d1   : > { %v7999_v57 = vmax.f32 %v1976_v53, %v2091_v35  ;;  %v8001_v2 = vpop.f32.mrb[103].mxu1 }
 0x1d2   : > { %v2313_v4 = vmax.f32 %v7992_v63, %v7994_v25 }
 0x1d3   : > { %v2314_v52 = vmax.f32 %v7999_v57, %v8001_v2  ;;  %v2095_v21 = vpop.f32.mrb[104].mxu0 }
 0x1d4   : > { %v8010_v12 = vmax.f32 %v1977_v55, %v2095_v21  ;;  %v2097_v40 = vpop.f32.mrb[105].mxu0  ;;  %v8012_v58 = vpop.f32.mrb[104].mxu1 }
 0x1d5   : > { %v8017_v50 = vmax.f32 %v1978_v51, %v2097_v40  ;;  %v8019_v56 = vpop.f32.mrb[105].mxu1 }
 0x1d6   : > { %v2315_v53 = vmax.f32 %v8010_v12, %v8012_v58 }
 0x1d7   : > { %v2101_v35 = vpop.f32.mrb[106].mxu0  ;;  %v9411_v57 = vmax.f32 %v8017_v50, %v8019_v56 }
 0x1d8   : > { %v8028_v9 = vmax.f32 %v1979_v28, %v2101_v35  ;;  %v2103_v19 = vpop.f32.mrb[107].mxu0  ;;  %v8030_v55 = vpop.f32.mrb[106].mxu1 }
 0x1d9   : > { %v8035_v54 = vmax.f32 %v9405_v17, %v2103_v19  ;;  %v8037_v51 = vpop.f32.mrb[107].mxu1 }
 0x1da   : > { %v9412_v12 = vmax.f32 %v8028_v9, %v8030_v55 }
 0x1db   : > { %v2107_v32 = vpop.f32.mrb[108].mxu0  ;;  %v9413_v50 = vmax.f32 %v8035_v54, %v8037_v51 }
 0x1dc   : > { %v8046_v1 = vmax.f32 %v9406_v24, %v2107_v32  ;;  %v2109_v28 = vpop.f32.mrb[109].mxu0  ;;  %v8048_v35 = vpop.f32.mrb[108].mxu1 }
 0x1dd   : > { %v8053_v33 = vmax.f32 %v9407_v59, %v2109_v28  ;;  %v8055_v19 = vpop.f32.mrb[109].mxu1 }
 0x1de   : > { %v9414_v9 = vmax.f32 %v8046_v1, %v8048_v35 }
 0x1df   : > { %v2113_v21 = vpop.f32.mrb[110].mxu0  ;;  %v9415_v54 = vmax.f32 %v8053_v33, %v8055_v19 }
 0x1e0   : > { %v8064_v41 = vmax.f32 %v9408_v61, %v2113_v21  ;;  %v2115_v32 = vpop.f32.mrb[111].mxu0  ;;  %v8066_v24 = vpop.f32.mrb[110].mxu1 }
 0x1e1   : > { %v8071_v3 = vmax.f32 %v9409_v45, %v2115_v32  ;;  %v8073_v28 = vpop.f32.mrb[111].mxu1 }
 0x1e2   : > { %v2321_v59 = vmax.f32 %v8064_v41, %v8066_v24 }
 0x1e3   : > { %v2322_v40 = vmax.f32 %v8071_v3, %v8073_v28  ;;  %v2119_v17 = vpop.f32.mrb[112].mxu0 }
 0x1e4   : > { %v8082_v7 = vmax.f32 %v1985_v39, %v2119_v17  ;;  %v2121_v10 = vpop.f32.mrb[113].mxu0  ;;  %v8084_v21 = vpop.f32.mrb[112].mxu1 }
 0x1e5   : > { %v8089_v47 = vmax.f32 %v1986_v38, %v2121_v10  ;;  %v8091_v23 = vpop.f32.mrb[113].mxu1 }
 0x1e6   : > { %v2323_v61 = vmax.f32 %v8082_v7, %v8084_v21 }
 0x1e7   : > { %v2324_v32 = vmax.f32 %v8089_v47, %v8091_v23  ;;  %v2125_v45 = vpop.f32.mrb[114].mxu0 }
 0x1e8   : > { %v8100_v60 = vmax.f32 %v1987_v48, %v2125_v45  ;;  %v2127_v44 = vpop.f32.mrb[115].mxu0  ;;  %v8102_v39 = vpop.f32.mrb[114].mxu1 }
 0x1e9   : > { %v8107_v38 = vmax.f32 %v1988_v43, %v2127_v44  ;;  %v8109_v22 = vpop.f32.mrb[115].mxu1 }
 0x1ea   : > { %v2325_v16 = vmax.f32 %v8100_v60, %v8102_v39 }
 0x1eb   : > { %v2131_v10 = vpop.f32.mrb[116].mxu0  ;;  %v9416_v47 = vmax.f32 %v8107_v38, %v8109_v22 }
 0x1ec   : > { %v8118_v46 = vmax.f32 %v1989_v31, %v2131_v10  ;;  %v2133_v11 = vpop.f32.mrb[117].mxu0  ;;  %v8120_v48 = vpop.f32.mrb[116].mxu1 }
 0x1ed   : > { %v8125_v30 = vmax.f32 %v9410_v36, %v2133_v11  ;;  %v8127_v43 = vpop.f32.mrb[117].mxu1 }
 0x1ee   : > { %v2327_v45 = vmax.f32 %v8118_v46, %v8120_v48 }
 0x1ef   : > { %v2328_v44 = vmax.f32 %v8125_v30, %v8127_v43  ;;  %v2137_v17 = vpop.f32.mrb[118].mxu0  ;;  %v3025_v30 = vpop.permute.xlu0 %3024 }
 0x1f0   : > { %v8136_v6 = vmax.f32 %v1991_v14, %v2137_v17  ;;  %v2139_v34 = vpop.f32.mrb[119].mxu0  ;;  %v8138_v31 = vpop.f32.mrb[118].mxu1 }
 0x1f1   : > { %v8143_v18 = vmax.f32 %v1992_v13, %v2139_v34  ;;  %v8145_v42 = vpop.f32.mrb[119].mxu1 }
 0x1f2   : > { %v2329_v10 = vmax.f32 %v8136_v6, %v8138_v31 }
 0x1f3   : > { %v2330_v11 = vmax.f32 %v8143_v18, %v8145_v42  ;;  %v2421_v36 = vpop.f32.mrb[120].mxu0 }
 0x1f4   : > { %v8154_v8 = vmax.f32 %v2311_v5, %v2421_v36  ;;  %v2423_v20 = vpop.f32.mrb[121].mxu0  ;;  %v8156_v14 = vpop.f32.mrb[120].mxu1 }
 0x1f5   : > { %v8161_v29 = vmax.f32 %v2312_v26, %v2423_v20  ;;  %v8163_v37 = vpop.f32.mrb[121].mxu1 }
 0x1f6   : > { %v2649_v13 = vmax.f32 %v8154_v8, %v8156_v14  ;;  %v4524_v8 = vld [vmem:[%s9335_s3 + $0x300] sm:$0xff]  ;;  %v4525_v14 = vld [vmem:[%s9335_s3 + $0x308] sm:$0xff] }
 0x1f7   : > { %v2650_v17 = vmax.f32 %v8161_v29, %v8163_v37  ;;  %v2427_v34 = vpop.f32.mrb[122].mxu0 }
 0x1f8   : > { %v8172_v27 = vmax.f32 %v2313_v4, %v2427_v34  ;;  %v2429_v49 = vpop.f32.mrb[123].mxu0  ;;  %v8174_v5 = vpop.f32.mrb[122].mxu1 }
 0x1f9   : > { %v8179_v15 = vmax.f32 %v2314_v52, %v2429_v49  ;;  %v8181_v0 = vpop.f32.mrb[123].mxu1 }
 0x1fa   : > { %v2651_v26 = vmax.f32 %v8172_v27, %v8174_v5  ;;  %v4542_v27 = vld [vmem:[%s9335_s3 + $0x390] sm:$0xff]  ;;  %v4543_v5 = vld [vmem:[%s9335_s3 + $0x398] sm:$0xff] }
 0x1fb   : > { %v2433_v20 = vpop.f32.mrb[124].mxu0  ;;  %v9417_v37 = vmax.f32 %v8179_v15, %v8181_v0  ;;  %v4492_v15 = vld [vmem:[%s9335_s3 + $0x200] sm:$0xff]  ;;  %v4493_v0 = vld [vmem:[%s9335_s3 + $0x208] sm:$0xff] }
 0x1fc   : > { %v8190_v63 = vmax.f32 %v2315_v53, %v2433_v20  ;;  %v2435_v25 = vpop.f32.mrb[125].mxu0  ;;  %v8192_v4 = vpop.f32.mrb[124].mxu1 }
 0x1fd   : > { %v8197_v2 = vmax.f32 %v9411_v57, %v2435_v25  ;;  %v8199_v52 = vpop.f32.mrb[125].mxu1 }
 0x1ff   : > { %v2439_v36 = vpop.f32.mrb[126].mxu0 }
 0x200   : > { %v8208_v58 = vmax.f32 %v9412_v12, %v2439_v36  ;;  %v2441_v53 = vpop.f32.mrb[127].mxu0  ;;  %v8210_v20 = vpop.f32.mrb[126].mxu1 }
 0x201   : > { %v8215_v56 = vmax.f32 %v9413_v50, %v2441_v53  ;;  %v8217_v25 = vpop.f32.mrb[127].mxu1 }
 0x203   : > { %v2445_v34 = vpop.f32.mrb[128].mxu0 }
 0x204   : > { %v8226_v55 = vmax.f32 %v9414_v9, %v2445_v34  ;;  %v2447_v36 = vpop.f32.mrb[129].mxu0  ;;  %v8228_v12 = vpop.f32.mrb[128].mxu1 }
 0x205   : > { %v8233_v51 = vmax.f32 %v9415_v54, %v2447_v36  ;;  %v8235_v53 = vpop.f32.mrb[129].mxu1 }
 0x206   : > { %v2657_v50 = vmax.f32 %v8226_v55, %v8228_v12  ;;  %v4514_v55 = vld [vmem:[%s9335_s3 + $0x2b0] sm:$0xff] }
 0x207   : > { %v2658_v49 = vmax.f32 %v8233_v51, %v8235_v53  ;;  %v2451_v57 = vpop.f32.mrb[130].mxu0 }
 0x208   : > { %v8244_v1 = vmax.f32 %v2321_v59, %v2451_v57  ;;  %v2453_v35 = vpop.f32.mrb[131].mxu0  ;;  %v8246_v34 = vpop.f32.mrb[130].mxu1 }
 0x209   : > { %v8251_v33 = vmax.f32 %v2322_v40, %v2453_v35  ;;  %v8253_v19 = vpop.f32.mrb[131].mxu1 }
 0x20a   : > { %v2659_v9 = vmax.f32 %v8244_v1, %v8246_v34  ;;  %v4516_v1 = vld [vmem:[%s9335_s3 + $0x2c0] sm:$0xff] }
 0x20b   : > { %v2660_v36 = vmax.f32 %v8251_v33, %v8253_v19  ;;  %v2457_v54 = vpop.f32.mrb[132].mxu0 }
 0x20c   : > { %v8262_v41 = vmax.f32 %v2323_v61, %v2457_v54  ;;  %v2459_v24 = vpop.f32.mrb[133].mxu0  ;;  %v8264_v59 = vpop.f32.mrb[132].mxu1 }
 0x20d   : > { %v8269_v40 = vmax.f32 %v2324_v32, %v2459_v24  ;;  %v8271_v3 = vpop.f32.mrb[133].mxu1 }
 0x20e   : > { %v2661_v28 = vmax.f32 %v8262_v41, %v8264_v59  ;;  %v4518_v41 = vld [vmem:[%s9335_s3 + $0x2d0] sm:$0xff] }
 0x20f   : > { %v2463_v35 = vpop.f32.mrb[134].mxu0  ;;  %v9422_v59 = vmax.f32 %v8269_v40, %v8271_v3 }
 0x210   : > { %v8280_v7 = vmax.f32 %v2325_v16, %v2463_v35  ;;  %v2465_v21 = vpop.f32.mrb[135].mxu0  ;;  %v8282_v61 = vpop.f32.mrb[134].mxu1 }
 0x211   : > { %v8287_v23 = vmax.f32 %v9416_v47, %v2465_v21  ;;  %v8289_v32 = vpop.f32.mrb[135].mxu1 }
 0x213   : > { %v2469_v57 = vpop.f32.mrb[136].mxu0 }
 0x214   : > { %v8298_v60 = vmax.f32 %v2327_v45, %v2469_v57  ;;  %v2471_v39 = vpop.f32.mrb[137].mxu0  ;;  %v8300_v16 = vpop.f32.mrb[136].mxu1 }
 0x215   : > { %v8305_v38 = vmax.f32 %v2328_v44, %v2471_v39  ;;  %v8307_v22 = vpop.f32.mrb[137].mxu1 }
 0x217   : > { %v2475_v47 = vpop.f32.mrb[138].mxu0 }
 0x218   : > { %v8316_v46 = vmax.f32 %v2329_v10, %v2475_v47  ;;  %v2477_v48 = vpop.f32.mrb[139].mxu0  ;;  %v8318_v45 = vpop.f32.mrb[138].mxu1 }
 0x219   : > { %v8323_v43 = vmax.f32 %v2330_v11, %v2477_v48  ;;  %v8325_v44 = vpop.f32.mrb[139].mxu1  ;;  %v3020_v48 = vpop.permute.xlu0 %3019 }
 0x21b   : > { %v2759_v6 = vpop.f32.mrb[140].mxu0 }
 0x21c   : > { %v2818_v31 = vmax.f32 %v2649_v13, %v2759_v6  ;;  %v2761_v10 = vpop.f32.mrb[141].mxu0  ;;  %v2928_v47 = vpop.f32.mrb[140].mxu1 }
 0x21d   : > { %v2819_v18 = vmax.f32 %v2650_v17, %v2761_v10  ;;  %v2930_v42 = vpop.f32.mrb[141].mxu1  ;;  %v5602_v10 = vpack.c.bf16 %v4525_v14, %v4524_v8  ;;  %v4527_v8 = vld [vmem:[%s9335_s3 + $0x318] sm:$0xff] }
 0x21e   : > { %v2987_v11 = vmax.f32 %v2818_v31, %v2928_v47  ;;  %v8355_v47 = vpop.permute.xlu1 %3029 }
 0x21f   : > { %v2988_v21 = vmax.f32 %v2819_v18, %v2930_v42  ;;  %v2765_v35 = vpop.f32.mrb[142].mxu0  ;;  %v9418_v18 = vmax.f32 %v8190_v63, %v8192_v4  ;;  %v9419_v63 = vmax.f32 %v8197_v2, %v8199_v52 }
 0x220   : > { %v3067_v57 = vadd.f32 %v3020_v48, %v2987_v11  ;;  %v2820_v39 = vmax.f32 %v2651_v26, %v2765_v35  ;;  %v2767_v24 = vpop.f32.mrb[143].mxu0  ;;  %v2934_v54 = vpop.f32.mrb[142].mxu1  ;;  %v5604_v11 = vpack.c.bf16 %v4543_v5, %v4542_v27  ;;  %v5570_v5 = vpack.c.bf16 %v4493_v0, %v4492_v15  ;;  %v4528_v0 = vld [vmem:[%s9335_s3 + $0x320] sm:$0xff] }
 0x221   : > { %v3068_v29 = vadd.f32 %v3020_v48, %v2988_v21  ;;  %v2821_v13 = vmax.f32 %v9417_v37, %v2767_v24  ;;  %v2936_v17 = vpop.f32.mrb[143].mxu1  ;;  %v4526_v48 = vld [vmem:[%s9335_s3 + $0x310] sm:$0xff]  ;;  %v4511_v37 = vld [vmem:[%s9335_s3 + $0x298] sm:$0xff] }
 0x222   : > { %v2989_v26 = vmax.f32 %v2820_v39, %v2934_v54  ;;  %v3087_v24 = vmax.f32 %v3067_v57, 0.0  ;;  %v4510_v57 = vld [vmem:[%s9335_s3 + $0x290] sm:$0xff] }
 0x223   : > { %v3088_v35 = vmax.f32 %v3068_v29, 0.0  ;;  %v2990_v6 = vmax.f32 %v2821_v13, %v2936_v17  ;;  %v2771_v31 = vpop.f32.mrb[144].mxu0  ;;  %v4544_v13 = vld [vmem:[%s9335_s3 + $0x3a0] sm:$0xff]  ;;  %v4545_v17 = vld [vmem:[%s9335_s3 + $0x3a8] sm:$0xff] }
 0x224   : > { %v3069_v21 = vadd.f32 %v3025_v30, %v2989_v26  ;;  %v8366_v54 = vmax.f32 %v9418_v18, %v2771_v31  ;;  %v2773_v39 = vpop.f32.mrb[145].mxu0  ;;  %v8368_v42 = vpop.f32.mrb[144].mxu1  ;;  %v5606_v26 = vpack.c.bf16 %v4527_v8, %v4526_v48  ;;  %v9420_v18 = vmax.f32 %v8208_v58, %v8210_v20  ;;  %v4529_v48 = vld [vmem:[%s9335_s3 + $0x328] sm:$0xff]  ;;  %v4512_v58 = vld [vmem:[%s9335_s3 + $0x2a0] sm:$0xff] }
 0x225   : > { %v3070_v14 = vadd.f32 %v3025_v30, %v2990_v6  ;;  %v2823_v4 = vmax.f32 %v9419_v63, %v2773_v39  ;;  %3306 = vmatprep.mubr.f32.mxu1 %v3088_v35  ;;  %v2942_v29 = vpop.f32.mrb[145].mxu1  ;;  %v4494_v35 = vld [vmem:[%s9335_s3 + $0x210] sm:$0xff]  ;;  %v4495_v6 = vld [vmem:[%s9335_s3 + $0x218] sm:$0xff]  ;;  %v5608_v15 = vpack.c.bf16 %v4545_v17, %v4544_v13 }
 0x226   : > { %v2991_v30 = vmax.f32 %v8366_v54, %v8368_v42  ;;  %3307 = vmatmul.mubr.f32.vlgmr.msra.gmra.mrb[160].mxu1 %v3087_v24  ;;  %v3089_v31 = vmax.f32 %v3069_v21, 0.0  ;;  %v9421_v21 = vmax.f32 %v8215_v56, %v8217_v25  ;;  %v4546_v63 = vld [vmem:[%s9335_s3 + $0x3b0] sm:$0xff]  ;;  %v8430_v56 = vpop.permute.xlu1 %3034  ;;  %v5574_v17 = vpack.c.bf16 %v4495_v6, %v4494_v35  ;;  %v4531_v6 = vld [vmem:[%s9335_s3 + $0x338] sm:$0xff] }
 0x227   : > { %v3090_v2 = vmax.f32 %v3070_v14, 0.0  ;;  %v2992_v52 = vmax.f32 %v2823_v4, %v2942_v29  ;;  %5603 = vmatpush3.bf16.msra.mxu1 %v5602_v10  ;;  %v2777_v27 = vpop.f32.mrb[146].mxu0  ;;  %v5572_v10 = vpack.c.bf16 %v4511_v37, %v4510_v57  ;;  %v4513_v57 = vld [vmem:[%s9335_s3 + $0x2a8] sm:$0xff]  ;;  %v4547_v4 = vld [vmem:[%s9335_s3 + $0x3b8] sm:$0xff]  ;;  %v4530_v35 = vld [vmem:[%s9335_s3 + $0x330] sm:$0xff] }
 0x228   : > { %v8402_v39 = vmax.f32 %v9420_v18, %v2777_v27  ;;  %v2779_v24 = vpop.f32.mrb[147].mxu0  ;;  %v8404_v14 = vpop.f32.mrb[146].mxu1  ;;  %5605 = vmatprep.subr.bf16.mxu1 %v5604_v11  ;;  %v4497_v27 = vld [vmem:[%s9335_s3 + $0x228] sm:$0xff]  ;;  %v4591_v42 = vld [vmem:[%s9335_s3 + $0x518] sm:$0xff] }
 0x229   : > { %v3072_v20 = vadd.f32 %v8355_v47, %v2992_v52  ;;  %v2825_v11 = vmax.f32 %v9421_v21, %v2779_v24  ;;  %3236 = vmatprep.mubr.f32.mxu0 %v3090_v2  ;;  %v2948_v8 = vpop.f32.mrb[147].mxu1  ;;  %v5610_v2 = vpack.c.bf16 %v4529_v48, %v4528_v0  ;;  %v4496_v52 = vld [vmem:[%s9335_s3 + $0x220] sm:$0xff]  ;;  %v4549_v48 = vld [vmem:[%s9335_s3 + $0x3c8] sm:$0xff]  ;;  %v5614_v21 = vpack.c.bf16 %v4531_v6, %v4530_v35 }
 0x22a   : > { %v2993_v29 = vmax.f32 %v8402_v39, %v8404_v14  ;;  %3237 = vmatmul.mubr.f32.vlgmr.msra.gmra.mrb[160].mxu0 %v3089_v31  ;;  %v4548_v0 = vld [vmem:[%s9335_s3 + $0x3c0] sm:$0xff]  ;;  %v4501_v35 = vld [vmem:[%s9335_s3 + $0x248] sm:$0xff] }
 0x22b   : > { %v3092_v25 = vmax.f32 %v3072_v20, 0.0  ;;  %v2994_v37 = vmax.f32 %v2825_v11, %v2948_v8  ;;  %5571 = vmatpush3.bf16.msra.mxu0 %v5570_v5  ;;  %5607 = vmatpush3.bf16.msra.mxu1 %v5606_v26  ;;  %v2783_v13 = vpop.f32.mrb[148].mxu0  ;;  %v5576_v5 = vpack.c.bf16 %v4513_v57, %v4512_v58  ;;  %v5612_v26 = vpack.c.bf16 %v4547_v4, %v4546_v63  ;;  %v4498_v11 = vld [vmem:[%s9335_s3 + $0x230] sm:$0xff]  ;;  %v4499_v8 = vld [vmem:[%s9335_s3 + $0x238] sm:$0xff]  ;;  %v4588_v39 = vld [vmem:[%s9335_s3 + $0x500] sm:$0xff] }
 0x22c   : > { %v8441_v31 = vmax.f32 %v2657_v50, %v2783_v13  ;;  %v2785_v18 = vpop.f32.mrb[149].mxu0  ;;  %v8443_v24 = vpop.f32.mrb[148].mxu1  ;;  %5573 = vmatprep.subr.bf16.mxu0 %v5572_v10  ;;  %5609 = vmatprep.subr.bf16.mxu1 %v5608_v15  ;;  %v4515_v15 = vld [vmem:[%s9335_s3 + $0x2b8] sm:$0xff]  ;;  %v5578_v20 = vpack.c.bf16 %v4497_v27, %v4496_v52  ;;  %v4532_v13 = vld [vmem:[%s9335_s3 + $0x340] sm:$0xff]  ;;  %v4550_v52 = vld [vmem:[%s9335_s3 + $0x3d0] sm:$0xff] }
 0x22d   : > { %v3074_v12 = vadd.f32 %v8430_v56, %v2994_v37  ;;  %v8458_v50 = vmax.f32 %v2658_v49, %v2785_v18  ;;  %3409 = vmatprep.mubr.f32.mxu0 %v3092_v25  ;;  %v8460_v10 = vpop.f32.mrb[149].mxu1  ;;  %v5580_v25 = vpack.c.bf16 %v4515_v15, %v4514_v55  ;;  %v5616_v37 = vpack.c.bf16 %v4549_v48, %v4548_v0  ;;  %v4551_v27 = vld [vmem:[%s9335_s3 + $0x3d8] sm:$0xff]  ;;  %v4534_v48 = vld [vmem:[%s9335_s3 + $0x350] sm:$0xff] }
 0x22e   : > { %v2995_v51 = vmax.f32 %v8441_v31, %v8443_v24  ;;  %v5582_v18 = vpack.c.bf16 %v4499_v8, %v4498_v11  ;;  %v5620_v0 = vpack.c.bf16 %v4551_v27, %v4550_v52  ;;  %v4553_v11 = vld [vmem:[%s9335_s3 + $0x3e8] sm:$0xff] }
 0x22f   : > { %v3094_v49 = vmax.f32 %v3074_v12, 0.0  ;;  %v2996_v53 = vmax.f32 %v8458_v50, %v8460_v10  ;;  %5575 = vmatpush3.bf16.msra.mxu0 %v5574_v17  ;;  %5611 = vmatpush3.bf16.msra.mxu1 %v5610_v2  ;;  %v2789_v58 = vpop.f32.mrb[150].mxu0  ;;  %v4533_v17 = vld [vmem:[%s9335_s3 + $0x348] sm:$0xff]  ;;  %v4608_v50 = vld [vmem:[%s9335_s3 + $0x5a0] sm:$0xff] }
 0x230   : > { %v8484_v57 = vmax.f32 %v2659_v9, %v2789_v58  ;;  %v2791_v63 = vpop.f32.mrb[151].mxu0  ;;  %v8486_v4 = vpop.f32.mrb[150].mxu1  ;;  %5577 = vmatprep.subr.bf16.mxu0 %v5576_v5  ;;  %5613 = vmatprep.subr.bf16.mxu1 %v5612_v26  ;;  %v4517_v2 = vld [vmem:[%s9335_s3 + $0x2c8] sm:$0xff]  ;;  %v5618_v5 = vpack.c.bf16 %v4533_v17, %v4532_v13  ;;  %v4500_v26 = vld [vmem:[%s9335_s3 + $0x240] sm:$0xff]  ;;  %v4503_v13 = vld [vmem:[%s9335_s3 + $0x258] sm:$0xff]  ;;  %v9423_v17 = vmax.f32 %v8280_v7, %v8282_v61 }
 0x231   : > { %v8500_v34 = vmax.f32 %v2660_v36, %v2791_v63  ;;  %3513 = vmatprep.mubr.f32.mxu1 %v3094_v49  ;;  %v8502_v9 = vpop.f32.mrb[151].mxu1  ;;  %v5584_v15 = vpack.c.bf16 %v4517_v2, %v4516_v1  ;;  %v4535_v49 = vld [vmem:[%s9335_s3 + $0x358] sm:$0xff]  ;;  %v5586_v63 = vpack.c.bf16 %v4501_v35, %v4500_v26  ;;  %v4520_v7 = vld [vmem:[%s9335_s3 + $0x2e0] sm:$0xff]  ;;  %v9424_v61 = vmax.f32 %v8287_v23, %v8289_v32  ;;  %v4609_v10 = vld [vmem:[%s9335_s3 + $0x5a8] sm:$0xff] }
 0x232   : > { %v2997_v33 = vmax.f32 %v8484_v57, %v8486_v4  ;;  %v4637_v4 = vld [vmem:[%s9335_s3 + $0x688] sm:$0xff] }
 0x233   : > { %v2998_v19 = vmax.f32 %v8500_v34, %v8502_v9  ;;  %5579 = vmatpush3.bf16.msra.mxu0 %v5578_v20  ;;  %5615 = vmatpush3.bf16.msra.mxu1 %v5614_v21  ;;  %v2795_v36 = vpop.f32.mrb[152].mxu0  ;;  %v4519_v20 = vld [vmem:[%s9335_s3 + $0x2d8] sm:$0xff]  ;;  %v4552_v21 = vld [vmem:[%s9335_s3 + $0x3e0] sm:$0xff]  ;;  %v8695_v9 = vpop.permute.xlu0 %3039 }
 0x234   : > { %v8526_v6 = vmax.f32 %v2661_v28, %v2795_v36  ;;  %v2797_v55 = vpop.f32.mrb[153].mxu0  ;;  %v8528_v12 = vpop.f32.mrb[152].mxu1  ;;  %5581 = vmatprep.subr.bf16.mxu0 %v5580_v25  ;;  %5617 = vmatprep.subr.bf16.mxu1 %v5616_v37  ;;  %v5622_v25 = vpack.c.bf16 %v4535_v49, %v4534_v48  ;;  %v4502_v37 = vld [vmem:[%s9335_s3 + $0x250] sm:$0xff]  ;;  %v5588_v27 = vpack.c.bf16 %v4519_v20, %v4518_v41  ;;  %v4505_v20 = vld [vmem:[%s9335_s3 + $0x268] sm:$0xff] }
 0x235   : > { %v8542_v28 = vmax.f32 %v9422_v59, %v2797_v55  ;;  %v8544_v58 = vpop.f32.mrb[153].mxu1  ;;  %v5624_v36 = vpack.c.bf16 %v4553_v11, %v4552_v21  ;;  %v4521_v55 = vld [vmem:[%s9335_s3 + $0x2e8] sm:$0xff]  ;;  %v5590_v49 = vpack.c.bf16 %v4503_v13, %v4502_v37  ;;  %v4504_v59 = vld [vmem:[%s9335_s3 + $0x260] sm:$0xff]  ;;  %v4538_v21 = vld [vmem:[%s9335_s3 + $0x370] sm:$0xff]  ;;  %v9425_v11 = vmax.f32 %v8298_v60, %v8300_v16 }
 0x236   : > { %v2999_v8 = vmax.f32 %v8526_v6, %v8528_v12  ;;  %v5592_v37 = vpack.c.bf16 %v4521_v55, %v4520_v7  ;;  %v4523_v60 = vld [vmem:[%s9335_s3 + $0x2f8] sm:$0xff]  ;;  %v9426_v16 = vmax.f32 %v8305_v38, %v8307_v22  ;;  %v8641_v55 = vpop.permute.xlu1 %3044 }
 0x237   : > { %v3000_v40 = vmax.f32 %v8542_v28, %v8544_v58  ;;  %5583 = vmatpush3.bf16.msra.mxu0 %v5582_v18  ;;  %5619 = vmatpush3.bf16.msra.mxu1 %v5618_v5  ;;  %v2801_v3 = vpop.f32.mrb[154].mxu0  ;;  %v4536_v18 = vld [vmem:[%s9335_s3 + $0x360] sm:$0xff]  ;;  %v4537_v5 = vld [vmem:[%s9335_s3 + $0x368] sm:$0xff] }
 0x238   : > { %v8568_v1 = vmax.f32 %v9423_v17, %v2801_v3  ;;  %v2803_v2 = vpop.f32.mrb[155].mxu0  ;;  %v8570_v52 = vpop.f32.mrb[154].mxu1  ;;  %5585 = vmatprep.subr.bf16.mxu0 %v5584_v15  ;;  %5621 = vmatprep.subr.bf16.mxu1 %v5620_v0  ;;  %v4554_v15 = vld [vmem:[%s9335_s3 + $0x3f0] sm:$0xff]  ;;  %v4555_v0 = vld [vmem:[%s9335_s3 + $0x3f8] sm:$0xff]  ;;  %v5626_v41 = vpack.c.bf16 %v4537_v5, %v4536_v18  ;;  %v4605_v5 = vld [vmem:[%s9335_s3 + $0x588] sm:$0xff] }
 0x239   : > { %v8584_v26 = vmax.f32 %v9424_v61, %v2803_v2  ;;  %v8586_v35 = vpop.f32.mrb[155].mxu1  ;;  %v5628_v13 = vpack.c.bf16 %v4555_v0, %v4554_v15  ;;  %v4539_v17 = vld [vmem:[%s9335_s3 + $0x378] sm:$0xff]  ;;  %v4522_v2 = vld [vmem:[%s9335_s3 + $0x2f0] sm:$0xff]  ;;  %v5594_v61 = vpack.c.bf16 %v4505_v20, %v4504_v59  ;;  %v9427_v59 = vmax.f32 %v8316_v46, %v8318_v45  ;;  %v4589_v46 = vld [vmem:[%s9335_s3 + $0x508] sm:$0xff] }
 0x23a   : > { %v3001_v48 = vmax.f32 %v8568_v1, %v8570_v52  ;;  %v5630_v15 = vpack.c.bf16 %v4539_v17, %v4538_v21  ;;  %v5596_v0 = vpack.c.bf16 %v4523_v60, %v4522_v2  ;;  %v4507_v21 = vld [vmem:[%s9335_s3 + $0x278] sm:$0xff]  ;;  %v9428_v45 = vmax.f32 %v8323_v43, %v8325_v44  ;;  %v4606_v44 = vld [vmem:[%s9335_s3 + $0x590] sm:$0xff]  ;;  %v4672_v28 = vld [vmem:[%s9335_s3 + $0x7a0] sm:$0xff] }
 0x23b   : > { %v3002_v23 = vmax.f32 %v8584_v26, %v8586_v35  ;;  %5587 = vmatpush3.bf16.msra.mxu0 %v5586_v63  ;;  %5623 = vmatpush3.bf16.msra.mxu1 %v5622_v25  ;;  %v2807_v32 = vpop.f32.mrb[156].mxu0  ;;  %v4607_v17 = vld [vmem:[%s9335_s3 + $0x598] sm:$0xff]  ;;  %v5666_v34 = vpack.c.bf16 %v4589_v46, %v4588_v39  ;;  %v5672_v46 = vpack.c.bf16 %v4609_v10, %v4608_v50  ;;  %v4562_v50 = vld [vmem:[%s9335_s3 + $0x430] sm:$0xff]  ;;  %v4673_v58 = vld [vmem:[%s9335_s3 + $0x7a8] sm:$0xff] }
 0x23c   : > { %v8613_v3 = vmax.f32 %v9425_v11, %v2807_v32  ;;  %v2809_v63 = vpop.f32.mrb[157].mxu0  ;;  %v8615_v25 = vpop.f32.mrb[156].mxu1  ;;  %5589 = vmatprep.subr.bf16.mxu0 %v5588_v27  ;;  %5625 = vmatprep.subr.bf16.mxu1 %v5624_v36  ;;  %v4604_v36 = vld [vmem:[%s9335_s3 + $0x580] sm:$0xff]  ;;  %v4506_v32 = vld [vmem:[%s9335_s3 + $0x270] sm:$0xff]  ;;  %v3073_v11 = vadd.f32 %v8430_v56, %v2993_v29  ;;  %v5668_v54 = vpack.c.bf16 %v4607_v17, %v4606_v44  ;;  %v4611_v44 = vld [vmem:[%s9335_s3 + $0x5b8] sm:$0xff] }
 0x23d   : > { %v8629_v18 = vmax.f32 %v9426_v16, %v2809_v63  ;;  %v8631_v27 = vpop.f32.mrb[157].mxu1  ;;  %v4572_v56 = vld [vmem:[%s9335_s3 + $0x480] sm:$0xff]  ;;  %v5598_v60 = vpack.c.bf16 %v4507_v21, %v4506_v32  ;;  %v4563_v10 = vld [vmem:[%s9335_s3 + $0x438] sm:$0xff]  ;;  %v3075_v26 = vadd.f32 %v8695_v9, %v2995_v51  ;;  %v4701_v52 = vld [vmem:[%s9335_s3 + $0x888] sm:$0xff] }
 0x23e   : > { %v3003_v7 = vmax.f32 %v8613_v3, %v8615_v25  ;;  %v3093_v16 = vmax.f32 %v3073_v11, 0.0  ;;  %v4592_v21 = vld [vmem:[%s9335_s3 + $0x520] sm:$0xff]  ;;  %v4154_v3 = vld [vmem:[%s9337_s5 + $0x8] sm:$0xff] }
 0x23f   : > { %v3004_v38 = vmax.f32 %v8629_v18, %v8631_v27  ;;  %5591 = vmatpush3.bf16.msra.mxu0 %v5590_v49  ;;  %5627 = vmatpush3.bf16.msra.mxu1 %v5626_v41  ;;  %v2813_v22 = vpop.f32.mrb[158].mxu0  ;;  %v5664_v41 = vpack.c.bf16 %v4605_v5, %v4604_v36  ;;  %v4556_v5 = vld [vmem:[%s9335_s3 + $0x400] sm:$0xff]  ;;  %v4737_v27 = vld [vmem:[%s9335_s3 + $0x9a8] sm:$0xff] }
 0x240   : > { %v8655_v20 = vmax.f32 %v9427_v59, %v2813_v22  ;;  %v2815_v63 = vpop.f32.mrb[159].mxu0  ;;  %v8657_v49 = vpop.f32.mrb[158].mxu1  ;;  %5593 = vmatprep.subr.bf16.mxu0 %v5592_v37  ;;  %5629 = vmatprep.subr.bf16.mxu1 %v5628_v13  ;;  %v4573_v37 = vld [vmem:[%s9335_s3 + $0x488] sm:$0xff]  ;;  %v3078_v13 = vadd.f32 %v8641_v55, %v2998_v19  ;;  %v3071_v19 = vadd.f32 %v8355_v47, %v2991_v30  ;;  %v4590_v22 = vld [vmem:[%s9335_s3 + $0x510] sm:$0xff]  ;;  %v4736_v18 = vld [vmem:[%s9335_s3 + $0x9a0] sm:$0xff] }
 0x241   : > { %v8671_v14 = vmax.f32 %v9428_v45, %v2815_v63  ;;  %v8673_v29 = vpop.f32.mrb[159].mxu1  ;;  %v5632_v36 = vpack.c.bf16 %v4573_v37, %v4572_v56  ;;  %v3076_v47 = vadd.f32 %v8695_v9, %v2996_v53  ;;  %v4574_v30 = vld [vmem:[%s9335_s3 + $0x490] sm:$0xff]  ;;  %v5670_v11 = vpack.c.bf16 %v4591_v42, %v4590_v22  ;;  %v4593_v45 = vld [vmem:[%s9335_s3 + $0x528] sm:$0xff]  ;;  %v4576_v56 = vld [vmem:[%s9335_s3 + $0x4a0] sm:$0xff] }
 0x242   : > { %v3005_v43 = vmax.f32 %v8655_v20, %v8657_v49  ;;  %v3091_v32 = vmax.f32 %v3071_v19, 0.0  ;;  %v4558_v63 = vld [vmem:[%s9335_s3 + $0x410] sm:$0xff]  ;;  %v4577_v37 = vld [vmem:[%s9335_s3 + $0x4a8] sm:$0xff]  ;;  %v4560_v19 = vld [vmem:[%s9335_s3 + $0x420] sm:$0xff] }
 0x243   : > { %v3006_v2 = vmax.f32 %v8671_v14, %v8673_v29  ;;  %5595 = vmatpush3.bf16.msra.mxu0 %v5594_v61  ;;  %5631 = vmatpush3.bf16.msra.mxu1 %v5630_v15  ;;  %v4557_v61 = vld [vmem:[%s9335_s3 + $0x408] sm:$0xff]  ;;  %v4575_v15 = vld [vmem:[%s9335_s3 + $0x498] sm:$0xff]  ;;  %v3096_v39 = vmax.f32 %v3076_v47, 0.0  ;;  %v4578_v22 = vld [vmem:[%s9335_s3 + $0x4b0] sm:$0xff] }
 0x244   : > { %5597 = vmatprep.subr.bf16.mxu0 %v5596_v0  ;;  %5665 = vmatprep.subr.bf16.mxu1 %v5664_v41  ;;  %v3098_v0 = vmax.f32 %v3078_v13, 0.0  ;;  %v5634_v53 = vpack.c.bf16 %v4557_v61, %v4556_v5  ;;  %v5636_v59 = vpack.c.bf16 %v4575_v15, %v4574_v30  ;;  %v4559_v41 = vld [vmem:[%s9335_s3 + $0x418] sm:$0xff]  ;;  %v4610_v13 = vld [vmem:[%s9335_s3 + $0x5b0] sm:$0xff]  ;;  %v4613_v42 = vld [vmem:[%s9335_s3 + $0x5c8] sm:$0xff] }
 0x245   : > { %v5638_v17 = vpack.c.bf16 %v4559_v41, %v4558_v63  ;;  %v5676_v5 = vpack.c.bf16 %v4611_v44, %v4610_v13  ;;  %v4595_v61 = vld [vmem:[%s9335_s3 + $0x538] sm:$0xff]  ;;  %v4581_v63 = vld [vmem:[%s9335_s3 + $0x4c8] sm:$0xff]  ;;  %v4614_v41 = vld [vmem:[%s9335_s3 + $0x5d0] sm:$0xff] }
 0x246   : > { %3514 = vmatmul.mubr.f32.vlgmr.msra.gmra.mrb[162].mxu1 %v3093_v16  ;;  %v4561_v16 = vld [vmem:[%s9335_s3 + $0x428] sm:$0xff]  ;;  %v4579_v47 = vld [vmem:[%s9335_s3 + $0x4b8] sm:$0xff]  ;;  %v4598_v13 = vld [vmem:[%s9335_s3 + $0x550] sm:$0xff] }
 0x247   : > { %5599 = vmatpush3.bf16.msra.mxu0 %v5598_v60  ;;  %5667 = vmatpush3.bf16.msra.mxu1 %v5666_v34  ;;  %v5674_v60 = vpack.c.bf16 %v4593_v45, %v4592_v21  ;;  %v5640_v34 = vpack.c.bf16 %v4577_v37, %v4576_v56  ;;  %v5642_v30 = vpack.c.bf16 %v4561_v16, %v4560_v19  ;;  %v4615_v21 = vld [vmem:[%s9335_s3 + $0x5d8] sm:$0xff]  ;;  %v4564_v56 = vld [vmem:[%s9335_s3 + $0x440] sm:$0xff]  ;;  %v4565_v37 = vld [vmem:[%s9335_s3 + $0x448] sm:$0xff] }
 0x248   : > { %3721 = vmatprep.mubr.f32.mxu1 %v3098_v0  ;;  %5633 = vmatprep.subr.bf16.mxu0 %v5632_v36  ;;  %v4594_v36 = vld [vmem:[%s9335_s3 + $0x530] sm:$0xff]  ;;  %v5644_v0 = vpack.c.bf16 %v4579_v47, %v4578_v22  ;;  %v5684_v44 = vpack.c.bf16 %v4615_v21, %v4614_v41  ;;  %v4616_v19 = vld [vmem:[%s9335_s3 + $0x5e0] sm:$0xff]  ;;  %v4617_v16 = vld [vmem:[%s9335_s3 + $0x5e8] sm:$0xff] }
 0x249   : > { %5669 = vmatprep.subr.bf16.mxu1 %v5668_v54  ;;  %v4612_v54 = vld [vmem:[%s9335_s3 + $0x5c0] sm:$0xff]  ;;  %v5678_v15 = vpack.c.bf16 %v4595_v61, %v4594_v36  ;;  %v5650_v36 = vpack.c.bf16 %v4565_v37, %v4564_v56  ;;  %v4566_v22 = vld [vmem:[%s9335_s3 + $0x450] sm:$0xff]  ;;  %v4567_v47 = vld [vmem:[%s9335_s3 + $0x458] sm:$0xff] }
 0x24a   : > { %3410 = vmatmul.mubr.f32.vlgmr.msra.gmra.mrb[162].mxu0 %v3091_v32  ;;  %v5680_v32 = vpack.c.bf16 %v4613_v42, %v4612_v54  ;;  %v4600_v54 = vld [vmem:[%s9335_s3 + $0x560] sm:$0xff]  ;;  %v5688_v42 = vpack.c.bf16 %v4617_v16, %v4616_v19  ;;  %v4602_v41 = vld [vmem:[%s9335_s3 + $0x570] sm:$0xff]  ;;  %v4669_v37 = vld [vmem:[%s9335_s3 + $0x788] sm:$0xff]  ;;  %v3077_v16 = vadd.f32 %v8641_v55, %v2997_v33 }
 0x24b   : > { %5635 = vmatpush3.bf16.msra.mxu0 %v5634_v53  ;;  %3617 = vmatprep.mubr.f32.mxu0 %v3096_v39  ;;  %v4596_v53 = vld [vmem:[%s9335_s3 + $0x540] sm:$0xff]  ;;  %v5646_v39 = vpack.c.bf16 %v4563_v10, %v4562_v50  ;;  %v4618_v50 = vld [vmem:[%s9335_s3 + $0x5f0] sm:$0xff]  ;;  %v4619_v10 = vld [vmem:[%s9335_s3 + $0x5f8] sm:$0xff] }
 0x24c   : > { %5671 = vmatpush3.bf16.msra.mxu1 %v5670_v11  ;;  %5637 = vmatprep.subr.bf16.mxu0 %v5636_v59  ;;  %v4597_v11 = vld [vmem:[%s9335_s3 + $0x548] sm:$0xff]  ;;  %v4580_v59 = vld [vmem:[%s9335_s3 + $0x4c0] sm:$0xff]  ;;  %v5692_v21 = vpack.c.bf16 %v4619_v10, %v4618_v50  ;;  %v4571_v19 = vld [vmem:[%s9335_s3 + $0x478] sm:$0xff] }
 0x24d   : > { %5673 = vmatprep.subr.bf16.mxu1 %v5672_v46  ;;  %v5682_v46 = vpack.c.bf16 %v4597_v11, %v4596_v53  ;;  %v5648_v45 = vpack.c.bf16 %v4581_v63, %v4580_v59  ;;  %v5654_v53 = vpack.c.bf16 %v4567_v47, %v4566_v22  ;;  %v4568_v59 = vld [vmem:[%s9335_s3 + $0x460] sm:$0xff]  ;;  %v4569_v63 = vld [vmem:[%s9335_s3 + $0x468] sm:$0xff]  ;;  %v4670_v33 = vld [vmem:[%s9335_s3 + $0x790] sm:$0xff] }
 0x24e   : > { %v4668_v56 = vld [vmem:[%s9335_s3 + $0x780] sm:$0xff]  ;;  %v4671_v55 = vld [vmem:[%s9335_s3 + $0x798] sm:$0xff] }
 0x24f   : > { %5639 = vmatpush3.bf16.msra.mxu0 %v5638_v17  ;;  %v4599_v17 = vld [vmem:[%s9335_s3 + $0x558] sm:$0xff]  ;;  %v4636_v22 = vld [vmem:[%s9335_s3 + $0x680] sm:$0xff]  ;;  %v5732_v51 = vpack.c.bf16 %v4671_v55, %v4670_v33  ;;  %v4677_v33 = vld [vmem:[%s9335_s3 + $0x7c8] sm:$0xff] }
 0x250   : > { %5675 = vmatpush3.bf16.msra.mxu1 %v5674_v60  ;;  %5641 = vmatprep.subr.bf16.mxu0 %v5640_v34  ;;  %v4582_v60 = vld [vmem:[%s9335_s3 + $0x4d0] sm:$0xff]  ;;  %v4583_v34 = vld [vmem:[%s9335_s3 + $0x4d8] sm:$0xff]  ;;  %v5696_v24 = vpack.c.bf16 %v4637_v4, %v4636_v22  ;;  %v4676_v4 = vld [vmem:[%s9335_s3 + $0x7c0] sm:$0xff] }
 0x251   : > { %5677 = vmatprep.subr.bf16.mxu1 %v5676_v5  ;;  %v5686_v5 = vpack.c.bf16 %v4599_v17, %v4598_v13  ;;  %v5652_v61 = vpack.c.bf16 %v4583_v34, %v4582_v60  ;;  %v8873_v13 = vpop.permute.xlu1 %3054  ;;  %v4570_v34 = vld [vmem:[%s9335_s3 + $0x470] sm:$0xff]  ;;  %v4655_v9 = vld [vmem:[%s9335_s3 + $0x718] sm:$0xff] }
 0x252   : > { %v3082_v57 = vadd.f32 %v8873_v13, %v3002_v23  ;;  %v5662_v47 = vpack.c.bf16 %v4571_v19, %v4570_v34  ;;  %v4620_v23 = vld [vmem:[%s9335_s3 + $0x600] sm:$0xff]  ;;  %v4639_v50 = vld [vmem:[%s9335_s3 + $0x698] sm:$0xff]  ;;  %v4642_v22 = vld [vmem:[%s9335_s3 + $0x6b0] sm:$0xff] }
 0x253   : > { %5643 = vmatpush3.bf16.msra.mxu0 %v5642_v30  ;;  %v4601_v30 = vld [vmem:[%s9335_s3 + $0x568] sm:$0xff]  ;;  %v4624_v19 = vld [vmem:[%s9335_s3 + $0x620] sm:$0xff] }
 0x254   : > { %5679 = vmatpush3.bf16.msra.mxu1 %v5678_v15  ;;  %5645 = vmatprep.subr.bf16.mxu0 %v5644_v0  ;;  %v4584_v15 = vld [vmem:[%s9335_s3 + $0x4e0] sm:$0xff]  ;;  %v4585_v0 = vld [vmem:[%s9335_s3 + $0x4e8] sm:$0xff]  ;;  %v3102_v10 = vmax.f32 %v3082_v57, 0.0  ;;  %v4643_v57 = vld [vmem:[%s9335_s3 + $0x6b8] sm:$0xff] }
 0x255   : > { %5681 = vmatprep.subr.bf16.mxu1 %v5680_v32  ;;  %v5690_v32 = vpack.c.bf16 %v4601_v30, %v4600_v54  ;;  %v5656_v11 = vpack.c.bf16 %v4585_v0, %v4584_v15  ;;  %v8907_v54 = vpop.permute.xlu0 %3049  ;;  %v4654_v30 = vld [vmem:[%s9335_s3 + $0x710] sm:$0xff]  ;;  %v3097_v15 = vmax.f32 %v3077_v16, 0.0  ;;  %v4625_v16 = vld [vmem:[%s9335_s3 + $0x628] sm:$0xff] }
 0x256   : > { %v3080_v31 = vadd.f32 %v8907_v54, %v3000_v40  ;;  %v4638_v0 = vld [vmem:[%s9335_s3 + $0x690] sm:$0xff]  ;;  %v5706_v55 = vpack.c.bf16 %v4625_v16, %v4624_v19  ;;  %v4683_v16 = vld [vmem:[%s9335_s3 + $0x7f8] sm:$0xff]  ;;  %v3079_v14 = vadd.f32 %v8907_v54, %v2999_v8 }
 0x257   : > { %5647 = vmatpush3.bf16.msra.mxu0 %v5646_v39  ;;  %v4603_v39 = vld [vmem:[%s9335_s3 + $0x578] sm:$0xff]  ;;  %v4682_v19 = vld [vmem:[%s9335_s3 + $0x7f0] sm:$0xff] }
 0x258   : > { %5683 = vmatpush3.bf16.msra.mxu1 %v5682_v46  ;;  %5649 = vmatprep.subr.bf16.mxu0 %v5648_v45  ;;  %v4586_v46 = vld [vmem:[%s9335_s3 + $0x4f0] sm:$0xff]  ;;  %v4587_v45 = vld [vmem:[%s9335_s3 + $0x4f8] sm:$0xff]  ;;  %v5694_v17 = vpack.c.bf16 %v4603_v39, %v4602_v41  ;;  %v4656_v41 = vld [vmem:[%s9335_s3 + $0x720] sm:$0xff]  ;;  %v5736_v39 = vpack.c.bf16 %v4673_v58, %v4672_v28 }
 0x259   : > { %5685 = vmatprep.subr.bf16.mxu1 %v5684_v44  ;;  %v5658_v44 = vpack.c.bf16 %v4569_v63, %v4568_v59  ;;  %v5660_v60 = vpack.c.bf16 %v4587_v45, %v4586_v46  ;;  %v4622_v59 = vld [vmem:[%s9335_s3 + $0x610] sm:$0xff]  ;;  %v4623_v63 = vld [vmem:[%s9335_s3 + $0x618] sm:$0xff]  ;;  %v4657_v46 = vld [vmem:[%s9335_s3 + $0x728] sm:$0xff] }
 0x25a   : > { %v4640_v45 = vld [vmem:[%s9335_s3 + $0x6a0] sm:$0xff]  ;;  %v4629_v58 = vld [vmem:[%s9335_s3 + $0x648] sm:$0xff]  ;;  %v4719_v54 = vld [vmem:[%s9335_s3 + $0x918] sm:$0xff] }
 0x25b   : > { %5651 = vmatpush3.bf16.msra.mxu0 %v5650_v36  ;;  %v5728_v36 = vpack.c.bf16 %v4669_v37, %v4668_v56  ;;  %v4641_v56 = vld [vmem:[%s9335_s3 + $0x6a8] sm:$0xff]  ;;  %v4674_v37 = vld [vmem:[%s9335_s3 + $0x7b0] sm:$0xff]  ;;  %v4628_v28 = vld [vmem:[%s9335_s3 + $0x640] sm:$0xff] }
 0x25c   : > { %5687 = vmatpush3.bf16.msra.mxu1 %v5686_v5  ;;  %5653 = vmatprep.subr.bf16.mxu0 %v5652_v61  ;;  %v4652_v5 = vld [vmem:[%s9335_s3 + $0x700] sm:$0xff]  ;;  %v4653_v61 = vld [vmem:[%s9335_s3 + $0x708] sm:$0xff]  ;;  %v5704_v34 = vpack.c.bf16 %v4641_v56, %v4640_v45  ;;  %v4630_v45 = vld [vmem:[%s9335_s3 + $0x650] sm:$0xff] }
 0x25d   : > { %5689 = vmatprep.subr.bf16.mxu1 %v5688_v42  ;;  %v5730_v35 = vpack.c.bf16 %v4653_v61, %v4652_v5  ;;  %v4621_v42 = vld [vmem:[%s9335_s3 + $0x608] sm:$0xff]  ;;  %v4659_v61 = vld [vmem:[%s9335_s3 + $0x738] sm:$0xff] }
 0x25e   : > { %v5698_v40 = vpack.c.bf16 %v4621_v42, %v4620_v23  ;;  %v4627_v23 = vld [vmem:[%s9335_s3 + $0x638] sm:$0xff]  ;;  %v4660_v42 = vld [vmem:[%s9335_s3 + $0x740] sm:$0xff] }
 0x25f   : > { %5655 = vmatpush3.bf16.msra.mxu0 %v5654_v53  ;;  %v3095_v53 = vmax.f32 %v3075_v26, 0.0  ;;  %v5708_v26 = vpack.c.bf16 %v4643_v57, %v4642_v22  ;;  %v4631_v56 = vld [vmem:[%s9335_s3 + $0x658] sm:$0xff]  ;;  %v4632_v22 = vld [vmem:[%s9335_s3 + $0x660] sm:$0xff]  ;;  %v4633_v57 = vld [vmem:[%s9335_s3 + $0x668] sm:$0xff] }
 0x260   : > { %5691 = vmatpush3.bf16.msra.mxu1 %v5690_v32  ;;  %5657 = vmatprep.subr.bf16.mxu0 %v5656_v11  ;;  %v5734_v32 = vpack.c.bf16 %v4655_v9, %v4654_v30  ;;  %v5700_v11 = vpack.c.bf16 %v4639_v50, %v4638_v0  ;;  %v5744_v30 = vpack.c.bf16 %v4677_v33, %v4676_v4  ;;  %v4679_v9 = vld [vmem:[%s9335_s3 + $0x7d8] sm:$0xff]  ;;  %v4666_v4 = vld [vmem:[%s9335_s3 + $0x770] sm:$0xff] }
 0x261   : > { %5693 = vmatprep.subr.bf16.mxu1 %v5692_v21  ;;  %v3100_v21 = vmax.f32 %v3080_v31, 0.0  ;;  %v4644_v31 = vld [vmem:[%s9335_s3 + $0x6c0] sm:$0xff]  ;;  %v5756_v33 = vpack.c.bf16 %v4683_v16, %v4682_v19  ;;  %v4705_v19 = vld [vmem:[%s9335_s3 + $0x8a8] sm:$0xff]  ;;  %v4738_v16 = vld [vmem:[%s9335_s3 + $0x9b0] sm:$0xff] }
 0x263   : > { %5659 = vmatpush3.bf16.msra.mxu0 %v5658_v44  ;;  %v4675_v44 = vld [vmem:[%s9335_s3 + $0x7b8] sm:$0xff] }
 0x264   : > { %5695 = vmatpush3.bf16.msra.mxu1 %v5694_v17  ;;  %5661 = vmatprep.subr.bf16.mxu0 %v5660_v60  ;;  %v5702_v17 = vpack.c.bf16 %v4623_v63, %v4622_v59  ;;  %v5738_v60 = vpack.c.bf16 %v4657_v46, %v4656_v41  ;;  %v5740_v5 = vpack.c.bf16 %v4675_v44, %v4674_v37  ;;  %v4647_v59 = vld [vmem:[%s9335_s3 + $0x6d8] sm:$0xff]  ;;  %v4680_v63 = vld [vmem:[%s9335_s3 + $0x7e0] sm:$0xff]  ;;  %v4681_v41 = vld [vmem:[%s9335_s3 + $0x7e8] sm:$0xff] }
 0x265   : > { %5729 = vmatprep.subr.bf16.mxu1 %v5728_v36  ;;  %v4658_v36 = vld [vmem:[%s9335_s3 + $0x730] sm:$0xff]  ;;  %v4664_v37 = vld [vmem:[%s9335_s3 + $0x760] sm:$0xff]  ;;  %v5752_v44 = vpack.c.bf16 %v4681_v41, %v4680_v63  ;;  %v4703_v63 = vld [vmem:[%s9335_s3 + $0x898] sm:$0xff] }
 0x267   : > { %3722 = vmatmul.mubr.f32.vlgmr.msra.gmra.mrb[164].mxu1 %v3097_v15  ;;  %5663 = vmatpush3.bf16.msra.mxu0 %v5662_v47  ;;  %v5742_v47 = vpack.c.bf16 %v4659_v61, %v4658_v36  ;;  %v4661_v15 = vld [vmem:[%s9335_s3 + $0x748] sm:$0xff]  ;;  %v5718_v36 = vpack.c.bf16 %v4631_v56, %v4630_v45  ;;  %v4686_v45 = vld [vmem:[%s9335_s3 + $0x810] sm:$0xff]  ;;  %v4687_v56 = vld [vmem:[%s9335_s3 + $0x818] sm:$0xff] }
 0x268   : > { %5731 = vmatpush3.bf16.msra.mxu1 %v5730_v35  ;;  %3929 = vmatprep.mubr.f32.mxu1 %v3102_v10  ;;  %v4626_v35 = vld [vmem:[%s9335_s3 + $0x630] sm:$0xff]  ;;  %v5746_v50 = vpack.c.bf16 %v4661_v15, %v4660_v42  ;;  %v5722_v42 = vpack.c.bf16 %v4633_v57, %v4632_v22  ;;  %v4688_v57 = vld [vmem:[%s9335_s3 + $0x820] sm:$0xff] }
 0x269   : > { %5697 = vmatprep.subr.bf16.mxu0 %v5696_v24  ;;  %5733 = vmatprep.subr.bf16.mxu1 %v5732_v51  ;;  %v4645_v24 = vld [vmem:[%s9335_s3 + $0x6c8] sm:$0xff]  ;;  %v4678_v51 = vld [vmem:[%s9335_s3 + $0x7d0] sm:$0xff]  ;;  %v5710_v0 = vpack.c.bf16 %v4627_v23, %v4626_v35  ;;  %v4732_v35 = vld [vmem:[%s9335_s3 + $0x980] sm:$0xff] }
 0x26a   : > { %3618 = vmatmul.mubr.f32.vlgmr.msra.gmra.mrb[164].mxu0 %v3095_v53  ;;  %v5712_v10 = vpack.c.bf16 %v4645_v24, %v4644_v31  ;;  %v5748_v53 = vpack.c.bf16 %v4679_v9, %v4678_v51  ;;  %v4733_v23 = vld [vmem:[%s9335_s3 + $0x988] sm:$0xff]  ;;  %v4634_v31 = vld [vmem:[%s9335_s3 + $0x670] sm:$0xff]  ;;  %v4635_v24 = vld [vmem:[%s9335_s3 + $0x678] sm:$0xff]  ;;  %v3081_v51 = vadd.f32 %v8873_v13, %v3001_v48  ;;  %v9095_v9 = vpop.permute.xlu1 %3064 }
 0x26b   : > { %5699 = vmatpush3.bf16.msra.mxu0 %v5698_v40  ;;  %3825 = vmatprep.mubr.f32.mxu0 %v3100_v21  ;;  %v4662_v40 = vld [vmem:[%s9335_s3 + $0x750] sm:$0xff]  ;;  %v5714_v21 = vpack.c.bf16 %v4629_v58, %v4628_v28  ;;  %v4700_v28 = vld [vmem:[%s9335_s3 + $0x880] sm:$0xff]  ;;  %v3086_v1 = vadd.f32 %v9095_v9, %v3006_v2  ;;  %v4735_v13 = vld [vmem:[%s9335_s3 + $0x998] sm:$0xff]  ;;  %v5726_v58 = vpack.c.bf16 %v4635_v24, %v4634_v31 }
 0x26c   : > { %5735 = vmatpush3.bf16.msra.mxu1 %v5734_v32  ;;  %5701 = vmatprep.subr.bf16.mxu0 %v5700_v11  ;;  %v4663_v32 = vld [vmem:[%s9335_s3 + $0x758] sm:$0xff]  ;;  %v4646_v11 = vld [vmem:[%s9335_s3 + $0x6d0] sm:$0xff]  ;;  %v4684_v2 = vld [vmem:[%s9335_s3 + $0x800] sm:$0xff]  ;;  %v5760_v12 = vpack.c.bf16 %v4701_v52, %v4700_v28 }
 0x26d   : > { %5737 = vmatprep.subr.bf16.mxu1 %v5736_v39  ;;  %v5750_v39 = vpack.c.bf16 %v4663_v32, %v4662_v40  ;;  %v5716_v46 = vpack.c.bf16 %v4647_v59, %v4646_v11  ;;  %v4734_v48 = vld [vmem:[%s9335_s3 + $0x990] sm:$0xff]  ;;  %v9119_v40 = vpop.permute.xlu0 %3059  ;;  %v3101_v11 = vmax.f32 %v3081_v51, 0.0  ;;  %v3106_v41 = vmax.f32 %v3086_v1, 0.0  ;;  %v4691_v51 = vld [vmem:[%s9335_s3 + $0x838] sm:$0xff]  ;;  %v4708_v28 = vld [vmem:[%s9335_s3 + $0x8c0] sm:$0xff] }
 0x26e   : > { %v4718_v32 = vld [vmem:[%s9335_s3 + $0x910] sm:$0xff]  ;;  %v3084_v6 = vadd.f32 %v9119_v40, %v3004_v38  ;;  %v5796_v8 = vpack.c.bf16 %v4735_v13, %v4734_v48  ;;  %v4709_v1 = vld [vmem:[%s9335_s3 + $0x8c8] sm:$0xff]  ;;  %v4743_v48 = vld [vmem:[%s9335_s3 + $0x9d8] sm:$0xff] }
 0x26f   : > { %5703 = vmatpush3.bf16.msra.mxu0 %v5702_v17  ;;  %v4665_v17 = vld [vmem:[%s9335_s3 + $0x768] sm:$0xff]  ;;  %v4702_v59 = vld [vmem:[%s9335_s3 + $0x890] sm:$0xff] }
 0x270   : > { %5739 = vmatpush3.bf16.msra.mxu1 %v5738_v60  ;;  %5705 = vmatprep.subr.bf16.mxu0 %v5704_v34  ;;  %v4648_v60 = vld [vmem:[%s9335_s3 + $0x6e0] sm:$0xff]  ;;  %v4649_v34 = vld [vmem:[%s9335_s3 + $0x6e8] sm:$0xff]  ;;  %v4690_v24 = vld [vmem:[%s9335_s3 + $0x830] sm:$0xff] }
 0x271   : > { %5741 = vmatprep.subr.bf16.mxu1 %v5740_v5  ;;  %v5754_v5 = vpack.c.bf16 %v4665_v17, %v4664_v37  ;;  %v5720_v61 = vpack.c.bf16 %v4649_v34, %v4648_v60  ;;  %v4720_v37 = vld [vmem:[%s9335_s3 + $0x920] sm:$0xff]  ;;  %v5800_v17 = vpack.c.bf16 %v4737_v27, %v4736_v18  ;;  %v4721_v60 = vld [vmem:[%s9335_s3 + $0x928] sm:$0xff]  ;;  %v4742_v52 = vld [vmem:[%s9335_s3 + $0x9d0] sm:$0xff]  ;;  %v5774_v13 = vpack.c.bf16 %v4691_v51, %v4690_v24 }
 0x272   : > { %v4704_v34 = vld [vmem:[%s9335_s3 + $0x8a0] sm:$0xff]  ;;  %v4694_v18 = vld [vmem:[%s9335_s3 + $0x850] sm:$0xff]  ;;  %v4695_v27 = vld [vmem:[%s9335_s3 + $0x858] sm:$0xff] }
 0x273   : > { %5707 = vmatpush3.bf16.msra.mxu0 %v5706_v55  ;;  %v4667_v55 = vld [vmem:[%s9335_s3 + $0x778] sm:$0xff]  ;;  %v5768_v22 = vpack.c.bf16 %v4705_v19, %v4704_v34  ;;  %v4696_v34 = vld [vmem:[%s9335_s3 + $0x860] sm:$0xff]  ;;  %v4697_v19 = vld [vmem:[%s9335_s3 + $0x868] sm:$0xff] }
 0x274   : > { %5743 = vmatpush3.bf16.msra.mxu1 %v5742_v47  ;;  %5709 = vmatprep.subr.bf16.mxu0 %v5708_v26  ;;  %v4650_v47 = vld [vmem:[%s9335_s3 + $0x6f0] sm:$0xff]  ;;  %v4651_v26 = vld [vmem:[%s9335_s3 + $0x6f8] sm:$0xff]  ;;  %v4153_v24 = vld [vmem:[%s9337_s5] sm:$0xff] }
 0x275   : > { %5745 = vmatprep.subr.bf16.mxu1 %v5744_v30  ;;  %v5758_v30 = vpack.c.bf16 %v4667_v55, %v4666_v4  ;;  %v5724_v15 = vpack.c.bf16 %v4651_v26, %v4650_v47  ;;  %v4689_v4 = vld [vmem:[%s9335_s3 + $0x828] sm:$0xff]  ;;  %v4723_v47 = vld [vmem:[%s9335_s3 + $0x938] sm:$0xff]  ;;  %v4706_v26 = vld [vmem:[%s9335_s3 + $0x8b0] sm:$0xff] }
 0x276   : > { %v4155_v51 = vld [vmem:[%s9337_s5 + $0x10] sm:$0xff] }
 0x277   : > { %5711 = vmatpush3.bf16.msra.mxu0 %v5710_v0  ;;  %v5792_v0 = vpack.c.bf16 %v4733_v23, %v4732_v35  ;;  %v4707_v35 = vld [vmem:[%s9335_s3 + $0x8b8] sm:$0xff]  ;;  %v4740_v23 = vld [vmem:[%s9335_s3 + $0x9c0] sm:$0xff] }
 0x278   : > { %5747 = vmatpush3.bf16.msra.mxu1 %v5746_v50  ;;  %5713 = vmatprep.subr.bf16.mxu0 %v5712_v10  ;;  %v4716_v50 = vld [vmem:[%s9335_s3 + $0x900] sm:$0xff]  ;;  %v4717_v10 = vld [vmem:[%s9335_s3 + $0x908] sm:$0xff]  ;;  %v5772_v31 = vpack.c.bf16 %v4707_v35, %v4706_v26  ;;  %v3085_v26 = vadd.f32 %v9095_v9, %v3005_v43 }
 0x279   : > { %5749 = vmatprep.subr.bf16.mxu1 %v5748_v53  ;;  %v5794_v29 = vpack.c.bf16 %v4717_v10, %v4716_v50  ;;  %v4685_v53 = vld [vmem:[%s9335_s3 + $0x808] sm:$0xff] }
 0x27a   : > { %v5762_v38 = vpack.c.bf16 %v4685_v53, %v4684_v2  ;;  %v4725_v10 = vld [vmem:[%s9335_s3 + $0x948] sm:$0xff]  ;;  %v4726_v53 = vld [vmem:[%s9335_s3 + $0x950] sm:$0xff] }
 0x27b   : > { %5715 = vmatpush3.bf16.msra.mxu0 %v5714_v21  ;;  %v3099_v21 = vmax.f32 %v3079_v14, 0.0  ;;  %v5776_v14 = vpack.c.bf16 %v4709_v1, %v4708_v28  ;;  %v4693_v2 = vld [vmem:[%s9335_s3 + $0x848] sm:$0xff] }
 0x27c   : > { %5751 = vmatpush3.bf16.msra.mxu1 %v5750_v39  ;;  %5717 = vmatprep.subr.bf16.mxu0 %v5716_v46  ;;  %v5798_v39 = vpack.c.bf16 %v4719_v54, %v4718_v32  ;;  %v5764_v46 = vpack.c.bf16 %v4703_v63, %v4702_v59  ;;  %v5812_v32 = vpack.c.bf16 %v4743_v48, %v4742_v52  ;;  %v4745_v54 = vld [vmem:[%s9335_s3 + $0x9e8] sm:$0xff] }
 0x27d   : > { %5753 = vmatprep.subr.bf16.mxu1 %v5752_v44  ;;  %v3104_v44 = vmax.f32 %v3084_v6, 0.0  ;;  %v4710_v6 = vld [vmem:[%s9335_s3 + $0x8d0] sm:$0xff] }
 0x27f   : > { %5719 = vmatpush3.bf16.msra.mxu0 %v5718_v36  ;;  %v4739_v36 = vld [vmem:[%s9335_s3 + $0x9b8] sm:$0xff] }
 0x280   : > { %5755 = vmatpush3.bf16.msra.mxu1 %v5754_v5  ;;  %5721 = vmatprep.subr.bf16.mxu0 %v5720_v61  ;;  %v5766_v5 = vpack.c.bf16 %v4687_v56, %v4686_v45  ;;  %v5802_v61 = vpack.c.bf16 %v4721_v60, %v4720_v37  ;;  %v5804_v55 = vpack.c.bf16 %v4739_v36, %v4738_v16  ;;  %v4713_v45 = vld [vmem:[%s9335_s3 + $0x8e8] sm:$0xff]  ;;  %v4746_v56 = vld [vmem:[%s9335_s3 + $0x9f0] sm:$0xff]  ;;  %v4747_v37 = vld [vmem:[%s9335_s3 + $0x9f8] sm:$0xff] }
 0x281   : > { %5757 = vmatprep.subr.bf16.mxu1 %v5756_v33  ;;  %v4722_v33 = vld [vmem:[%s9335_s3 + $0x930] sm:$0xff]  ;;  %v5820_v36 = vpack.c.bf16 %v4747_v37, %v4746_v56 }
 0x282   : > { %v4730_v16 = vld [vmem:[%s9335_s3 + $0x970] sm:$0xff] }
 0x283   : > { %5723 = vmatpush3.bf16.msra.mxu0 %v5722_v42  ;;  %v4741_v42 = vld [vmem:[%s9335_s3 + $0x9c8] sm:$0xff] }
 0x284   : > { %5759 = vmatpush3.bf16.msra.mxu1 %v5758_v30  ;;  %5725 = vmatprep.subr.bf16.mxu0 %v5724_v15  ;;  %v5770_v30 = vpack.c.bf16 %v4689_v4, %v4688_v57  ;;  %v5806_v15 = vpack.c.bf16 %v4723_v47, %v4722_v33  ;;  %v5808_v50 = vpack.c.bf16 %v4741_v42, %v4740_v23  ;;  %v4699_v47 = vld [vmem:[%s9335_s3 + $0x878] sm:$0xff]  ;;  %v3105_v42 = vmax.f32 %v3085_v26, 0.0 }
 0x285   : > { %5793 = vmatprep.subr.bf16.mxu1 %v5792_v0  ;;  %v4724_v0 = vld [vmem:[%s9335_s3 + $0x940] sm:$0xff]  ;;  %v5786_v57 = vpack.c.bf16 %v4697_v19, %v4696_v34  ;;  %v3083_v23 = vadd.f32 %v9119_v40, %v3003_v7  ;;  %v5825_v7 = vpack.c.bf16 %v4154_v3, %v4153_v24  ;;  %v5869_v40 = vmov 0.0|0.0  }
 0x287   : > { %3930 = vmatmul.mubr.f32.vlgmr.msra.gmra.mrb[166].mxu1 %v3101_v11  ;;  %5727 = vmatpush3.bf16.msra.mxu0 %v5726_v58  ;;  %v5810_v58 = vpack.c.bf16 %v4725_v10, %v4724_v0  ;;  %v4727_v11 = vld [vmem:[%s9335_s3 + $0x958] sm:$0xff] }
 0x288   : > { %5795 = vmatpush3.bf16.msra.mxu1 %v5794_v29  ;;  %4137 = vmatprep.mubr.f32.mxu1 %v3106_v41  ;;  %v4692_v29 = vld [vmem:[%s9335_s3 + $0x840] sm:$0xff]  ;;  %v5814_v63 = vpack.c.bf16 %v4727_v11, %v4726_v53  ;;  %v4156_v0 = vld [vmem:[%s9337_s5 + $0x18] sm:$0xff] }
 0x289   : > { %5761 = vmatprep.subr.bf16.mxu0 %v5760_v12  ;;  %5797 = vmatprep.subr.bf16.mxu1 %v5796_v8  ;;  %v4711_v12 = vld [vmem:[%s9335_s3 + $0x8d8] sm:$0xff]  ;;  %v4744_v8 = vld [vmem:[%s9335_s3 + $0x9e0] sm:$0xff]  ;;  %v5778_v59 = vpack.c.bf16 %v4693_v2, %v4692_v29 }
 0x28a   : > { %3826 = vmatmul.mubr.f32.vlgmr.msra.gmra.mrb[166].mxu0 %v3099_v21  ;;  %v5780_v41 = vpack.c.bf16 %v4711_v12, %v4710_v6  ;;  %v5816_v21 = vpack.c.bf16 %v4745_v54, %v4744_v8 }
 0x28b   : > { %5763 = vmatpush3.bf16.msra.mxu0 %v5762_v38  ;;  %4033 = vmatprep.mubr.f32.mxu0 %v3104_v44  ;;  %v4728_v38 = vld [vmem:[%s9335_s3 + $0x960] sm:$0xff]  ;;  %v5782_v44 = vpack.c.bf16 %v4695_v27, %v4694_v18 }
 0x28c   : > { %5799 = vmatpush3.bf16.msra.mxu1 %v5798_v39  ;;  %5765 = vmatprep.subr.bf16.mxu0 %v5764_v46  ;;  %v4729_v39 = vld [vmem:[%s9335_s3 + $0x968] sm:$0xff]  ;;  %v4712_v46 = vld [vmem:[%s9335_s3 + $0x8e0] sm:$0xff] }
 0x28d   : > { %5801 = vmatprep.subr.bf16.mxu1 %v5800_v17  ;;  %v5818_v17 = vpack.c.bf16 %v4729_v39, %v4728_v38  ;;  %v5784_v60 = vpack.c.bf16 %v4713_v45, %v4712_v46 }
 0x28f   : > { %5767 = vmatpush3.bf16.msra.mxu0 %v5766_v5  ;;  %v4731_v5 = vld [vmem:[%s9335_s3 + $0x978] sm:$0xff] }
 0x290   : > { %5803 = vmatpush3.bf16.msra.mxu1 %v5802_v61  ;;  %5769 = vmatprep.subr.bf16.mxu0 %v5768_v22  ;;  %v4714_v61 = vld [vmem:[%s9335_s3 + $0x8f0] sm:$0xff]  ;;  %v4715_v22 = vld [vmem:[%s9335_s3 + $0x8f8] sm:$0xff]  ;;  %v5822_v4 = vpack.c.bf16 %v4731_v5, %v4730_v16  ;;  %v4749_v16 = vld [vmem:[%s9338_s6] ss:$0 sm:$0xff] }
 0x291   : > { %5805 = vmatprep.subr.bf16.mxu1 %v5804_v55  ;;  %v5788_v33 = vpack.c.bf16 %v4715_v22, %v4714_v61  ;;  %v4698_v55 = vld [vmem:[%s9335_s3 + $0x870] sm:$0xff] }
 0x292   : > { %v5790_v35 = vpack.c.bf16 %v4699_v47, %v4698_v55 }
 0x293   : > { %5771 = vmatpush3.bf16.msra.mxu0 %v5770_v30  ;;  %v3103_v30 = vmax.f32 %v3083_v23, 0.0 }
 0x294   : > { %5807 = vmatpush3.bf16.msra.mxu1 %v5806_v15  ;;  %5773 = vmatprep.subr.bf16.mxu0 %v5772_v31 }
 0x295   : > { %5809 = vmatprep.subr.bf16.mxu1 %v5808_v50  ;;  %v5828_v50 = vpack.c.bf16 %v4156_v0, %v4155_v51 }
 0x297   : > { %5775 = vmatpush3.bf16.msra.mxu0 %v5774_v13 }
 0x298   : > { %5811 = vmatpush3.bf16.msra.mxu1 %v5810_v58  ;;  %5777 = vmatprep.subr.bf16.mxu0 %v5776_v14 }
 0x299   : > { %5813 = vmatprep.subr.bf16.mxu1 %v5812_v32 }
 0x29b   : > { %5779 = vmatpush3.bf16.msra.mxu0 %v5778_v59 }
 0x29c   : > { %5815 = vmatpush3.bf16.msra.mxu1 %v5814_v63  ;;  %5781 = vmatprep.subr.bf16.mxu0 %v5780_v41 }
 0x29d   : > { %5817 = vmatprep.subr.bf16.mxu1 %v5816_v21 }
 0x29f   : > { %5783 = vmatpush3.bf16.msra.mxu0 %v5782_v44 }
 0x2a0   : > { %5819 = vmatpush3.bf16.msra.mxu1 %v5818_v17  ;;  %5785 = vmatprep.subr.bf16.mxu0 %v5784_v60  ;;  %v4748_v17 = vld [vmem:[%s9336_s4] ss:$0 sm:$0xff] }
 0x2a1   : > { %5821 = vmatprep.subr.bf16.mxu1 %v5820_v36 }
 0x2a3   : > { %5787 = vmatpush3.bf16.msra.mxu0 %v5786_v57 }
 0x2a4   : > { %5823 = vmatpush3.bf16.msra.mxu1 %v5822_v4  ;;  %5789 = vmatprep.subr.bf16.mxu0 %v5788_v33 }
 0x2a7   : > { %4138 = vmatmul.mubr.f32.vlgmr.msra.gmra.mrb[168].mxu1 %v3105_v42  ;;  %5791 = vmatpush3.bf16.msra.mxu0 %v5790_v35 }
 0x2a8   : > { %5824 = vmatprep.subr.bf16.mxu0 %v5869_v40 }
 0x2aa   : > { %4034 = vmatmul.mubr.f32.vlgmr.msra.gmra.mrb[168].mxu0 %v3103_v30 }
 0x2ab   : > { %5826 = vmatpush3.bf16.msra.mxu0 %v5825_v7  ;;  %5117 = vmatprep.mubr.msk.f32.mxu0 %vm5870_vm1, %v9356_v62 }
 0x2ac   : > { %5827 = vmatprep.subr.bf16.mxu0 %v5869_v40 }
 0x2af   : > { %5829 = vmatpush3.bf16.msra.mxu0 %v5828_v50 }
 0x2f9   : > { %v4821_v15 = vpop.f32.mrb[160].mxu1 }
 0x2fa   : > { %v4822_v31 = vpop.f32.mrb[161].mxu1 }
 0x2fb   : > { %v4823_v20 = vadd.f32 %v4822_v31, %v4821_v15 }
 0x2fd   : > { %v4786_v49 = vpop.f32.mrb[160].mxu0 }
 0x2fe   : > { %v4787_v43 = vpop.f32.mrb[161].mxu0 }
 0x2ff   : > { %v4788_v9 = vadd.f32 %v4787_v43, %v4786_v49 }
 0x301   : > { %v3309_v25 = vadd.f32 %v4823_v20, %v4788_v9 }
 0x319   : > { %v4891_v10 = vpop.f32.mrb[162].mxu1 }
 0x31a   : > { %v4892_v28 = vpop.f32.mrb[163].mxu1 }
 0x31b   : > { %v4893_v1 = vadd.f32 %v4892_v28, %v4891_v10 }
 0x31d   : > { %v4856_v52 = vpop.f32.mrb[162].mxu0 }
 0x31e   : > { %v4857_v48 = vpop.f32.mrb[163].mxu0 }
 0x31f   : > { %v4858_v13 = vadd.f32 %v4857_v48, %v4856_v52 }
 0x321   : > { %v3415_v58 = vadd.f32 %v4858_v13, %v3309_v25 }
 0x323   : > { %v3519_v14 = vadd.f32 %v4893_v1, %v3415_v58 }
 0x33a   : > { %v4961_v29 = vpop.f32.mrb[164].mxu1 }
 0x33b   : > { %v4962_v2 = vpop.f32.mrb[165].mxu1 }
 0x33c   : > { %v4963_v53 = vadd.f32 %v4962_v2, %v4961_v29 }
 0x33d   : > { %v4926_v32 = vpop.f32.mrb[164].mxu0 }
 0x33e   : > { %v4927_v11 = vpop.f32.mrb[165].mxu0 }
 0x33f   : > { %v4928_v6 = vadd.f32 %v4927_v11, %v4926_v32 }
 0x341   : > { %v3623_v12 = vadd.f32 %v4928_v6, %v3519_v14 }
 0x343   : > { %v3727_v8 = vadd.f32 %v4963_v53, %v3623_v12 }
 0x35a   : > { %v5031_v54 = vpop.f32.mrb[166].mxu1 }
 0x35b   : > { %v5032_v59 = vpop.f32.mrb[167].mxu1 }
 0x35c   : > { %v5033_v63 = vadd.f32 %v5032_v59, %v5031_v54 }
 0x35d   : > { %v4996_v62 = vpop.f32.mrb[166].mxu0 }
 0x35e   : > { %v4997_v41 = vpop.f32.mrb[167].mxu0 }
 0x35f   : > { %v4998_v18 = vadd.f32 %v4997_v41, %v4996_v62 }
 0x361   : > { %v3831_v27 = vadd.f32 %v4998_v18, %v3727_v8 }
 0x363   : > { %v3935_v38 = vadd.f32 %v5033_v63, %v3831_v27 }
 0x37a   : > { %v5101_v21 = vpop.f32.mrb[168].mxu1 }
 0x37b   : > { %v5102_v39 = vpop.f32.mrb[169].mxu1 }
 0x37c   : > { %v5103_v46 = vadd.f32 %v5102_v39, %v5101_v21 }
 0x37d   : > { %v5066_v45 = vpop.f32.mrb[168].mxu0 }
 0x37e   : > { %v5067_v56 = vpop.f32.mrb[169].mxu0 }
 0x37f   : > { %v5068_v37 = vadd.f32 %v5067_v56, %v5066_v45 }
 0x381   : > { %v4039_v44 = vadd.f32 %v5068_v37, %v3935_v38 }
 0x383   : > { %v4143_v60 = vadd.f32 %v5103_v46, %v4039_v44 }
 0x385   : > { %v4151_v34 = vadd.f32 %v4748_v17, %v4143_v60 }
 0x387   : > { %v4152_v19 = vmax.f32 %v4151_v34, 0.0 }
 0x389   : > { %5118 = vmatmul.mubr.msk.f32.vlgmr.msra.gmra.mrb[170].mxu0 %vm4164_vm2, %v4152_v19 }
 0x45c   : > { %v4234_v36 = vpop.f32.mrb[170].mxu0 }
 0x45d   : > { %v4235_v5 = vadd.f32 %v4749_v16, %v4234_v36  ;;  %v5119_v61 = vpop.f32.mrb[171].mxu0 }
 0x45f   : > { %4238 = vst [vmem:[%s281_s20] sm:$0xff] %v4235_v5 }
 0x460 PF: > { %s17_s24 = sadd.s32 1, %s5865_s24  }
 0x461   : > { %p14_p5 = scmp.ge.s32.totalorder %s17_s24, 4  }
 0x463   :  { %16 = sbr.rel (!%p14_p5) target bundleno = 1 (0x1), region = 87 }

</bundles_post_ra>
